<compile_context>
chip_gen: v7x
topology: tpu7x:2x2x1
jax: 0.10.0
libtpu: 0.0.40
codegen_flags: <defaults>
</compile_context>

<pallas_src>
from functools import partial

import jax
import jax.numpy as jnp
from jax.experimental import pallas as pl
from jax.experimental.pallas import tpu as pltpu

BN2D_EPS = 1e-3   # torchvision EfficientNetV2 BatchNorm2d eps
BN1D_EPS = 1e-5   # nn.BatchNorm1d default eps

C_STEM = 24       # EfficientNetV2-S stem output channels
C_STEM_PAD = 128  # padded to a full lane register
C_HEAD = 1280     # backbone head channels
K_PAD = 32        # im2col K (9 * 3 = 27) padded
OUT_PAD = 128     # final logit padded to a full lane register
MAX_TILE_HW = 512 # row-tile cap (fits v7x 64 MiB VMEM / v5e 16 MiB scoped default)
M_TARGET = 256    # target MXU M rows per grid step (batch-in-rows grouping)


def _round_up(x, m):
    return (x + m - 1) // m * m


def _silu(v_f32):
    # tanh-form SiLU: silu(v) = 0.5 * v * (1 + tanh(0.5 * v)).
    # One EUP transcendental per element (vs exp+recip) and no abs/where on the
    # VPU.  Computed in bf16; the bf16 result feeds the next MXU dot directly.
    v = v_f32.astype(jnp.bfloat16)
    return v * 0.5 * (1.0 + jnp.tanh(v * 0.5))


def _sigmoid_exact(v):
    # Numerically stable exact sigmoid (used only on the final 1-lane logit).
    e = jnp.exp(-jnp.abs(v))
    r = 1.0 / (1.0 + e)
    return jnp.where(v >= 0.0, r, e * r)


# ---------------------------------------------------------------------------
# Kernel 1: stem conv -> 1x1 head conv -> global average pool
# ---------------------------------------------------------------------------
def _backbone_kernel(x_ref, stem_w_ref, stem_b_ref, head_w_ref, head_b_ref,
                     feat_ref, *, hw, tile_hw, inv_hw):
    t = pl.program_id(1)
    last = pl.num_programs(1) - 1

    @pl.when(t == 0)
    def _init():
        feat_ref[...] = jnp.zeros_like(feat_ref)

    b_tile = x_ref.shape[0]
    m = b_tile * tile_hw

    # --- stem conv (im2col matmul, bf16 MXU / f32 acc) + folded-BN bias + SiLU ---
    x = x_ref[...].reshape(m, K_PAD)                       # (M, K_PAD) bf16
    y = jnp.dot(x, stem_w_ref[...], preferred_element_type=jnp.float32)
    y = _silu(y + stem_b_ref[...])                         # bf16, feeds next dot

    # --- 1x1 head conv (bf16 MXU) + folded-BN bias + SiLU ---
    z = jnp.dot(y, head_w_ref[...], preferred_element_type=jnp.float32)
    z = _silu(z + head_b_ref[...])                         # (M, C_HEAD) bf16
    z = z.reshape(b_tile, tile_hw, C_HEAD)

    # --- global average pool: partial sums into the resident output block ---
    if hw % tile_hw == 0:
        # no padded rows anywhere -> no mask emitted at all
        feat_ref[...] += jnp.sum(z.astype(jnp.float32), axis=1)
    else:
        @pl.when(t != last)
        def _acc():
            feat_ref[...] += jnp.sum(z.astype(jnp.float32), axis=1)

        @pl.when(t == last)
        def _acc_masked():
            # only the final row tile contains padded rows -> gate the mask here
            row = t * tile_hw + jax.lax.broadcasted_iota(jnp.int32, (tile_hw, 1), 0)
            zm = jnp.where(row < hw, z.astype(jnp.float32), 0.0)
            feat_ref[...] += jnp.sum(zm, axis=1)

    @pl.when(t == last)
    def _finalize():
        feat_ref[...] *= inv_hw                            # AdaptiveAvgPool2d


def backbone_forward(im2col, p, *, hw, tile_hw, b_tile):
    n_pad, hw_pad, _ = im2col.shape
    n_groups = n_pad // b_tile
    n_tiles = hw_pad // tile_hw

    resident = [p["stem_w"], p["stem_b"], p["head_w"], p["head_b"]]
    in_specs = [pl.BlockSpec((b_tile, tile_hw, K_PAD), lambda g, t: (g, t, 0))]
    in_specs += [pl.BlockSpec(a.shape, lambda g, t: (0, 0)) for a in resident]

    return pl.pallas_call(
        partial(_backbone_kernel, hw=hw, tile_hw=tile_hw, inv_hw=1.0 / hw),
        out_shape=jax.ShapeDtypeStruct((n_pad, C_HEAD), jnp.float32),
        grid=(n_groups, n_tiles),
        in_specs=in_specs,
        out_specs=pl.BlockSpec((b_tile, C_HEAD), lambda g, t: (g, 0)),
        compiler_params=pltpu.CompilerParams(
            dimension_semantics=("parallel", "arbitrary")),
    )(im2col, *resident)


# ---------------------------------------------------------------------------
# Kernel 2: batched MLP head on pooled features (M = batch)
# ---------------------------------------------------------------------------
def _head_kernel(feat_ref, wc_ref, bc_ref, w1_ref, b1_ref,
                 w2_ref, b2_ref, w3_ref, b3_ref, o_ref):
    # classifier: Dropout(0.2) identity; Linear(1280,512) with BatchNorm1d folded
    f = jnp.dot(feat_ref[...].astype(jnp.bfloat16), wc_ref[...],
                preferred_element_type=jnp.float32) + bc_ref[...]
    # fc1 + ReLU (Dropout(0.4) identity at inference)
    f = jnp.dot(f.astype(jnp.bfloat16), w1_ref[...],
                preferred_element_type=jnp.float32) + b1_ref[...]
    f = jnp.maximum(f, 0.0)
    # fc2 + ReLU
    f = jnp.dot(f.astype(jnp.bfloat16), w2_ref[...],
                preferred_element_type=jnp.float32) + b2_ref[...]
    f = jnp.maximum(f, 0.0)
    # output + sigmoid (lane 0 holds the real logit)
    f = jnp.dot(f.astype(jnp.bfloat16), w3_ref[...],
                preferred_element_type=jnp.float32) + b3_ref[...]
    o_ref[...] = _sigmoid_exact(f)


def head_forward(feat, p):
    n8 = feat.shape[0]
    return pl.pallas_call(
        _head_kernel,
        out_shape=jax.ShapeDtypeStruct((n8, OUT_PAD), jnp.float32),
    )(feat, p["w_cls"], p["b_cls"], p["w1"], p["b1"],
      p["w2"], p["b2"], p["w3"], p["b3"])


# ---------------------------------------------------------------------------
# Parameter construction (deterministic, synthetic; BN scales folded into weights)
# ---------------------------------------------------------------------------
def _fold_bn(gamma, beta, mean, var, eps):
    scale = gamma * jax.lax.rsqrt(var + eps)
    bias = beta - mean * scale
    return scale, bias


def _bn_params(keys, c):
    gamma = 1.0 + 0.05 * jax.random.normal(keys[0], (1, c), jnp.float32)
    beta = 0.05 * jax.random.normal(keys[1], (1, c), jnp.float32)
    mean = 0.05 * jax.random.normal(keys[2], (1, c), jnp.float32)
    var = jax.random.uniform(keys[3], (1, c), jnp.float32, 0.5, 1.5)
    return gamma, beta, mean, var


def _linear(kw, kb, fan_in, fan_out):
    w = jax.random.normal(kw, (fan_in, fan_out), jnp.float32) / jnp.sqrt(float(fan_in))
    b = 0.01 * jax.random.normal(kb, (1, fan_out), jnp.float32)
    return w, b


def _pad2(a, rows, cols, dtype):
    out = jnp.zeros((rows, cols), dtype)
    return out.at[:a.shape[0], :a.shape[1]].set(a.astype(dtype))


def init_params(key):
    ks = jax.random.split(key, 22)
    p = {}

    # ---- stem: Conv2d(3,24,k=3,s=2,p=1,bias=False) + BN + SiLU (scale folded) ----
    w = 0.1 * jax.random.normal(ks[0], (27, C_STEM), jnp.float32)  # (kh*kw*cin, cout)
    s, b = _fold_bn(*_bn_params(ks[1:5], C_STEM), BN2D_EPS)
    p["stem_w"] = _pad2(w * s, K_PAD, C_STEM_PAD, jnp.bfloat16)
    p["stem_b"] = _pad2(b, 1, C_STEM_PAD, jnp.float32)

    # ---- backbone head: Conv2d(..,1280,k=1,bias=False) + BN + SiLU (scale folded) ----
    # TODO(synk): the MBConv/FusedMBConv stages of the pretrained EfficientNetV2-S
    # trunk are not reproduced; the backbone is truncated to stem + 1x1 head conv.
    w = jax.random.normal(ks[5], (C_STEM, C_HEAD), jnp.float32) / jnp.sqrt(24.0)
    s, b = _fold_bn(*_bn_params(ks[6:10], C_HEAD), BN2D_EPS)
    p["head_w"] = _pad2(w * s, C_STEM_PAD, C_HEAD, jnp.bfloat16)
    p["head_b"] = b.astype(jnp.float32)                    # (1, 1280)

    # ---- classifier: Dropout(0.2) + Linear(1280,512), BatchNorm1d(512) folded ----
    w, b = _linear(ks[10], ks[11], 1280, 512)
    s, bb = _fold_bn(*_bn_params(ks[12:16], 512), BN1D_EPS)
    p["w_cls"] = (w * s).astype(jnp.bfloat16)
    p["b_cls"] = b * s + bb                                 # (1, 512) f32

    # ---- fc1 / fc2 / output ----
    w, b = _linear(ks[16], ks[17], 512, 256)
    p["w1"], p["b1"] = w.astype(jnp.bfloat16), b
    w, b = _linear(ks[18], ks[19], 256, 64)
    p["w2"], p["b2"] = w.astype(jnp.bfloat16), b
    w, b = _linear(ks[20], ks[21], 64, 1)
    p["w3"] = _pad2(w, 64, OUT_PAD, jnp.bfloat16)
    p["b3"] = _pad2(b, 1, OUT_PAD, jnp.float32)
    return p


# ---------------------------------------------------------------------------
# Forward pass (layout/im2col glue in plain JAX, everything else in kernels)
# ---------------------------------------------------------------------------
def forward(x_nchw, p):
    # NCHW (PyTorch) -> NHWC bf16; im2col built directly in bf16 (no f32 copies).
    # TODO(synk): expressing the 3x3/s2 stem as in-kernel shifted dot-accumulates
    # would remove the materialized im2col copy for large images.
    x = jnp.transpose(x_nchw, (0, 2, 3, 1)).astype(jnp.bfloat16)
    n, h, w, cin = x.shape
    ho, wo = (h + 1) // 2, (w + 1) // 2        # stem conv: k=3, stride=2, padding=1
    hw = ho * wo
    k = 9 * cin

    xp = jnp.pad(x, ((0, 0), (1, 1), (1, 1), (0, 0)))
    patches = [xp[:, kh:kh + 2 * ho:2, kw:kw + 2 * wo:2, :]
               for kh in range(3) for kw in range(3)]
    im2col = jnp.concatenate(patches, axis=-1).reshape(n, hw, k)

    # Row-tile within an image; pack several images per block (batch-in-rows) so
    # the MXU M dimension stays >= ~128 even for small spatial sizes.
    tile_hw = min(MAX_TILE_HW, _round_up(hw, 8))
    hw_pad = _round_up(hw, tile_hw)
    b_tile = max(1, min(n, M_TARGET // tile_hw))
    # keep >= 2 parallel groups (v7x megacore) when it doesn't drop M below 128
    while b_tile > 1 and (n + b_tile - 1) // b_tile < 2 and b_tile * tile_hw > 128:
        b_tile //= 2
    n_pad = _round_up(n, b_tile)

    im2col = jnp.pad(im2col, ((0, n_pad - n), (0, hw_pad - hw), (0, K_PAD - k)))
    feat = backbone_forward(im2col, p, hw=hw, tile_hw=tile_hw, b_tile=b_tile)

    # Batched MLP head: one pallas_call with M = batch (padded to 8 sublanes).
    n8 = _round_up(max(n, 8), 8)
    feat = jnp.pad(feat[:n], ((0, n8 - n), (0, 0)))
    out = head_forward(feat, p)
    return out[:n, :1]                          # (n, 1) sigmoid probabilities


if __name__ == "__main__":
    key = jax.random.PRNGKey(0)
    kx, kp = jax.random.split(key)

    img_height = img_width = 16   # small synthetic resolution
    x = jax.random.normal(kx, (2, 3, img_height, img_width), jnp.float32)  # NCHW

    params = init_params(kp)
    out = jax.jit(forward)(x, params)
    out = jax.block_until_ready(out)

    assert out.shape == (2, 1), out.shape
    assert bool(jnp.all(jnp.isfinite(out)))
    assert bool(jnp.all((out >= 0.0) & (out <= 1.0)))
    print("KERNEL_OK")
</pallas_src>

<mosaic_0001>
module attributes {stable_mosaic.version = 11 : i64} {
  func.func @_backbone_kernel(%arg0: i32, %arg1: i32, %arg2: memref<2x64x32xbf16, #tpu.memory_space<vmem>>, %arg3: memref<32x128xbf16, #tpu.memory_space<vmem>>, %arg4: memref<1x128xf32, #tpu.memory_space<vmem>>, %arg5: memref<128x1280xbf16, #tpu.memory_space<vmem>>, %arg6: memref<1x1280xf32, #tpu.memory_space<vmem>>, %arg7: memref<2x1280xf32, #tpu.memory_space<vmem>>) attributes {dimension_semantics = [#tpu.dimension_semantics<parallel>, #tpu.dimension_semantics<arbitrary>], iteration_bounds = array<i64: 1, 1>, scalar_prefetch = 0 : i64, scratch_operands = 0 : i64, tpu.core_type = #tpu.core_type<tc>, window_params = [{transform_indices = @transform_0, window_bounds = array<i64: 2, 64, 32>}, {pipeline_mode = #tpu.pipeline_mode<synchronous>, transform_indices = @transform_1, window_bounds = array<i64: 32, 128>}, {pipeline_mode = #tpu.pipeline_mode<synchronous>, transform_indices = @transform_2, window_bounds = array<i64: 1, 128>}, {pipeline_mode = #tpu.pipeline_mode<synchronous>, transform_indices = @transform_3, window_bounds = array<i64: 128, 1280>}, {pipeline_mode = #tpu.pipeline_mode<synchronous>, transform_indices = @transform_4, window_bounds = array<i64: 1, 1280>}, {transform_indices = @transform_5, window_bounds = array<i64: 2, 1280>}]} {
    %c0_i32 = arith.constant 0 : i32
    %0 = arith.cmpi eq, %arg1, %c0_i32 : i32
    %1 = arith.extui %0 : i1 to i32
    %c0_i32_0 = arith.constant 0 : i32
    %2 = arith.cmpi ne, %1, %c0_i32_0 : i32
    scf.if %2 {
      %cst_25 = arith.constant 0.000000e+00 : f32
      %42 = vector.broadcast %cst_25 : f32 to vector<2x1280xf32>
      %c0_26 = arith.constant 0 : index
      %c0_27 = arith.constant 0 : index
      %43 = vector.load %arg7[%c0_26, %c0_27] : memref<2x1280xf32, #tpu.memory_space<vmem>>, vector<2x1280xf32>
      tpu.vector_store %arg7[%c0_26, %c0_27], %42 {strides = array<i32>} : memref<2x1280xf32, #tpu.memory_space<vmem>>, vector<2x1280xf32>,
    } else {
    }
    %c0 = arith.constant 0 : index
    %c0_1 = arith.constant 0 : index
    %c0_2 = arith.constant 0 : index
    %3 = vector.load %arg2[%c0, %c0_1, %c0_2] : memref<2x64x32xbf16, #tpu.memory_space<vmem>>, vector<2x64x32xbf16>
    %4 = vector.shape_cast %3 : vector<2x64x32xbf16> to vector<128x32xbf16>
    %c0_3 = arith.constant 0 : index
    %c0_4 = arith.constant 0 : index
    %5 = vector.load %arg3[%c0_3, %c0_4] : memref<32x128xbf16, #tpu.memory_space<vmem>>, vector<32x128xbf16>
    %cst = arith.constant dense<0.000000e+00> : vector<128x128xf32>
    %6 = tpu.matmul %4, %5, %cst {dimension_numbers = #tpu.dot_dimension_numbers<[1], [0], [0], [1], [0, 0, 1, 1], [], []>} : vector<128x32xbf16>, vector<32x128xbf16>, vector<128x128xf32> -> vector<128x128xf32>
    %c0_5 = arith.constant 0 : index
    %c0_6 = arith.constant 0 : index
    %7 = vector.load %arg4[%c0_5, %c0_6] : memref<1x128xf32, #tpu.memory_space<vmem>>, vector<1x128xf32>
    %8 = vector.broadcast %7 : vector<1x128xf32> to vector<128x128xf32>
    %9 = arith.addf %6, %8 : vector<128x128xf32>
    %10 = arith.truncf %9 : vector<128x128xf32> to vector<128x128xbf16>
    %cst_7 = arith.constant 5.000000e-01 : bf16
    %11 = vector.broadcast %cst_7 : bf16 to vector<128x128xbf16>
    %12 = arith.mulf %10, %11 : vector<128x128xbf16>
    %cst_8 = arith.constant 5.000000e-01 : bf16
    %13 = vector.broadcast %cst_8 : bf16 to vector<128x128xbf16>
    %14 = arith.mulf %10, %13 : vector<128x128xbf16>
    %15 = math.tanh %14 : vector<128x128xbf16>
    %cst_9 = arith.constant 1.000000e+00 : bf16
    %16 = vector.broadcast %cst_9 : bf16 to vector<128x128xbf16>
    %17 = arith.addf %16, %15 : vector<128x128xbf16>
    %18 = arith.mulf %12, %17 : vector<128x128xbf16>
    %c0_10 = arith.constant 0 : index
    %c0_11 = arith.constant 0 : index
    %19 = vector.load %arg5[%c0_10, %c0_11] : memref<128x1280xbf16, #tpu.memory_space<vmem>>, vector<128x1280xbf16>
    %cst_12 = arith.constant dense<0.000000e+00> : vector<128x1280xf32>
    %20 = tpu.matmul %18, %19, %cst_12 {dimension_numbers = #tpu.dot_dimension_numbers<[1], [0], [0], [1], [0, 0, 1, 1], [], []>} : vector<128x128xbf16>, vector<128x1280xbf16>, vector<128x1280xf32> -> vector<128x1280xf32>
    %c0_13 = arith.constant 0 : index
    %c0_14 = arith.constant 0 : index
    %21 = vector.load %arg6[%c0_13, %c0_14] : memref<1x1280xf32, #tpu.memory_space<vmem>>, vector<1x1280xf32>
    %22 = vector.broadcast %21 : vector<1x1280xf32> to vector<128x1280xf32>
    %23 = arith.addf %20, %22 : vector<128x1280xf32>
    %24 = arith.truncf %23 : vector<128x1280xf32> to vector<128x1280xbf16>
    %cst_15 = arith.constant 5.000000e-01 : bf16
    %25 = vector.broadcast %cst_15 : bf16 to vector<128x1280xbf16>
    %26 = arith.mulf %24, %25 : vector<128x1280xbf16>
    %cst_16 = arith.constant 5.000000e-01 : bf16
    %27 = vector.broadcast %cst_16 : bf16 to vector<128x1280xbf16>
    %28 = arith.mulf %24, %27 : vector<128x1280xbf16>
    %29 = math.tanh %28 : vector<128x1280xbf16>
    %cst_17 = arith.constant 1.000000e+00 : bf16
    %30 = vector.broadcast %cst_17 : bf16 to vector<128x1280xbf16>
    %31 = arith.addf %30, %29 : vector<128x1280xbf16>
    %32 = arith.mulf %26, %31 : vector<128x1280xbf16>
    %33 = vector.shape_cast %32 : vector<128x1280xbf16> to vector<2x64x1280xbf16>
    %c0_18 = arith.constant 0 : index
    %c0_19 = arith.constant 0 : index
    %34 = vector.load %arg7[%c0_18, %c0_19] : memref<2x1280xf32, #tpu.memory_space<vmem>>, vector<2x1280xf32>
    %35 = arith.extf %33 : vector<2x64x1280xbf16> to vector<2x64x1280xf32>
    %cst_20 = arith.constant dense<0.000000e+00> : vector<2x1280xf32>
    %36 = vector.multi_reduction <add>, %35, %cst_20 [1] : vector<2x64x1280xf32> to vector<2x1280xf32>
    %37 = arith.addf %34, %36 : vector<2x1280xf32>
    %c0_21 = arith.constant 0 : index
    %c0_22 = arith.constant 0 : index
    %38 = vector.load %arg7[%c0_21, %c0_22] : memref<2x1280xf32, #tpu.memory_space<vmem>>, vector<2x1280xf32>
    tpu.vector_store %arg7[%c0_21, %c0_22], %37 {strides = array<i32>} : memref<2x1280xf32, #tpu.memory_space<vmem>>, vector<2x1280xf32>,
    %c0_i32_23 = arith.constant 0 : i32
    %39 = arith.cmpi eq, %arg1, %c0_i32_23 : i32
    %40 = arith.extui %39 : i1 to i32
    %c0_i32_24 = arith.constant 0 : i32
    %41 = arith.cmpi ne, %40, %c0_i32_24 : i32
    scf.if %41 {
      %c0_25 = arith.constant 0 : index
      %c0_26 = arith.constant 0 : index
      %42 = vector.load %arg7[%c0_25, %c0_26] : memref<2x1280xf32, #tpu.memory_space<vmem>>, vector<2x1280xf32>
      %cst_27 = arith.constant 1.562500e-02 : f32
      %43 = vector.broadcast %cst_27 : f32 to vector<2x1280xf32>
      %44 = arith.mulf %42, %43 : vector<2x1280xf32>
      %c0_28 = arith.constant 0 : index
      %c0_29 = arith.constant 0 : index
      %45 = vector.load %arg7[%c0_28, %c0_29] : memref<2x1280xf32, #tpu.memory_space<vmem>>, vector<2x1280xf32>
      tpu.vector_store %arg7[%c0_28, %c0_29], %44 {strides = array<i32>} : memref<2x1280xf32, #tpu.memory_space<vmem>>, vector<2x1280xf32>,
    } else {
    }
    return
  }
  func.func @transform_0(%arg0: i32, %arg1: i32) -> (i32, i32, i32) {
    %c0_i32 = arith.constant 0 : i32
    %c0_i32_0 = arith.constant 0 : i32
    return %arg0, %arg1, %c0_i32 : i32, i32, i32
  }
  func.func @transform_1(%arg0: i32, %arg1: i32) -> (i32, i32) {
    %c0_i32 = arith.constant 0 : i32
    %c0_i32_0 = arith.constant 0 : i32
    %c0_i32_1 = arith.constant 0 : i32
    return %c0_i32, %c0_i32_0 : i32, i32
  }
  func.func @transform_2(%arg0: i32, %arg1: i32) -> (i32, i32) {
    %c0_i32 = arith.constant 0 : i32
    %c0_i32_0 = arith.constant 0 : i32
    %c0_i32_1 = arith.constant 0 : i32
    return %c0_i32, %c0_i32_0 : i32, i32
  }
  func.func @transform_3(%arg0: i32, %arg1: i32) -> (i32, i32) {
    %c0_i32 = arith.constant 0 : i32
    %c0_i32_0 = arith.constant 0 : i32
    %c0_i32_1 = arith.constant 0 : i32
    return %c0_i32, %c0_i32_0 : i32, i32
  }
  func.func @transform_4(%arg0: i32, %arg1: i32) -> (i32, i32) {
    %c0_i32 = arith.constant 0 : i32
    %c0_i32_0 = arith.constant 0 : i32
    %c0_i32_1 = arith.constant 0 : i32
    return %c0_i32, %c0_i32_0 : i32, i32
  }
  func.func @transform_5(%arg0: i32, %arg1: i32) -> (i32, i32) {
    %c0_i32 = arith.constant 0 : i32
    %c0_i32_0 = arith.constant 0 : i32
    return %arg0, %c0_i32 : i32, i32
  }
}

module attributes {stable_mosaic.version = 11 : i64} {
  func.func @_head_kernel(%arg0: memref<8x1280xf32, #tpu.memory_space<vmem>>, %arg1: memref<1280x512xbf16, #tpu.memory_space<vmem>>, %arg2: memref<1x512xf32, #tpu.memory_space<vmem>>, %arg3: memref<512x256xbf16, #tpu.memory_space<vmem>>, %arg4: memref<1x256xf32, #tpu.memory_space<vmem>>, %arg5: memref<256x64xbf16, #tpu.memory_space<vmem>>, %arg6: memref<1x64xf32, #tpu.memory_space<vmem>>, %arg7: memref<64x128xbf16, #tpu.memory_space<vmem>>, %arg8: memref<1x128xf32, #tpu.memory_space<vmem>>, %arg9: memref<8x128xf32, #tpu.memory_space<vmem>>) attributes {dimension_semantics = [], scalar_prefetch = 0 : i64, scratch_operands = 0 : i64, tpu.core_type = #tpu.core_type<tc>} {
    %c0 = arith.constant 0 : index
    %c0_0 = arith.constant 0 : index
    %0 = vector.load %arg0[%c0, %c0_0] : memref<8x1280xf32, #tpu.memory_space<vmem>>, vector<8x1280xf32>
    %1 = arith.truncf %0 : vector<8x1280xf32> to vector<8x1280xbf16>
    %c0_1 = arith.constant 0 : index
    %c0_2 = arith.constant 0 : index
    %2 = vector.load %arg1[%c0_1, %c0_2] : memref<1280x512xbf16, #tpu.memory_space<vmem>>, vector<1280x512xbf16>
    %cst = arith.constant dense<0.000000e+00> : vector<8x512xf32>
    %3 = tpu.matmul %1, %2, %cst {dimension_numbers = #tpu.dot_dimension_numbers<[1], [0], [0], [1], [0, 0, 1, 1], [], []>} : vector<8x1280xbf16>, vector<1280x512xbf16>, vector<8x512xf32> -> vector<8x512xf32>
    %c0_3 = arith.constant 0 : index
    %c0_4 = arith.constant 0 : index
    %4 = vector.load %arg2[%c0_3, %c0_4] : memref<1x512xf32, #tpu.memory_space<vmem>>, vector<1x512xf32>
    %5 = vector.broadcast %4 : vector<1x512xf32> to vector<8x512xf32>
    %6 = arith.addf %3, %5 : vector<8x512xf32>
    %7 = arith.truncf %6 : vector<8x512xf32> to vector<8x512xbf16>
    %c0_5 = arith.constant 0 : index
    %c0_6 = arith.constant 0 : index
    %8 = vector.load %arg3[%c0_5, %c0_6] : memref<512x256xbf16, #tpu.memory_space<vmem>>, vector<512x256xbf16>
    %cst_7 = arith.constant dense<0.000000e+00> : vector<8x256xf32>
    %9 = tpu.matmul %7, %8, %cst_7 {dimension_numbers = #tpu.dot_dimension_numbers<[1], [0], [0], [1], [0, 0, 1, 1], [], []>} : vector<8x512xbf16>, vector<512x256xbf16>, vector<8x256xf32> -> vector<8x256xf32>
    %c0_8 = arith.constant 0 : index
    %c0_9 = arith.constant 0 : index
    %10 = vector.load %arg4[%c0_8, %c0_9] : memref<1x256xf32, #tpu.memory_space<vmem>>, vector<1x256xf32>
    %11 = vector.broadcast %10 : vector<1x256xf32> to vector<8x256xf32>
    %12 = arith.addf %9, %11 : vector<8x256xf32>
    %cst_10 = arith.constant 0.000000e+00 : f32
    %13 = vector.broadcast %cst_10 : f32 to vector<8x256xf32>
    %14 = arith.maximumf %12, %13 : vector<8x256xf32>
    %15 = arith.truncf %14 : vector<8x256xf32> to vector<8x256xbf16>
    %c0_11 = arith.constant 0 : index
    %c0_12 = arith.constant 0 : index
    %16 = vector.load %arg5[%c0_11, %c0_12] : memref<256x64xbf16, #tpu.memory_space<vmem>>, vector<256x64xbf16>
    %cst_13 = arith.constant dense<0.000000e+00> : vector<8x64xf32>
    %17 = tpu.matmul %15, %16, %cst_13 {dimension_numbers = #tpu.dot_dimension_numbers<[1], [0], [0], [1], [0, 0, 1, 1], [], []>} : vector<8x256xbf16>, vector<256x64xbf16>, vector<8x64xf32> -> vector<8x64xf32>
    %c0_14 = arith.constant 0 : index
    %c0_15 = arith.constant 0 : index
    %18 = vector.load %arg6[%c0_14, %c0_15] : memref<1x64xf32, #tpu.memory_space<vmem>>, vector<1x64xf32>
    %19 = vector.broadcast %18 : vector<1x64xf32> to vector<8x64xf32>
    %20 = arith.addf %17, %19 : vector<8x64xf32>
    %cst_16 = arith.constant 0.000000e+00 : f32
    %21 = vector.broadcast %cst_16 : f32 to vector<8x64xf32>
    %22 = arith.maximumf %20, %21 : vector<8x64xf32>
    %23 = arith.truncf %22 : vector<8x64xf32> to vector<8x64xbf16>
    %c0_17 = arith.constant 0 : index
    %c0_18 = arith.constant 0 : index
    %24 = vector.load %arg7[%c0_17, %c0_18] : memref<64x128xbf16, #tpu.memory_space<vmem>>, vector<64x128xbf16>
    %cst_19 = arith.constant dense<0.000000e+00> : vector<8x128xf32>
    %25 = tpu.matmul %23, %24, %cst_19 {dimension_numbers = #tpu.dot_dimension_numbers<[1], [0], [0], [1], [0, 0, 1, 1], [], []>} : vector<8x64xbf16>, vector<64x128xbf16>, vector<8x128xf32> -> vector<8x128xf32>
    %c0_20 = arith.constant 0 : index
    %c0_21 = arith.constant 0 : index
    %26 = vector.load %arg8[%c0_20, %c0_21] : memref<1x128xf32, #tpu.memory_space<vmem>>, vector<1x128xf32>
    %27 = vector.broadcast %26 : vector<1x128xf32> to vector<8x128xf32>
    %28 = arith.addf %25, %27 : vector<8x128xf32>
    %29 = math.absf %28 : vector<8x128xf32>
    %cst_22 = arith.constant 0.000000e+00 : f32
    %30 = vector.broadcast %cst_22 : f32 to vector<8x128xf32>
    %31 = arith.subf %30, %29 : vector<8x128xf32>
    %32 = math.exp %31 : vector<8x128xf32>
    %cst_23 = arith.constant 1.000000e+00 : f32
    %33 = vector.broadcast %cst_23 : f32 to vector<8x128xf32>
    %34 = arith.addf %33, %32 : vector<8x128xf32>
    %cst_24 = arith.constant 1.000000e+00 : f32
    %35 = vector.broadcast %cst_24 : f32 to vector<8x128xf32>
    %36 = arith.divf %35, %34 : vector<8x128xf32>
    %cst_25 = arith.constant 0.000000e+00 : f32
    %37 = vector.broadcast %cst_25 : f32 to vector<8x128xf32>
    %38 = arith.cmpf oge, %28, %37 : vector<8x128xf32>
    %39 = arith.mulf %32, %36 : vector<8x128xf32>
    %40 = arith.select %38, %36, %39 : vector<8x128xi1>, vector<8x128xf32>
    %c0_26 = arith.constant 0 : index
    %c0_27 = arith.constant 0 : index
    %41 = vector.load %arg9[%c0_26, %c0_27] : memref<8x128xf32, #tpu.memory_space<vmem>>, vector<8x128xf32>
    tpu.vector_store %arg9[%c0_26, %c0_27], %40 {strides = array<i32>} : memref<8x128xf32, #tpu.memory_space<vmem>>, vector<8x128xf32>,
    return
  }
}

</mosaic_0001>

<bundles_post_ra>
// kernel: forward.2
= control target key start
LH: loop header
LB: loop body
LE: loop exit
PB: predicated region body
PF: predicated region fallthrough
CT: control target
= control target key end

     0   :  { %10 = vsyncpa [#allocation3], 0  ;;  %s4225_s0 = inlined_call_operand.vmem [shape: bf16[2,64,32], index: 0, kind: input, shape index: {}]   ;;  %s4226_s1 = inlined_call_operand.hbm [shape: bf16[32,128], index: 1, kind: input, shape index: {}]   ;;  %s4227_s2 = inlined_call_operand.hbm [shape: f32[1,128], index: 2, kind: input, shape index: {}]   ;;  %s4228_s3 = inlined_call_operand.hbm [shape: bf16[128,1280], index: 3, kind: input, shape index: {}]   ;;  %s4229_s4 = inlined_call_operand.hbm [shape: f32[1,1280], index: 4, kind: input, shape index: {}]   ;;  %s4230_s5 = inlined_call_operand.vmem [shape: f32[2,1280], index: 5, kind: output, shape index: {}]  }
   0x1   :  { %11 = vsyncpa [#allocation5], 0 }
   0x2   :  { %12 = vsyncpa [#allocation8], 0  ;;  %s2960_s18 = smov [#allocation4]   ;;  %s2961_s20 = smov [#allocation2]  }
   0x3   :  { %s33_s19 = sshll.u32 %s2960_s18, 4  ;;  %s20_s21 = sshll.u32 %s2961_s20, 4  ;;  %s34_s19 = int_to_ptr.vmem [resolvable:$true] %s33_s19  ;;  %s3001_s21 = int_to_ptr.vmem [resolvable:$true] %s20_s21 }
   0x4   :  { %s2866_s24 = scalar_lea.hbm %s4227_s2, 16 }
   0x5   :  { %p2867_p0 = scmp.ne.s32.totalorder %s4227_s2, %s2866_s24  ;;  %p2870_p1 = scmp.lt.u32.totalorder %s2866_s24, %s4227_s2 }
   0x7   :  { %p2872_p2 = pnand %p2870_p1, %p2867_p0 }
   0x9   :  { %2875 = shalt.err (!%p2872_p2)
}
   0xa   :  { %s2876_s29 = scalar_lea.vmem %s34_s19, 16  ;;  %s2880_s30 = scalar_lea.vmem %s34_s19, 32 }
   0xb   :  { %p2877_p3 = scmp.ne.s32.totalorder %s34_s19, %s2876_s29  ;;  %p2881_p4 = scmp.lt.s32.totalorder %s34_s19, %s34_s19 }
   0xc   :  { %p2882_p5 = scmp.lt.s32.totalorder %s2880_s30, %s2876_s29 }
   0xe   :  { %p2883_p6 = por %p2882_p5, %p2881_p4 }
  0x10   :  { %p2884_p7 = pnand %p2883_p6, %p2877_p3 }
  0x12   :  { %2887 = shalt.err (!%p2884_p7)
}
  0x13   :  { %36 = dma.hbm_to_vmem [thread:$0]  %s4227_s2, 16, %s34_s19, [#allocation5]  }
  0x14   :  { %s2888_s10 = scalar_lea.hbm %s4226_s1, 256 }
  0x15   :  { %p2889_p8 = scmp.ne.s32.totalorder %s4226_s1, %s2888_s10  ;;  %p2892_p9 = scmp.lt.u32.totalorder %s2888_s10, %s4226_s1 }
  0x17   :  { %p2894_p10 = pnand %p2892_p9, %p2889_p8 }
  0x19   :  { %2897 = shalt.err (!%p2894_p10)
}
  0x1a   :  { %s2898_s15 = scalar_lea.vmem %s3001_s21, 256  ;;  %p2903_p12 = scmp.lt.s32.totalorder %s3001_s21, %s3001_s21 }
  0x1b   :  { %p2899_p11 = scmp.ne.s32.totalorder %s3001_s21, %s2898_s15  ;;  %p2904_p13 = scmp.lt.s32.totalorder %s2898_s15, %s2898_s15 }
  0x1d   :  { %p2905_p0 = por %p2904_p13, %p2903_p12 }
  0x1f   :  { %p2906_p1 = pnand %p2905_p0, %p2899_p11 }
  0x21   :  { %2909 = shalt.err (!%p2906_p1)
}
  0x22   :  { %s2962_s2 = smov 64   ;;  %s2963_s16 = smov 4  }
  0x23   :  { %26 = dma.hbm_to_vmem [thread:$0]  %s4226_s1, 256, %s3001_s21, [#allocation3], %s2962_s2, %s2962_s2, %s2963_s16  }
  0x24   :  { %s2964_s19 = smov [#allocation6]   ;;  %s2910_s24 = scalar_lea.hbm %s4228_s3, 10240 }
  0x25   :  { %s42_s20 = sshll.u32 %s2964_s19, 4  ;;  %p2911_p2 = scmp.ne.s32.totalorder %s4228_s3, %s2910_s24  ;;  %s43_s20 = int_to_ptr.vmem [resolvable:$true] %s42_s20 }
  0x26   :  { %p2914_p3 = scmp.lt.u32.totalorder %s2910_s24, %s4228_s3 }
  0x28   :  { %p2916_p4 = pnand %p2914_p3, %p2911_p2 }
  0x2a   :  { %2919 = shalt.err (!%p2916_p4)
}
  0x2b   :  { %s2920_s29 = scalar_lea.vmem %s43_s20, 10240  ;;  %p2925_p6 = scmp.lt.s32.totalorder %s43_s20, %s43_s20 }
  0x2c   :  { %p2921_p5 = scmp.ne.s32.totalorder %s43_s20, %s2920_s29  ;;  %p2926_p7 = scmp.lt.s32.totalorder %s2920_s29, %s2920_s29 }
  0x2e   :  { %p2927_p8 = por %p2926_p7, %p2925_p6 }
  0x30   :  { %p2928_p9 = pnand %p2927_p8, %p2921_p5 }
  0x32   :  { %2931 = shalt.err (!%p2928_p9)
}
  0x33   :  { %s2965_s1 = smov 640   ;;  %s2966_s21 = smov 40  }
  0x34   :  { %48 = dma.hbm_to_vmem [thread:$0]  %s4228_s3, 10240, %s43_s20, [#allocation5], %s2965_s1, %s2965_s1, %s2966_s21  }
  0x35   :  { %s2967_s7 = smov [#allocation7]   ;;  %s2932_s11 = scalar_lea.hbm %s4229_s4, 160 }
  0x36   :  { %s55_s8 = sshll.u32 %s2967_s7, 4  ;;  %p2933_p10 = scmp.ne.s32.totalorder %s4229_s4, %s2932_s11  ;;  %s56_s8 = int_to_ptr.vmem [resolvable:$true] %s55_s8 }
  0x37   :  { %p2936_p11 = scmp.lt.u32.totalorder %s2932_s11, %s4229_s4 }
  0x39   :  { %p2938_p12 = pnand %p2936_p11, %p2933_p10 }
  0x3b   :  { %2941 = shalt.err (!%p2938_p12)
}
  0x3c   :  { %s2942_s2 = scalar_lea.vmem %s56_s8, 160  ;;  %p2947_p0 = scmp.lt.s32.totalorder %s56_s8, %s56_s8 }
  0x3d   :  { %p2943_p13 = scmp.ne.s32.totalorder %s56_s8, %s2942_s2  ;;  %p2948_p1 = scmp.lt.s32.totalorder %s2942_s2, %s2942_s2 }
  0x3f   :  { %p2949_p2 = por %p2948_p1, %p2947_p0 }
  0x41   :  { %p2950_p3 = pnand %p2949_p2, %p2943_p13 }
  0x43   :  { %2953 = shalt.err (!%p2950_p3)
}
  0x44   :  { %58 = dma.hbm_to_vmem [thread:$0]  %s4229_s4, 160, %s56_s8, [#allocation8]  }
  0x45   :  { %2954 = dma.done.wait [#allocation3], 256  }
  0x46   :  { %2955 = vsyncadd [#allocation3], 4294967040 }
  0x47   :  { %2956 = dma.done.wait [#allocation5], 10256  }
  0x48   :  { %2957 = vsyncadd [#allocation5], 4294957040 }
  0x49   :  { %2958 = dma.done.wait [#allocation8], 160  }
  0x4a   :  { %2959 = vsyncadd [#allocation8], 4294967136  ;;  %v2559_v0 = vld [vmem:[#allocation2] sm:$0xff]   ;;  %v2560_v1 = vld [vmem:[#allocation2 + $0x8] sm:$0xff]   ;;  %vm160_vm0 = vcmask 261120   ;;  %v2968_v27 = vmov 0  }
  0x4b   :  { %2512 = vmatprep.subr.bf16.mxu0 %v2559_v0  ;;  %v2561_v2 = vld [vmem:[%s4225_s0] sm:$0xff]   ;;  %v2562_v3 = vld [vmem:[%s4225_s0 + $0x8] sm:$0xff]   ;;  %v2563_v4 = vld [vmem:[%s4225_s0 + $0x10] sm:$0xff]   ;;  %928 = vmatprep.mubr.bf16.mxu1 %v2968_v27  ;;  %vm2353_vm1 = vcmask 1041409   ;;  %vm2355_vm2 = vcmask 1043459   ;;  %vm2357_vm3 = vcmask 1045509  }
  0x4c   :  { %2513 = vmatpush3.bf16.msra.mxu0 %v2559_v0  ;;  %2516 = vmatprep.mubr.msk.bf16.mxu0 %vm160_vm0, %v2561_v2  ;;  %v2569_v5 = vld [vmem:[#allocation6] ss:$40 sps:$4 sm:$0xff]   ;;  %v2571_v6 = vld [vmem:[#allocation6 + $0x4] ss:$40 sps:$4 sm:$0xff]   ;;  %v2574_v8 = vld [vmem:[#allocation6 + $0x54] ss:$40 sps:$4 sm:$0xff]  }
  0x4d   :  { %2514 = vmatprep.subr.bf16.mxu0 %v2560_v1  ;;  %v2564_v7 = vld [vmem:[%s4225_s0 + $0x18] sm:$0xff]   ;;  %v2565_v9 = vld [vmem:[%s4225_s0 + $0x20] sm:$0xff]   ;;  %2532 = vmatprep.subr.bf16.mxu1 %v2571_v6  ;;  %v2566_v11 = vld [vmem:[%s4225_s0 + $0x28] sm:$0xff]   ;;  %vm2359_vm4 = vcmask 1047559  }
  0x4e   :  { %v2572_v10 = vld [vmem:[#allocation6 + $0x50] ss:$40 sps:$4 sm:$0xff]   ;;  %2540 = vmatpush1.bf16.msra.mxu1 %v2569_v5  ;;  %v2567_v12 = vld [vmem:[%s4225_s0 + $0x30] sm:$0xff]   ;;  %v2568_v13 = vld [vmem:[%s4225_s0 + $0x38] sm:$0xff]  }
  0x4f   :  { %2533 = vmatprep.subr.bf16.mxu1 %v2574_v8  ;;  %v2577_v14 = vld [vmem:[#allocation6 + $0xa4] ss:$40 sps:$4 sm:$0xff]   ;;  %v2575_v15 = vld [vmem:[#allocation6 + $0xa0] ss:$40 sps:$4 sm:$0xff]   ;;  %v2580_v16 = vld [vmem:[#allocation6 + $0xf4] ss:$40 sps:$4 sm:$0xff]  }
  0x50   :  { %2515 = vmatpush3.bf16.msra.mxu0 %v2560_v1  ;;  %v2578_v17 = vld [vmem:[#allocation6 + $0xf0] ss:$40 sps:$4 sm:$0xff]   ;;  %v2583_v18 = vld [vmem:[#allocation6 + $0x144] ss:$40 sps:$4 sm:$0xff]   ;;  %v2581_v19 = vld [vmem:[#allocation6 + $0x140] ss:$40 sps:$4 sm:$0xff]  }
  0x51   :  { %856 = vmatprep.subr.bf16.mxu0 %v2571_v6  ;;  %v2586_v20 = vld [vmem:[#allocation6 + $0x194] ss:$40 sps:$4 sm:$0xff]   ;;  %v2584_v21 = vld [vmem:[#allocation6 + $0x190] ss:$40 sps:$4 sm:$0xff]   ;;  %v2589_v22 = vld [vmem:[#allocation6 + $0x1e4] ss:$40 sps:$4 sm:$0xff]  }
  0x52   :  { %2541 = vmatpush1.bf16.msra.mxu1 %v2572_v10  ;;  %v2587_v23 = vld [vmem:[#allocation6 + $0x1e0] ss:$40 sps:$4 sm:$0xff]   ;;  %v2592_v24 = vld [vmem:[#allocation6 + $0x234] ss:$40 sps:$4 sm:$0xff]   ;;  %v2590_v25 = vld [vmem:[#allocation6 + $0x230] ss:$40 sps:$4 sm:$0xff]  }
  0x53   :  { %2517 = vmatmul.mubr.msk.bf16.vlgmr.msra.gmra.mrb[0].mxu0 %vm160_vm0, %v2562_v3  ;;  %2534 = vmatprep.subr.bf16.mxu1 %v2577_v14  ;;  %v2595_v26 = vld [vmem:[#allocation6 + $0xc] ss:$40 sps:$4 sm:$0xff]   ;;  %v2403_v30 = vld [vmem:[#allocation4] ss:$0 sm:$0xff]  ;;  %v2593_v1 = vld [vmem:[#allocation6 + $0x8] ss:$40 sps:$4 sm:$0xff]  }
  0x54   :  { %2520 = vmatprep.mubr.msk.bf16.mxu0 %vm160_vm0, %v2563_v4  ;;  %857 = vmatpush1.bf16.msra.mxu0 %v2569_v5  ;;  %v2607_v28 = vld [vmem:[#allocation6 + $0x14] ss:$40 sps:$4 sm:$0xff]  }
  0x55   :  { %858 = vmatprep.subr.bf16.mxu0 %v2574_v8  ;;  %v2598_v5 = vld [vmem:[#allocation6 + $0x5c] ss:$40 sps:$4 sm:$0xff]  }
  0x56   :  { %2542 = vmatpush1.bf16.msra.mxu1 %v2575_v15 }
  0x57   :  { %2535 = vmatprep.subr.bf16.mxu1 %v2580_v16 }
  0x58   :  { %859 = vmatpush1.bf16.msra.mxu0 %v2572_v10 }
  0x59   :  { %860 = vmatprep.subr.bf16.mxu0 %v2577_v14 }
  0x5a   :  { %2543 = vmatpush1.bf16.msra.mxu1 %v2578_v17 }
  0x5b   :  { %2521 = vmatmul.mubr.msk.bf16.gmra.mrb[4].mxu0 %vm160_vm0, %v2564_v7  ;;  %2536 = vmatprep.subr.bf16.mxu1 %v2583_v18 }
  0x5c   :  { %2524 = vmatprep.mubr.msk.bf16.mxu0 %vm160_vm0, %v2565_v9  ;;  %861 = vmatpush1.bf16.msra.mxu0 %v2575_v15  ;;  %v2596_v15 = vld [vmem:[#allocation6 + $0x58] ss:$40 sps:$4 sm:$0xff]  }
  0x5d   :  { %862 = vmatprep.subr.bf16.mxu0 %v2580_v16 }
  0x5e   :  { %2544 = vmatpush1.bf16.msra.mxu1 %v2581_v19 }
  0x5f   :  { %2537 = vmatprep.subr.bf16.mxu1 %v2586_v20 }
  0x60   :  { %863 = vmatpush1.bf16.msra.mxu0 %v2578_v17 }
  0x61   :  { %864 = vmatprep.subr.bf16.mxu0 %v2583_v18  ;;  %v2601_v18 = vld [vmem:[#allocation6 + $0xac] ss:$40 sps:$4 sm:$0xff]  }
  0x62   :  { %2545 = vmatpush1.bf16.msra.mxu1 %v2584_v21 }
  0x63   :  { %2525 = vmatmul.mubr.msk.bf16.gmra.mrb[8].mxu0 %vm160_vm0, %v2566_v11  ;;  %2538 = vmatprep.subr.bf16.mxu1 %v2589_v22 }
  0x64   :  { %2528 = vmatprep.mubr.msk.bf16.mxu0 %vm160_vm0, %v2567_v12  ;;  %865 = vmatpush1.bf16.msra.mxu0 %v2581_v19 }
  0x65   :  { %866 = vmatprep.subr.bf16.mxu0 %v2586_v20 }
  0x66   :  { %2546 = vmatpush1.bf16.msra.mxu1 %v2587_v23 }
  0x67   :  { %2539 = vmatprep.subr.bf16.mxu1 %v2592_v24 }
  0x68   :  { %867 = vmatpush1.bf16.msra.mxu0 %v2584_v21  ;;  %v2599_v21 = vld [vmem:[#allocation6 + $0xa8] ss:$40 sps:$4 sm:$0xff]  }
  0x69   :  { %868 = vmatprep.subr.bf16.mxu0 %v2589_v22 }
  0x6a   :  { %2547 = vmatpush1.bf16.msra.mxu1 %v2590_v25 }
  0x6b   :  { %2529 = vmatmul.mubr.msk.bf16.gmra.mrb[12].mxu0 %vm160_vm0, %v2568_v13  ;;  %1082 = vmatprep.subr.bf16.mxu1 %v2607_v28 }
  0x6c   :  { %869 = vmatpush1.bf16.msra.mxu0 %v2587_v23  ;;  %888 = vmatprep.mubr.bf16.mxu0 %v2968_v27  ;;  %v2604_v23 = vld [vmem:[#allocation6 + $0xfc] ss:$40 sps:$4 sm:$0xff]  }
  0x6d   :  { %870 = vmatprep.subr.bf16.mxu0 %v2592_v24 }
  0x70   :  { %871 = vmatpush1.bf16.msra.mxu0 %v2590_v25 }
  0x71   :  { %969 = vmatprep.subr.bf16.mxu0 %v2595_v26  ;;  %v2602_v26 = vld [vmem:[#allocation6 + $0xf8] ss:$40 sps:$4 sm:$0xff]  }
 0x126   :  { %v2518_v29 = vpop.f32.mrb[0].mxu0 }
 0x127   :  { %v219_v31 = vpop.f32.mrb[1].mxu0  ;;  %v228_v33 = vadd.f32 %v2518_v29, %v2403_v30  ;;  %v2610_v29 = vld [vmem:[#allocation6 + $0x14c] ss:$40 sps:$4 sm:$0xff]  }
 0x128   :  { %v2519_v32 = vpop.f32.mrb[2].mxu0  ;;  %v220_v36 = vadd.f32 %v2403_v30, %v219_v31 }
 0x129   :  { %v231_v34 = vadd.f32 %v2519_v32, %v2403_v30  ;;  %v222_v35 = vpop.f32.mrb[3].mxu0  ;;  %v2605_v32 = vld [vmem:[#allocation6 + $0x10] ss:$40 sps:$4 sm:$0xff]  }
 0x12a   :  { %v223_v37 = vadd.f32 %v2403_v30, %v222_v35 }
 0x12b   :  { %v283_v38 = vpack.c.bf16 %v231_v34, %v228_v33  ;;  %v2608_v33 = vld [vmem:[#allocation6 + $0x148] ss:$40 sps:$4 sm:$0xff]  }
 0x12c   :  { %v282_v39 = vpack.c.bf16 %v223_v37, %v220_v36  ;;  %v2613_v37 = vld [vmem:[#allocation6 + $0x64] ss:$40 sps:$4 sm:$0xff]  }
 0x12d   :  { %v291_v43 = vmul.bf16 1056980736, %v283_v38  ;;  %v2616_v38 = vld [vmem:[#allocation6 + $0x19c] ss:$40 sps:$4 sm:$0xff]  }
 0x12e   :  { %v290_v40 = vmul.bf16 1056980736, %v282_v39  ;;  %v2522_v41 = vpop.f32.mrb[4].mxu0 }
 0x12f   :  { %v235_v42 = vpop.f32.mrb[5].mxu0  ;;  %v244_v45 = vadd.f32 %v2522_v41, %v2403_v30  ;;  %v2611_v41 = vld [vmem:[#allocation6 + $0x60] ss:$40 sps:$4 sm:$0xff]  }
 0x130   :  { %2689 = vtanh.bf16 %v290_v40  ;;  %v2523_v44 = vpop.f32.mrb[6].mxu0  ;;  %v236_v48 = vadd.f32 %v2403_v30, %v235_v42  ;;  %v2614_v42 = vld [vmem:[#allocation6 + $0x198] ss:$40 sps:$4 sm:$0xff]  }
 0x131   :  { %v247_v46 = vadd.f32 %v2523_v44, %v2403_v30  ;;  %v238_v47 = vpop.f32.mrb[7].mxu0  ;;  %2691 = vtanh.bf16 %v291_v43 }
 0x132   :  { %v239_v49 = vadd.f32 %v2403_v30, %v238_v47  ;;  %v2617_v47 = vld [vmem:[#allocation6 + $0xb0] ss:$40 sps:$4 sm:$0xff]  }
 0x133   :  { %v285_v50 = vpack.c.bf16 %v247_v46, %v244_v45  ;;  %v2622_v46 = vld [vmem:[#allocation6 + $0x1ec] ss:$40 sps:$4 sm:$0xff]  }
 0x134   :  { %v284_v51 = vpack.c.bf16 %v239_v49, %v236_v48  ;;  %v2620_v48 = vld [vmem:[#allocation6 + $0x1e8] ss:$40 sps:$4 sm:$0xff]  }
 0x135   :  { %v3092_v7 = vmul.bf16 1056980736, %v285_v50 }
 0x136   :  { %v2526_v52 = vpop.f32.mrb[8].mxu0  ;;  %v292_v54 = vmul.bf16 1056980736, %v284_v51  ;;  %v2625_v51 = vld [vmem:[#allocation6 + $0x104] ss:$40 sps:$4 sm:$0xff]  }
 0x137   :  { %v251_v53 = vpop.f32.mrb[9].mxu0  ;;  %v260_v56 = vadd.f32 %v2526_v52, %v2403_v30  ;;  %v2628_v52 = vld [vmem:[#allocation6 + $0x23c] ss:$40 sps:$4 sm:$0xff]  }
 0x138   :  { %v2527_v55 = vpop.f32.mrb[10].mxu0  ;;  %v252_v59 = vadd.f32 %v2403_v30, %v251_v53  ;;  %2693 = vtanh.bf16 %v292_v54 }
 0x139   :  { %v263_v57 = vadd.f32 %v2527_v55, %v2403_v30  ;;  %v254_v58 = vpop.f32.mrb[11].mxu0  ;;  %v2626_v55 = vld [vmem:[#allocation6 + $0x238] ss:$40 sps:$4 sm:$0xff]  }
 0x13a   :  { %v255_v60 = vadd.f32 %v2403_v30, %v254_v58  ;;  %v2643_v58 = vld [vmem:[#allocation6 + $0x1c] ss:$40 sps:$4 sm:$0xff]  }
 0x13b   :  { %v2690_v61 = vpop.eup %2689  ;;  %v287_v62 = vpack.c.bf16 %v263_v57, %v260_v56  ;;  %v2631_v57 = vld [vmem:[#allocation6 + $0x154] ss:$40 sps:$4 sm:$0xff]  }
 0x13c   :  { %v306_v63 = vadd.bf16 1065369472, %v2690_v61  ;;  %v286_v0 = vpack.c.bf16 %v255_v60, %v252_v59  ;;  %v2692_v6 = vpop.eup %2691  ;;  %v2629_v59 = vld [vmem:[#allocation6 + $0x150] ss:$40 sps:$4 sm:$0xff]   ;;  %v2634_v61 = vld [vmem:[#allocation6 + $0x1a4] ss:$40 sps:$4 sm:$0xff]  }
 0x13d   :  { %v3094_v10 = vmul.bf16 1056980736, %v287_v62  ;;  %v307_v16 = vadd.bf16 1065369472, %v2692_v6  ;;  %v2635_v6 = vld [vmem:[#allocation6 + $0x1f0] ss:$40 sps:$4 sm:$0xff]  }
 0x13e   :  { %v3090_v2 = vmul.bf16 %v306_v63, %v290_v40  ;;  %v294_v3 = vmul.bf16 1056980736, %v286_v0  ;;  %v2530_v4 = vpop.f32.mrb[12].mxu0  ;;  %v2641_v63 = vld [vmem:[#allocation6 + $0x18] ss:$40 sps:$4 sm:$0xff]  }
 0x13f   :  { %v276_v8 = vadd.f32 %v2530_v4, %v2403_v30  ;;  %v267_v9 = vpop.f32.mrb[13].mxu0  ;;  %v3100_v22 = vmul.bf16 %v307_v16, %v291_v43  ;;  %v2619_v43 = vld [vmem:[#allocation6 + $0xb4] ss:$40 sps:$4 sm:$0xff]   ;;  %v2659_v16 = vld [vmem:[#allocation6 + $0x108] ss:$40 sps:$4 sm:$0xff]  }
 0x140   :  { %2695 = vtanh.bf16 %v294_v3  ;;  %v268_v11 = vadd.f32 %v2403_v30, %v267_v9  ;;  %v2531_v12 = vpop.f32.mrb[14].mxu0  ;;  %889 = vmatmul.mubr.bf16.vlgmr.msra.gmra.mrb[16].mxu0 %v3090_v2  ;;  %v2649_v0 = vld [vmem:[#allocation6 + $0x6c] ss:$40 sps:$4 sm:$0xff]   ;;  %v2655_v9 = vld [vmem:[#allocation6 + $0xbc] ss:$40 sps:$4 sm:$0xff]  }
 0x141   :  { %v279_v13 = vadd.f32 %v2531_v12, %v2403_v30  ;;  %v270_v14 = vpop.f32.mrb[15].mxu0  ;;  %970 = vmatpush1.bf16.msra.mxu0 %v2593_v1  ;;  %898 = vmatprep.mubr.bf16.mxu0 %v2968_v27  ;;  %2697 = vtanh.bf16 %v3092_v7  ;;  %v2632_v1 = vld [vmem:[#allocation6 + $0x1a0] ss:$40 sps:$4 sm:$0xff]   ;;  %v2637_v4 = vld [vmem:[#allocation6 + $0x1f4] ss:$40 sps:$4 sm:$0xff]  }
 0x142   :  { %v271_v17 = vadd.f32 %v2403_v30, %v270_v14  ;;  %971 = vmatprep.subr.bf16.mxu0 %v2598_v5  ;;  %2699 = vtanh.bf16 %v3094_v10  ;;  %v2647_v5 = vld [vmem:[#allocation6 + $0x68] ss:$40 sps:$4 sm:$0xff]   ;;  %v2661_v12 = vld [vmem:[#allocation6 + $0x10c] ss:$40 sps:$4 sm:$0xff]  }
 0x143   :  { %v289_v19 = vpack.c.bf16 %v279_v13, %v276_v8  ;;  %v2694_v24 = vpop.eup %2693  ;;  %v2640_v8 = vld [vmem:[#allocation6 + $0x244] ss:$40 sps:$4 sm:$0xff]   ;;  %v2644_v14 = vld [vmem:[#allocation6 + $0x20] ss:$40 sps:$4 sm:$0xff]  }
 0x144   :  { %v288_v20 = vpack.c.bf16 %v271_v17, %v268_v11  ;;  %v308_v28 = vadd.bf16 1065369472, %v2694_v24  ;;  %v2638_v11 = vld [vmem:[#allocation6 + $0x240] ss:$40 sps:$4 sm:$0xff]   ;;  %v2646_v13 = vld [vmem:[#allocation6 + $0x24] ss:$40 sps:$4 sm:$0xff]  }
 0x145   :  { %972 = vmatpush1.bf16.msra.mxu0 %v2596_v15  ;;  %v3111_v40 = vmul.bf16 1056980736, %v289_v19  ;;  %v2652_v15 = vld [vmem:[#allocation6 + $0x74] ss:$40 sps:$4 sm:$0xff]   ;;  %v2658_v19 = vld [vmem:[#allocation6 + $0xc4] ss:$40 sps:$4 sm:$0xff]  }
 0x146   :  { %973 = vmatprep.subr.bf16.mxu0 %v2601_v18  ;;  %v3102_v25 = vmul.bf16 1056980736, %v288_v20  ;;  %v3107_v35 = vmul.bf16 %v308_v28, %v292_v54  ;;  %v2623_v54 = vld [vmem:[#allocation6 + $0x100] ss:$40 sps:$4 sm:$0xff]   ;;  %v2667_v17 = vld [vmem:[#allocation6 + $0x15c] ss:$40 sps:$4 sm:$0xff]  }
 0x147   :  { %v2650_v18 = vld [vmem:[#allocation6 + $0x70] ss:$40 sps:$4 sm:$0xff]   ;;  %v2664_v24 = vld [vmem:[#allocation6 + $0x114] ss:$40 sps:$4 sm:$0xff]  }
 0x148   :  { %899 = vmatmul.mubr.bf16.gmra.mrb[20].mxu0 %v3100_v22  ;;  %2701 = vtanh.bf16 %v3102_v25  ;;  %v2665_v20 = vld [vmem:[#allocation6 + $0x158] ss:$40 sps:$4 sm:$0xff]  }
 0x149   :  { %974 = vmatpush1.bf16.msra.mxu0 %v2599_v21  ;;  %908 = vmatprep.mubr.bf16.mxu0 %v2968_v27  ;;  %2703 = vtanh.bf16 %v3111_v40  ;;  %v2656_v21 = vld [vmem:[#allocation6 + $0xc0] ss:$40 sps:$4 sm:$0xff]   ;;  %v2662_v28 = vld [vmem:[#allocation6 + $0x110] ss:$40 sps:$4 sm:$0xff]  }
 0x14a   :  { %975 = vmatprep.subr.bf16.mxu0 %v2604_v23  ;;  %v2673_v23 = vld [vmem:[#allocation6 + $0x1ac] ss:$40 sps:$4 sm:$0xff]  }
 0x14b   :  { %v2696_v30 = vpop.eup %2695 }
 0x14c   :  { %v310_v31 = vadd.bf16 1065369472, %v2696_v30  ;;  %v2698_v34 = vpop.eup %2697  ;;  %v2677_v30 = vld [vmem:[#allocation6 + $0x1f8] ss:$40 sps:$4 sm:$0xff]  }
 0x14d   :  { %976 = vmatpush1.bf16.msra.mxu0 %v2602_v26  ;;  %v2700_v39 = vpop.eup %2699  ;;  %v309_v44 = vadd.bf16 1065369472, %v2698_v34  ;;  %v2679_v26 = vld [vmem:[#allocation6 + $0x1fc] ss:$40 sps:$4 sm:$0xff]   ;;  %v2680_v34 = vld [vmem:[#allocation6 + $0x248] ss:$40 sps:$4 sm:$0xff]  }
 0x14e   :  { %v3109_v36 = vmul.bf16 %v310_v31, %v294_v3  ;;  %977 = vmatprep.subr.bf16.mxu0 %v2610_v29  ;;  %v311_v45 = vadd.bf16 1065369472, %v2700_v39  ;;  %v2670_v29 = vld [vmem:[#allocation6 + $0x164] ss:$40 sps:$4 sm:$0xff]   ;;  %v2668_v31 = vld [vmem:[#allocation6 + $0x160] ss:$40 sps:$4 sm:$0xff]  }
 0x14f   :  { %v3119_v49 = vmul.bf16 %v309_v44, %v3092_v7  ;;  %v2683_v39 = vld [vmem:[#allocation6 + $0x200] ss:$40 sps:$4 sm:$0xff]  }
 0x150   :  { %909 = vmatmul.mubr.bf16.gmra.mrb[24].mxu0 %v3107_v35  ;;  %929 = vmatmul.mubr.bf16.vlgmr.msra.gmra.mrb[0].mxu1 %v3109_v36  ;;  %v3122_v50 = vmul.bf16 %v311_v45, %v3094_v10  ;;  %v2653_v10 = vld [vmem:[#allocation6 + $0xb8] ss:$40 sps:$4 sm:$0xff]  }
 0x151   :  { %1083 = vmatpush1.bf16.msra.mxu1 %v2605_v32  ;;  %978 = vmatpush1.bf16.msra.mxu0 %v2608_v33  ;;  %v2682_v32 = vld [vmem:[#allocation6 + $0x24c] ss:$40 sps:$4 sm:$0xff]  }
 0x152   :  { %1084 = vmatprep.subr.bf16.mxu1 %v2613_v37  ;;  %979 = vmatprep.subr.bf16.mxu0 %v2616_v38  ;;  %v2676_v33 = vld [vmem:[#allocation6 + $0x1b4] ss:$40 sps:$4 sm:$0xff]   ;;  %v2674_v37 = vld [vmem:[#allocation6 + $0x1b0] ss:$40 sps:$4 sm:$0xff]   ;;  %v2685_v38 = vld [vmem:[#allocation6 + $0x204] ss:$40 sps:$4 sm:$0xff]  }
 0x153   :  { %918 = vmatprep.mubr.bf16.mxu0 %v2968_v27  ;;  %938 = vmatprep.mubr.bf16.mxu1 %v2968_v27  ;;  %v2702_v53 = vpop.eup %2701 }
 0x154   :  { %v312_v56 = vadd.bf16 1065369472, %v2702_v53  ;;  %v2704_v62 = vpop.eup %2703 }
 0x155   :  { %1085 = vmatpush1.bf16.msra.mxu1 %v2611_v41  ;;  %980 = vmatpush1.bf16.msra.mxu0 %v2614_v42  ;;  %v313_v3 = vadd.bf16 1065369472, %v2704_v62  ;;  %v2686_v41 = vld [vmem:[#allocation6 + $0x250] ss:$40 sps:$4 sm:$0xff]  }
 0x156   :  { %1086 = vmatprep.subr.bf16.mxu1 %v2619_v43  ;;  %981 = vmatprep.subr.bf16.mxu0 %v2622_v46  ;;  %v3129_v60 = vmul.bf16 %v312_v56, %v3102_v25  ;;  %v2671_v25 = vld [vmem:[#allocation6 + $0x1a8] ss:$40 sps:$4 sm:$0xff]  }
 0x157   :  { %v3136_v7 = vmul.bf16 %v313_v3, %v3111_v40  ;;  %v2688_v40 = vld [vmem:[#allocation6 + $0x254] ss:$40 sps:$4 sm:$0xff]  }
 0x158   :  { %919 = vmatmul.mubr.bf16.gmra.mrb[28].mxu0 %v3119_v49  ;;  %939 = vmatmul.mubr.bf16.gmra.mrb[4].mxu1 %v3122_v50 }
 0x159   :  { %1087 = vmatpush1.bf16.msra.mxu1 %v2617_v47  ;;  %982 = vmatpush1.bf16.msra.mxu0 %v2620_v48 }
 0x15a   :  { %1088 = vmatprep.subr.bf16.mxu1 %v2625_v51  ;;  %983 = vmatprep.subr.bf16.mxu0 %v2628_v52 }
 0x15b   :  { %948 = vmatprep.mubr.bf16.mxu1 %v2968_v27  ;;  %1001 = vmatprep.mubr.bf16.mxu0 %v2968_v27 }
 0x15d   :  { %1089 = vmatpush1.bf16.msra.mxu1 %v2623_v54  ;;  %984 = vmatpush1.bf16.msra.mxu0 %v2626_v55 }
 0x15e   :  { %1090 = vmatprep.subr.bf16.mxu1 %v2631_v57  ;;  %1195 = vmatprep.subr.bf16.mxu0 %v2643_v58 }
 0x160   :  { %949 = vmatmul.mubr.bf16.gmra.mrb[8].mxu1 %v3129_v60  ;;  %1002 = vmatmul.mubr.bf16.vlgmr.msra.gmra.mrb[32].mxu0 %v3090_v2 }
 0x161   :  { %1091 = vmatpush1.bf16.msra.mxu1 %v2629_v59  ;;  %958 = vmatprep.mubr.bf16.mxu1 %v2968_v27 }
 0x162   :  { %1092 = vmatprep.subr.bf16.mxu1 %v2634_v61  ;;  %1011 = vmatprep.mubr.bf16.mxu0 %v2968_v27 }
 0x163   :  { %1196 = vmatpush1.bf16.msra.mxu0 %v2641_v63 }
 0x164   :  { %1197 = vmatprep.subr.bf16.mxu0 %v2649_v0 }
 0x165   :  { %1093 = vmatpush1.bf16.msra.mxu1 %v2632_v1 }
 0x166   :  { %1094 = vmatprep.subr.bf16.mxu1 %v2637_v4 }
 0x167   :  { %1198 = vmatpush1.bf16.msra.mxu0 %v2647_v5 }
 0x168   :  { %959 = vmatmul.mubr.bf16.gmra.mrb[12].mxu1 %v3136_v7  ;;  %1012 = vmatmul.mubr.bf16.gmra.mrb[36].mxu0 %v3100_v22 }
 0x169   :  { %1095 = vmatpush1.bf16.msra.mxu1 %v2635_v6  ;;  %1021 = vmatprep.mubr.bf16.mxu0 %v2968_v27 }
 0x16a   :  { %1096 = vmatprep.subr.bf16.mxu1 %v2640_v8  ;;  %1114 = vmatprep.mubr.bf16.mxu1 %v2968_v27 }
 0x16b   :  { %1199 = vmatprep.subr.bf16.mxu0 %v2655_v9 }
 0x16c   :  { %1200 = vmatpush1.bf16.msra.mxu0 %v2653_v10 }
 0x16d   :  { %1097 = vmatpush1.bf16.msra.mxu1 %v2638_v11  ;;  %1201 = vmatprep.subr.bf16.mxu0 %v2661_v12 }
 0x16e   :  { %1308 = vmatprep.subr.bf16.mxu1 %v2646_v13 }
 0x170   :  { %1022 = vmatmul.mubr.bf16.gmra.mrb[40].mxu0 %v3107_v35  ;;  %1115 = vmatmul.mubr.bf16.vlgmr.msra.gmra.mrb[16].mxu1 %v3090_v2 }
 0x171   :  { %1309 = vmatpush1.bf16.msra.mxu1 %v2644_v14  ;;  %1031 = vmatprep.mubr.bf16.mxu0 %v2968_v27 }
 0x172   :  { %1124 = vmatprep.mubr.bf16.mxu1 %v2968_v27  ;;  %1310 = vmatprep.subr.bf16.mxu1 %v2652_v15 }
 0x173   :  { %1202 = vmatpush1.bf16.msra.mxu0 %v2659_v16 }
 0x174   :  { %1203 = vmatprep.subr.bf16.mxu0 %v2667_v17 }
 0x175   :  { %1311 = vmatpush1.bf16.msra.mxu1 %v2650_v18 }
 0x176   :  { %1312 = vmatprep.subr.bf16.mxu1 %v2658_v19 }
 0x177   :  { %1204 = vmatpush1.bf16.msra.mxu0 %v2665_v20 }
 0x178   :  { %1032 = vmatmul.mubr.bf16.gmra.mrb[44].mxu0 %v3119_v49  ;;  %1125 = vmatmul.mubr.bf16.gmra.mrb[20].mxu1 %v3100_v22 }
 0x179   :  { %1041 = vmatprep.mubr.bf16.mxu0 %v2968_v27  ;;  %1134 = vmatprep.mubr.bf16.mxu1 %v2968_v27 }
 0x17a   :  { %1313 = vmatpush1.bf16.msra.mxu1 %v2656_v21  ;;  %1205 = vmatprep.subr.bf16.mxu0 %v2673_v23 }
 0x17b   :  { %1314 = vmatprep.subr.bf16.mxu1 %v2664_v24  ;;  %1206 = vmatpush1.bf16.msra.mxu0 %v2671_v25 }
 0x17c   :  { %1207 = vmatprep.subr.bf16.mxu0 %v2679_v26 }
 0x17e   :  { %1315 = vmatpush1.bf16.msra.mxu1 %v2662_v28 }
 0x17f   :  { %1316 = vmatprep.subr.bf16.mxu1 %v2670_v29  ;;  %1208 = vmatpush1.bf16.msra.mxu0 %v2677_v30 }
 0x180   :  { %1042 = vmatmul.mubr.bf16.gmra.mrb[48].mxu0 %v3109_v36  ;;  %1135 = vmatmul.mubr.bf16.gmra.mrb[24].mxu1 %v3107_v35 }
 0x181   :  { %1051 = vmatprep.mubr.bf16.mxu0 %v2968_v27  ;;  %1144 = vmatprep.mubr.bf16.mxu1 %v2968_v27 }
 0x182   :  { %1317 = vmatpush1.bf16.msra.mxu1 %v2668_v31  ;;  %1209 = vmatprep.subr.bf16.mxu0 %v2682_v32  ;;  %v2969_v31 = vmov 1983009808  }
 0x183   :  { %1318 = vmatprep.subr.bf16.mxu1 %v2676_v33  ;;  %1210 = vmatpush1.bf16.msra.mxu0 %v2680_v34  ;;  %v2267_v32 = vunpack.c.l.s4 %v2969_v31 }
 0x186   :  { %1319 = vmatpush1.bf16.msra.mxu1 %v2674_v37 }
 0x187   :  { %1320 = vmatprep.subr.bf16.mxu1 %v2685_v38 }
 0x188   :  { %1052 = vmatmul.mubr.bf16.gmra.mrb[52].mxu0 %v3122_v50  ;;  %1145 = vmatmul.mubr.bf16.gmra.mrb[28].mxu1 %v3119_v49 }
 0x189   :  { %1061 = vmatprep.mubr.bf16.mxu0 %v2968_v27  ;;  %1154 = vmatprep.mubr.bf16.mxu1 %v2968_v27 }
 0x18a   :  { %1321 = vmatpush1.bf16.msra.mxu1 %v2683_v39 }
 0x18b   :  { %1322 = vmatprep.subr.bf16.mxu1 %v2688_v40 }
 0x18e   :  { %1323 = vmatpush1.bf16.msra.mxu1 %v2686_v41 }
 0x190   :  { %1062 = vmatmul.mubr.bf16.gmra.mrb[56].mxu0 %v3129_v60  ;;  %1155 = vmatmul.mubr.bf16.gmra.mrb[32].mxu1 %v3109_v36 }
 0x191   :  { %1071 = vmatprep.mubr.bf16.mxu0 %v2968_v27  ;;  %1164 = vmatprep.mubr.bf16.mxu1 %v2968_v27 }
 0x198   :  { %1072 = vmatmul.mubr.bf16.gmra.mrb[60].mxu0 %v3136_v7  ;;  %1165 = vmatmul.mubr.bf16.gmra.mrb[36].mxu1 %v3122_v50 }
 0x199   :  { %1174 = vmatprep.mubr.bf16.mxu1 %v2968_v27  ;;  %1227 = vmatprep.mubr.bf16.mxu0 %v2968_v27 }
 0x1a0   :  { %1175 = vmatmul.mubr.bf16.gmra.mrb[40].mxu1 %v3129_v60  ;;  %1228 = vmatmul.mubr.bf16.vlgmr.msra.gmra.mrb[64].mxu0 %v3090_v2 }
 0x1a1   :  { %1184 = vmatprep.mubr.bf16.mxu1 %v2968_v27  ;;  %1237 = vmatprep.mubr.bf16.mxu0 %v2968_v27 }
 0x1a8   :  { %1185 = vmatmul.mubr.bf16.gmra.mrb[44].mxu1 %v3136_v7  ;;  %1238 = vmatmul.mubr.bf16.gmra.mrb[68].mxu0 %v3100_v22 }
 0x1a9   :  { %1247 = vmatprep.mubr.bf16.mxu0 %v2968_v27  ;;  %1340 = vmatprep.mubr.bf16.mxu1 %v2968_v27 }
 0x1b0   :  { %1248 = vmatmul.mubr.bf16.gmra.mrb[72].mxu0 %v3107_v35  ;;  %1341 = vmatmul.mubr.bf16.vlgmr.msra.gmra.mrb[48].mxu1 %v3090_v2  ;;  %v406_v2 = vlaneseq }
 0x1b1   :  { %1257 = vmatprep.mubr.bf16.mxu0 %v2968_v27  ;;  %1350 = vmatprep.mubr.bf16.mxu1 %v2968_v27 }
 0x1b8   :  { %1258 = vmatmul.mubr.bf16.gmra.mrb[76].mxu0 %v3119_v49  ;;  %1351 = vmatmul.mubr.bf16.gmra.mrb[52].mxu1 %v3100_v22  ;;  %v3200_v22 = vshrl.u32 %v406_v2, 7 }
 0x1b9   :  { %1267 = vmatprep.mubr.bf16.mxu0 %v2968_v27  ;;  %1360 = vmatprep.mubr.bf16.mxu1 %v2968_v27 }
 0x1ba   :  { %v4231_v42 = vsub.s32 1, %v3200_v22  ;;  %v416_v9 = vsub.s32 2, %v3200_v22  ;;  %v420_v12 = vsub.s32 3, %v3200_v22  ;;  %v424_v13 = vsub.s32 4, %v3200_v22 }
 0x1c0   :  { %1268 = vmatmul.mubr.bf16.gmra.mrb[80].mxu0 %v3109_v36  ;;  %1361 = vmatmul.mubr.bf16.gmra.mrb[56].mxu1 %v3107_v35  ;;  %v4232_v35 = vsub.s32 0, %v3200_v22 }
 0x1c1   :  { %1277 = vmatprep.mubr.bf16.mxu0 %v2968_v27  ;;  %1370 = vmatprep.mubr.bf16.mxu1 %v2968_v27 }
 0x1c8   :  { %1278 = vmatmul.mubr.bf16.gmra.mrb[84].mxu0 %v3122_v50  ;;  %1371 = vmatmul.mubr.bf16.gmra.mrb[60].mxu1 %v3119_v49 }
 0x1c9   :  { %1287 = vmatprep.mubr.bf16.mxu0 %v2968_v27  ;;  %1380 = vmatprep.mubr.bf16.mxu1 %v2968_v27 }
 0x1d0   :  { %1288 = vmatmul.mubr.bf16.gmra.mrb[88].mxu0 %v3129_v60  ;;  %1381 = vmatmul.mubr.bf16.gmra.mrb[64].mxu1 %v3109_v36  ;;  %v3203_v36 = vld [vmem:[#allocation7] sm:$0xff] }
 0x1d1   :  { %1297 = vmatprep.mubr.bf16.mxu0 %v2968_v27  ;;  %1390 = vmatprep.mubr.bf16.mxu1 %v2968_v27  ;;  %v3209_v43 = vrot.slane %v3203_v36, %v4232_v35  ;;  %v3246_v41 = vrot.slane %v3203_v36, %v416_v9 }
 0x1d8   :  { %1298 = vmatmul.mubr.bf16.gmra.mrb[92].mxu0 %v3136_v7  ;;  %1391 = vmatmul.mubr.bf16.gmra.mrb[68].mxu1 %v3122_v50 }
 0x1d9   :  { %1400 = vmatprep.mubr.bf16.mxu1 %v2968_v27 }
 0x1e0   :  { %1401 = vmatmul.mubr.bf16.gmra.mrb[72].mxu1 %v3129_v60 }
 0x1e1   :  { %1410 = vmatprep.mubr.bf16.mxu1 %v2968_v27  ;;  %v3214_v27 = vrot.slane %v3203_v36, %v4231_v42 }
 0x1e8   :  { %1411 = vmatmul.mubr.bf16.gmra.mrb[76].mxu1 %v3136_v7 }
 0x213   :  { %v890_v44 = vpop.f32.mrb[16].mxu0 }
 0x214   :  { %v892_v45 = vpop.f32.mrb[17].mxu0  ;;  %v891_v47 = vadd.f32 %v890_v44, %v3209_v43 }
 0x215   :  { %v894_v46 = vpop.f32.mrb[18].mxu0  ;;  %v893_v50 = vadd.f32 %v892_v45, %v3214_v27 }
 0x216   :  { %v895_v48 = vadd.f32 %v894_v46, %v3209_v43  ;;  %v896_v49 = vpop.f32.mrb[19].mxu0 }
 0x217   :  { %v897_v51 = vadd.f32 %v896_v49, %v3214_v27 }
 0x218   :  { %v1421_v52 = vpack.c.bf16 %v895_v48, %v891_v47  ;;  %v3253_v48 = vrot.slane %v3203_v36, %v420_v12 }
 0x219   :  { %v1422_v53 = vpack.c.bf16 %v897_v51, %v893_v50  ;;  %v2268_v51 = vunpack.c.0.s8 %v2267_v32 }
 0x21a   :  { %v1501_v54 = vmul.bf16 1056980736, %v1421_v52  ;;  %v3257_v52 = vrot.slane %v3203_v36, %v424_v13 }
 0x21b   :  { %v1502_v55 = vmul.bf16 1056980736, %v1422_v53  ;;  %v900_v56 = vpop.f32.mrb[20].mxu0  ;;  %v428_v53 = vsub.s32 5, %v3200_v22 }
 0x21c   :  { %2705 = vtanh.bf16 %v1501_v54  ;;  %v902_v57 = vpop.f32.mrb[21].mxu0  ;;  %v901_v59 = vadd.f32 %v900_v56, %v3209_v43 }
 0x21d   :  { %2707 = vtanh.bf16 %v1502_v55  ;;  %v904_v58 = vpop.f32.mrb[22].mxu0  ;;  %v903_v62 = vadd.f32 %v902_v57, %v3214_v27 }
 0x21e   :  { %v905_v60 = vadd.f32 %v904_v58, %v3209_v43  ;;  %v906_v61 = vpop.f32.mrb[23].mxu0 }
 0x21f   :  { %v907_v63 = vadd.f32 %v906_v61, %v3214_v27 }
 0x220   :  { %v1431_v0 = vpack.c.bf16 %v905_v60, %v901_v59 }
 0x221   :  { %v1432_v1 = vpack.c.bf16 %v907_v63, %v903_v62 }
 0x222   :  { %v3224_v3 = vmul.bf16 1056980736, %v1431_v0 }
 0x223   :  { %v3226_v4 = vmul.bf16 1056980736, %v1432_v1  ;;  %v910_v5 = vpop.f32.mrb[24].mxu0  ;;  %v930_v6 = vpop.f32.mrb[0].mxu1 }
 0x224   :  { %2709 = vtanh.bf16 %v3224_v3  ;;  %v912_v7 = vpop.f32.mrb[25].mxu0  ;;  %v932_v8 = vpop.f32.mrb[1].mxu1  ;;  %v911_v14 = vadd.f32 %v910_v5, %v3209_v43  ;;  %v931_v15 = vadd.f32 %v930_v6, %v3209_v43 }
 0x225   :  { %2711 = vtanh.bf16 %v3226_v4  ;;  %v914_v10 = vpop.f32.mrb[26].mxu0  ;;  %v934_v11 = vpop.f32.mrb[2].mxu1  ;;  %v913_v21 = vadd.f32 %v912_v7, %v3214_v27  ;;  %v933_v23 = vadd.f32 %v932_v8, %v3214_v27 }
 0x226   :  { %v915_v16 = vadd.f32 %v914_v10, %v3209_v43  ;;  %v935_v17 = vadd.f32 %v934_v11, %v3209_v43  ;;  %v916_v18 = vpop.f32.mrb[27].mxu0  ;;  %v936_v19 = vpop.f32.mrb[3].mxu1 }
 0x227   :  { %v2706_v20 = vpop.eup %2705  ;;  %v917_v24 = vadd.f32 %v916_v18, %v3214_v27  ;;  %v937_v25 = vadd.f32 %v936_v19, %v3214_v27  ;;  %v3276_v18 = vsub.s32 %v2268_v51, %v3200_v22 }
 0x228   :  { %v2708_v26 = vpop.eup %2707  ;;  %v1661_v28 = vadd.bf16 1065369472, %v2706_v20  ;;  %v1441_v29 = vpack.c.bf16 %v915_v16, %v911_v14  ;;  %v1461_v30 = vpack.c.bf16 %v935_v17, %v931_v15  ;;  %v3272_v15 = vrot.slane %v3203_v36, %v428_v53 }
 0x229   :  { %v1662_v33 = vadd.bf16 1065369472, %v2708_v26  ;;  %v1442_v34 = vpack.c.bf16 %v917_v24, %v913_v21  ;;  %v1462_v37 = vpack.c.bf16 %v937_v25, %v933_v23 }
 0x22a   :  { %v1741_v38 = vmul.bf16 %v1661_v28, %v1501_v54  ;;  %v3241_v39 = vmul.bf16 1056980736, %v1441_v29  ;;  %v3243_v40 = vmul.bf16 1056980736, %v1461_v30 }
 0x22b   :  { %v1742_v2 = vmul.bf16 %v1662_v33, %v1502_v55  ;;  %v3248_v44 = vmul.bf16 1056980736, %v1442_v34  ;;  %v3250_v45 = vmul.bf16 1056980736, %v1462_v37  ;;  %v920_v46 = vpop.f32.mrb[28].mxu0  ;;  %v940_v47 = vpop.f32.mrb[4].mxu1 }
 0x22c   :  { %2713 = vtanh.bf16 %v3241_v39  ;;  %v922_v49 = vpop.f32.mrb[29].mxu0  ;;  %v942_v50 = vpop.f32.mrb[5].mxu1  ;;  %v1824_v54 = vunpack.c.l.bf16 %v1741_v38  ;;  %v1834_v55 = vunpack.c.h.bf16 %v1741_v38  ;;  %v921_v56 = vadd.f32 %v920_v46, %v3209_v43 }
 0x22d   :  { %2715 = vtanh.bf16 %v3243_v40  ;;  %v924_v57 = vpop.f32.mrb[30].mxu0  ;;  %v944_v58 = vpop.f32.mrb[6].mxu1  ;;  %v1825_v59 = vunpack.c.l.bf16 %v1742_v2  ;;  %v1835_v60 = vunpack.c.h.bf16 %v1742_v2  ;;  %v941_v61 = vadd.f32 %v940_v47, %v3209_v43 }
 0x22e   :  { %2717 = vtanh.bf16 %v3248_v44  ;;  %v926_v62 = vpop.f32.mrb[31].mxu0  ;;  %v946_v63 = vpop.f32.mrb[7].mxu1  ;;  %v923_v1 = vadd.f32 %v922_v49, %v3214_v27  ;;  %v925_v5 = vadd.f32 %v924_v57, %v3209_v43  ;;  %v945_v6 = vadd.f32 %v944_v58, %v3209_v43 }
 0x22f   :  { %v2710_v0 = vpop.eup %2709  ;;  %2719 = vtanh.bf16 %v3250_v45  ;;  %v943_v9 = vadd.f32 %v942_v50, %v3214_v27  ;;  %v927_v10 = vadd.f32 %v926_v62, %v3214_v27  ;;  %v947_v11 = vadd.f32 %v946_v63, %v3214_v27 }
 0x230   :  { %v2712_v7 = vpop.eup %2711  ;;  %v1671_v8 = vadd.bf16 1065369472, %v2710_v0  ;;  %v1451_v13 = vpack.c.bf16 %v925_v5, %v921_v56  ;;  %v1471_v14 = vpack.c.bf16 %v945_v6, %v941_v61  ;;  %v1984_v20 = vadd.f32 %v1834_v55, %v1824_v54 }
 0x231   :  { %v1672_v12 = vadd.bf16 1065369472, %v2712_v7  ;;  %v1452_v17 = vpack.c.bf16 %v927_v10, %v923_v1  ;;  %v1472_v19 = vpack.c.bf16 %v947_v11, %v943_v9  ;;  %v1997_v28 = vadd.f32 %v1835_v60, %v1825_v59 }
 0x232   :  { %v1751_v16 = vmul.bf16 %v1671_v8, %v3224_v3  ;;  %v3279_v23 = vmul.bf16 1056980736, %v1451_v13  ;;  %v3281_v24 = vmul.bf16 1056980736, %v1471_v14 }
 0x233   :  { %v1752_v21 = vmul.bf16 %v1672_v12, %v3226_v4  ;;  %v950_v25 = vpop.f32.mrb[8].mxu1  ;;  %v1003_v26 = vpop.f32.mrb[32].mxu0  ;;  %v3283_v36 = vmul.bf16 1056980736, %v1452_v17  ;;  %v3285_v30 = vmul.bf16 1056980736, %v1472_v19 }
 0x234   :  { %v1844_v29 = vunpack.c.l.bf16 %v1751_v16  ;;  %v952_v3 = vpop.f32.mrb[9].mxu1  ;;  %v1005_v31 = vpop.f32.mrb[33].mxu0  ;;  %v1854_v32 = vunpack.c.h.bf16 %v1751_v16  ;;  %2721 = vtanh.bf16 %v3279_v23  ;;  %v951_v2 = vadd.f32 %v950_v25, %v3209_v43 }
 0x235   :  { %v1845_v33 = vunpack.c.l.bf16 %v1752_v21  ;;  %v1855_v34 = vunpack.c.h.bf16 %v1752_v21  ;;  %v954_v4 = vpop.f32.mrb[10].mxu1  ;;  %v1007_v37 = vpop.f32.mrb[34].mxu0  ;;  %2723 = vtanh.bf16 %v3281_v24  ;;  %v1004_v46 = vadd.f32 %v1003_v26, %v3246_v41 }
 0x236   :  { %v1985_v38 = vadd.f32 %v1984_v20, %v1844_v29  ;;  %v956_v47 = vpop.f32.mrb[11].mxu1  ;;  %v1009_v49 = vpop.f32.mrb[35].mxu0  ;;  %2725 = vtanh.bf16 %v3283_v36  ;;  %v953_v53 = vadd.f32 %v952_v3, %v3214_v27  ;;  %v955_v54 = vadd.f32 %v954_v4, %v3209_v43 }
 0x237   :  { %v2714_v50 = vpop.eup %2713  ;;  %v1998_v51 = vadd.f32 %v1997_v28, %v1845_v33  ;;  %2727 = vtanh.bf16 %v3285_v30  ;;  %v1008_v58 = vadd.f32 %v1007_v37, %v3246_v41  ;;  %v957_v63 = vadd.f32 %v956_v47, %v3214_v27 }
 0x238   :  { %v2716_v55 = vpop.eup %2715  ;;  %v1986_v56 = vadd.f32 %v1985_v38, %v1854_v32  ;;  %v1681_v57 = vadd.bf16 1065369472, %v2714_v50  ;;  %v1481_v62 = vpack.c.bf16 %v955_v54, %v951_v2  ;;  %v1006_v6 = vadd.f32 %v1005_v31, %v3253_v48 }
 0x239   :  { %v2718_v59 = vpop.eup %2717  ;;  %v1999_v60 = vadd.f32 %v1998_v51, %v1855_v34  ;;  %v1701_v61 = vadd.bf16 1065369472, %v2716_v55  ;;  %v1423_v7 = vpack.c.bf16 %v1008_v58, %v1004_v46  ;;  %v1482_v11 = vpack.c.bf16 %v957_v63, %v953_v53 }
 0x23a   :  { %v2720_v0 = vpop.eup %2719  ;;  %v1761_v1 = vmul.bf16 %v1681_v57, %v3241_v39  ;;  %v1682_v5 = vadd.bf16 1065369472, %v2718_v59  ;;  %v3300_v10 = vmul.bf16 1056980736, %v1481_v62  ;;  %v1010_v19 = vadd.f32 %v1009_v49, %v3253_v48 }
 0x23b   :  { %v1781_v8 = vmul.bf16 %v1701_v61, %v3243_v40  ;;  %v1702_v9 = vadd.bf16 1065369472, %v2720_v0  ;;  %v960_v12 = vpop.f32.mrb[12].mxu1  ;;  %v1013_v13 = vpop.f32.mrb[36].mxu0  ;;  %v3303_v17 = vmul.bf16 1056980736, %v1423_v7 }
 0x23c   :  { %v1864_v14 = vunpack.c.l.bf16 %v1761_v1  ;;  %v1762_v16 = vmul.bf16 %v1682_v5, %v3248_v44  ;;  %v962_v39 = vpop.f32.mrb[13].mxu1  ;;  %v3306_v20 = vpop.f32.mrb[37].mxu0  ;;  %2729 = vtanh.bf16 %v3300_v10  ;;  %v1874_v29 = vunpack.c.h.bf16 %v1761_v1 }
 0x23d   :  { %v1904_v21 = vunpack.c.l.bf16 %v1781_v8  ;;  %v1914_v25 = vunpack.c.h.bf16 %v1781_v8  ;;  %v1782_v40 = vmul.bf16 %v1702_v9, %v3250_v45  ;;  %v964_v26 = vpop.f32.mrb[14].mxu1  ;;  %v1017_v28 = vpop.f32.mrb[38].mxu0  ;;  %2731 = vtanh.bf16 %v3303_v17 }
 0x23e   :  { %v1987_v3 = vadd.f32 %v1986_v56, %v1864_v14  ;;  %v1865_v31 = vunpack.c.l.bf16 %v1762_v16  ;;  %v3311_v44 = vpop.f32.mrb[15].mxu1  ;;  %v3313_v32 = vpop.f32.mrb[39].mxu0  ;;  %v1875_v33 = vunpack.c.h.bf16 %v1762_v16  ;;  %v3315_v37 = vmul.bf16 1056980736, %v1482_v11 }
 0x23f   :  { %v1905_v34 = vunpack.c.l.bf16 %v1782_v40  ;;  %v1915_v4 = vunpack.c.h.bf16 %v1782_v40  ;;  %v2722_v38 = vpop.eup %2721  ;;  %v2114_v2 = vadd.f32 %v1914_v25, %v1904_v21  ;;  %v1424_v47 = vpack.c.bf16 %v1010_v19, %v1006_v6 }
 0x240   :  { %v1988_v45 = vadd.f32 %v1987_v3, %v1874_v29  ;;  %v2000_v46 = vadd.f32 %v1999_v60, %v1865_v31  ;;  %v2724_v49 = vpop.eup %2723  ;;  %v1691_v51 = vadd.bf16 1065369472, %v2722_v38  ;;  %2733 = vtanh.bf16 %v3315_v37 }
 0x241   :  { %v2127_v50 = vadd.f32 %v1915_v4, %v1905_v34  ;;  %v961_v53 = vadd.f32 %v960_v12, %v3209_v43  ;;  %v2726_v54 = vpop.eup %2725  ;;  %v1711_v56 = vadd.bf16 1065369472, %v2724_v49  ;;  %v3319_v57 = vmul.bf16 1056980736, %v1424_v47 }
 0x242   :  { %v2001_v55 = vadd.f32 %v2000_v46, %v1875_v33  ;;  %v1014_v58 = vadd.f32 %v1013_v13, %v3246_v41  ;;  %v2728_v59 = vpop.eup %2727  ;;  %v1771_v61 = vmul.bf16 %v1691_v51, %v3279_v23  ;;  %v1692_v62 = vadd.bf16 1065369472, %v2726_v54 }
 0x243   :  { %v3324_v60 = vadd.f32 %v962_v39, %v3214_v27  ;;  %v965_v63 = vadd.f32 %v964_v26, %v3209_v43  ;;  %v3327_v0 = vpop.f32.mrb[40].mxu0  ;;  %v3329_v1 = vpop.f32.mrb[16].mxu1  ;;  %v1791_v5 = vmul.bf16 %v1711_v56, %v3281_v24  ;;  %v1712_v6 = vadd.bf16 1065369472, %v2728_v59 }
 0x244   :  { %2735 = vtanh.bf16 %v3319_v57  ;;  %v1018_v7 = vadd.f32 %v1017_v28, %v3246_v41  ;;  %v3334_v8 = vpop.f32.mrb[41].mxu0  ;;  %v3336_v23 = vpop.f32.mrb[17].mxu1  ;;  %v1884_v9 = vunpack.c.l.bf16 %v1771_v61  ;;  %v1894_v11 = vunpack.c.h.bf16 %v1771_v61 }
 0x245   :  { %v1772_v12 = vmul.bf16 %v1692_v62, %v3283_v36  ;;  %v1491_v43 = vpack.c.bf16 %v965_v63, %v961_v53  ;;  %v3339_v13 = vpop.f32.mrb[42].mxu0  ;;  %v3341_v14 = vpop.f32.mrb[18].mxu1  ;;  %v1924_v16 = vunpack.c.l.bf16 %v1791_v5  ;;  %v1934_v24 = vunpack.c.h.bf16 %v1791_v5 }
 0x246   :  { %v1792_v19 = vmul.bf16 %v1712_v6, %v3285_v30  ;;  %v1433_v39 = vpack.c.bf16 %v1018_v7, %v1014_v58  ;;  %v3344_v21 = vpop.f32.mrb[43].mxu0  ;;  %v3346_v25 = vpop.f32.mrb[19].mxu1  ;;  %v1989_v40 = vadd.f32 %v1988_v45, %v1884_v9  ;;  %v1020_v62 = vadd.f32 %v3313_v32, %v3253_v48 }
 0x247   :  { %v1885_v26 = vunpack.c.l.bf16 %v1772_v12  ;;  %v1895_v28 = vunpack.c.h.bf16 %v1772_v12  ;;  %v3348_v29 = vmul.bf16 1056980736, %v1491_v43  ;;  %v2730_v36 = vpop.eup %2729  ;;  %v2115_v3 = vadd.f32 %v2114_v2, %v1924_v16 }
 0x248   :  { %v1925_v31 = vunpack.c.l.bf16 %v1792_v19  ;;  %v1935_v33 = vunpack.c.h.bf16 %v1792_v19  ;;  %v3350_v34 = vmul.bf16 1056980736, %v1433_v39  ;;  %v2732_v4 = vpop.eup %2731  ;;  %v1990_v38 = vadd.f32 %v1989_v40, %v1894_v11 }
 0x249   :  { %v2002_v46 = vadd.f32 %v2001_v55, %v1885_v26  ;;  %v1721_v30 = vadd.bf16 1065369472, %v2730_v36  ;;  %2737 = vtanh.bf16 %v3348_v29  ;;  %v2116_v47 = vadd.f32 %v2115_v3, %v1934_v24 }
 0x24a   :  { %v2128_v49 = vadd.f32 %v2127_v50, %v1925_v31  ;;  %v1663_v51 = vadd.bf16 1065369472, %v2732_v4  ;;  %2739 = vtanh.bf16 %v3350_v34  ;;  %v1991_v45 = vrot.slane %v1990_v38, 4 }
 0x24b   :  { %v2003_v53 = vadd.f32 %v2002_v46, %v1895_v28  ;;  %v1801_v54 = vmul.bf16 %v1721_v30, %v3300_v10  ;;  %v967_v2 = vadd.f32 %v3311_v44, %v3214_v27  ;;  %v3357_v56 = vpop.f32.mrb[44].mxu0  ;;  %v3359_v58 = vpop.f32.mrb[20].mxu1  ;;  %v1016_v50 = vadd.f32 %v3306_v20, %v3253_v48 }
 0x24c   :  { %v2734_v55 = vpop.eup %2733  ;;  %v2129_v59 = vadd.f32 %v2128_v49, %v1935_v33  ;;  %v1743_v61 = vmul.bf16 %v1663_v51, %v3303_v17  ;;  %v3366_v63 = vpop.f32.mrb[45].mxu0  ;;  %v1992_v5 = vadd.f32 %v1991_v45, %v1990_v38  ;;  %v1024_v30 = vadd.f32 %v3327_v0, %v3246_v41 }
 0x24d   :  { %v3368_v10 = vpop.f32.mrb[21].mxu1  ;;  %v2004_v27 = vrot.slane %v2003_v53, 4  ;;  %v1944_v44 = vunpack.c.l.bf16 %v1801_v54  ;;  %v1954_v6 = vunpack.c.h.bf16 %v1801_v54  ;;  %v3370_v7 = vpop.f32.mrb[46].mxu0  ;;  %v1722_v12 = vadd.bf16 1065369472, %v2734_v55 }
 0x24e   :  { %v3372_v9 = vpop.f32.mrb[22].mxu1  ;;  %v1826_v11 = vunpack.c.l.bf16 %v1743_v61  ;;  %v1836_v17 = vunpack.c.h.bf16 %v1743_v61  ;;  %v1492_v20 = vpack.c.bf16 %v967_v2, %v3324_v60  ;;  %v3375_v43 = vpop.f32.mrb[47].mxu0  ;;  %v1993_v24 = vrot.slane %v1992_v5, 2 }
 0x24f   :  { %v3377_v32 = vpop.f32.mrb[23].mxu1  ;;  %v2736_v16 = vpop.eup %2735  ;;  %v2005_v19 = vadd.f32 %v2004_v27, %v2003_v53  ;;  %v2117_v39 = vadd.f32 %v2116_v47, %v1944_v44  ;;  %v1434_v40 = vpack.c.bf16 %v1020_v62, %v1016_v50  ;;  %v1802_v26 = vmul.bf16 %v1722_v12, %v3315_v37 }
 0x250   :  { %v1664_v28 = vadd.bf16 1065369472, %v2736_v16  ;;  %v3380_v36 = vmul.bf16 1056980736, %v1492_v20  ;;  %v1994_v31 = vadd.f32 %v1993_v24, %v1992_v5  ;;  %v2010_v49 = vadd.f32 %v1836_v17, %v1826_v11 }
 0x251   :  { %v2006_v33 = vrot.slane %v2005_v19, 2  ;;  %v2118_v4 = vadd.f32 %v2117_v39, %v1954_v6  ;;  %v3383_v60 = vmul.bf16 1056980736, %v1434_v40  ;;  %v1945_v38 = vunpack.c.l.bf16 %v1802_v26 }
 0x252   :  { %v1744_v46 = vmul.bf16 %v1664_v28, %v3319_v57  ;;  %2741 = vtanh.bf16 %v3380_v36  ;;  %v1995_v47 = vrot.slane %v1994_v31, 1  ;;  %v1955_v54 = vunpack.c.h.bf16 %v1802_v26 }
 0x253   :  { %v2007_v37 = vadd.f32 %v2006_v33, %v2005_v19  ;;  %2743 = vtanh.bf16 %v3383_v60  ;;  %v3390_v51 = vpop.f32.mrb[48].mxu0  ;;  %v3392_v45 = vpop.f32.mrb[24].mxu1  ;;  %v2130_v2 = vadd.f32 %v2129_v59, %v1945_v38  ;;  %v1117_v57 = vadd.f32 %v3329_v1, %v3257_v52 }
 0x254   :  { %v2738_v53 = vpop.eup %2737  ;;  %v1827_v55 = vunpack.c.l.bf16 %v1744_v46  ;;  %v3396_v61 = vpop.f32.mrb[49].mxu0  ;;  %v3400_v62 = vadd.f32 %v1995_v47, %v1994_v31  ;;  %v1837_v27 = vunpack.c.h.bf16 %v1744_v46  ;;  %v1026_v1 = vadd.f32 %v3334_v8, %v3253_v48 }
 0x255   :  { %v3398_v50 = vpop.f32.mrb[25].mxu1  ;;  %v2740_v0 = vpop.eup %2739  ;;  %v2008_v5 = vrot.slane %v2007_v37, 1  ;;  %v1731_v44 = vadd.bf16 1065369472, %v2738_v53  ;;  %v3406_v17 = vadd.f32 %v2130_v2, %v1955_v54  ;;  %v1028_v12 = vadd.f32 %v3339_v13, %v3246_v41 }
 0x256   :  { %v3402_v6 = vpop.f32.mrb[50].mxu0  ;;  %v3404_v11 = vpop.f32.mrb[26].mxu1  ;;  %v1673_v59 = vadd.bf16 1065369472, %v2740_v0  ;;  %v1121_v39 = vadd.f32 %v3341_v14, %v3257_v52  ;;  %v1030_v40 = vadd.f32 %v3344_v21, %v3253_v48  ;;  %v1119_v8 = vadd.f32 %v3336_v23, %v3272_v15 }
 0x257   :  { %v3412_v20 = vpop.f32.mrb[51].mxu0  ;;  %v3414_v16 = vpop.f32.mrb[27].mxu1  ;;  %v3416_v24 = vadd.f32 %v2008_v5, %v2007_v37  ;;  %v1811_v19 = vmul.bf16 %v1731_v44, %v3348_v29  ;;  %v1443_v13 = vpack.c.bf16 %v1028_v12, %v1024_v30  ;;  %v1123_v28 = vadd.f32 %v3346_v25, %v3272_v15 }
 0x258   :  { %v1753_v26 = vmul.bf16 %v1673_v59, %v3350_v34  ;;  %v3430_v33 = vadd.f32 %v1837_v27, %v1827_v55  ;;  %v1425_v38 = vpack.c.bf16 %v1121_v39, %v1117_v57  ;;  %v1444_v21 = vpack.c.bf16 %v1030_v40, %v1026_v1 }
 0x259   :  { %v1964_v29 = vunpack.c.l.bf16 %v1811_v19  ;;  %v3432_v46 = vmul.bf16 1056980736, %v1443_v13  ;;  %v1034_v34 = vadd.f32 %v3357_v56, %v3246_v41  ;;  %v1974_v47 = vunpack.c.h.bf16 %v1811_v19 }
 0x25a   :  { %v1846_v14 = vunpack.c.l.bf16 %v1753_v26  ;;  %v3436_v30 = vmul.bf16 1056980736, %v1425_v38  ;;  %v1426_v37 = vpack.c.bf16 %v1123_v28, %v1119_v8  ;;  %v1856_v54 = vunpack.c.h.bf16 %v1753_v26 }
 0x25b   :  { %v2119_v23 = vadd.f32 %v2118_v4, %v1964_v29  ;;  %v3438_v25 = vpop.f32.mrb[52].mxu0  ;;  %v3440_v53 = vpop.f32.mrb[28].mxu1  ;;  %2745 = vtanh.bf16 %v3432_v46  ;;  %v3443_v55 = vmul.bf16 1056980736, %v1444_v21  ;;  %v1127_v27 = vadd.f32 %v3359_v58, %v3257_v52 }
 0x25c   :  { %v2011_v2 = vadd.f32 %v2010_v49, %v1846_v14  ;;  %v3445_v57 = vpop.f32.mrb[53].mxu0  ;;  %v3447_v0 = vpop.f32.mrb[29].mxu1  ;;  %2747 = vtanh.bf16 %v3436_v30  ;;  %v3450_v4 = vmul.bf16 1056980736, %v1426_v37  ;;  %v1036_v19 = vadd.f32 %v3366_v63, %v3253_v48 }
 0x25d   :  { %v2742_v56 = vpop.eup %2741  ;;  %v2120_v5 = vadd.f32 %v2119_v23, %v1974_v47  ;;  %v3454_v44 = vpop.f32.mrb[54].mxu0  ;;  %2749 = vtanh.bf16 %v3443_v55  ;;  %v1038_v58 = vadd.f32 %v3370_v7, %v3246_v41  ;;  %v1131_v28 = vadd.f32 %v3372_v9, %v3257_v52 }
 0x25e   :  { %v3456_v49 = vpop.f32.mrb[30].mxu1  ;;  %v2744_v59 = vpop.eup %2743  ;;  %v3458_v1 = vadd.f32 %v2011_v2, %v1856_v54  ;;  %v1732_v12 = vadd.bf16 1065369472, %v2742_v56  ;;  %2751 = vtanh.bf16 %v3450_v4  ;;  %v1040_v29 = vadd.f32 %v3375_v43, %v3253_v48 }
 0x25f   :  { %v3463_v39 = vpop.f32.mrb[55].mxu0  ;;  %v3465_v40 = vpop.f32.mrb[31].mxu1  ;;  %v2121_v26 = vrot.slane %v2120_v5, 4  ;;  %v1674_v8 = vadd.bf16 1065369472, %v2744_v59  ;;  %v1133_v63 = vadd.f32 %v3377_v32, %v3272_v15  ;;  %v1129_v21 = vadd.f32 %v3368_v10, %v3272_v15 }
 0x260   :  { %v1812_v13 = vmul.bf16 %v1732_v12, %v3380_v36  ;;  %v1453_v47 = vpack.c.bf16 %v1038_v58, %v1034_v34  ;;  %v1435_v7 = vpack.c.bf16 %v1131_v28, %v1127_v27  ;;  %v1454_v37 = vpack.c.bf16 %v1040_v29, %v1036_v19 }
 0x261   :  { %v2122_v38 = vadd.f32 %v2121_v26, %v2120_v5  ;;  %v1754_v14 = vmul.bf16 %v1674_v8, %v3383_v60  ;;  %v1044_v36 = vadd.f32 %v3390_v51, %v3246_v41  ;;  %v1436_v34 = vpack.c.bf16 %v1133_v63, %v1129_v21 }
 0x262   :  { %v1965_v23 = vunpack.c.l.bf16 %v1812_v13  ;;  %v1975_v54 = vunpack.c.h.bf16 %v1812_v13  ;;  %v3482_v43 = vmul.bf16 1056980736, %v1453_v47  ;;  %v3489_v5 = vmul.bf16 1056980736, %v1435_v7 }
 0x263   :  { %v2123_v9 = vrot.slane %v2122_v38, 2  ;;  %v1847_v2 = vunpack.c.l.bf16 %v1754_v14  ;;  %v3484_v56 = vpop.f32.mrb[56].mxu0  ;;  %v3486_v32 = vpop.f32.mrb[32].mxu1  ;;  %v3491_v10 = vmul.bf16 1056980736, %v1454_v37  ;;  %v1857_v12 = vunpack.c.h.bf16 %v1754_v14 }
 0x264   :  { %v2132_v60 = vadd.f32 %v3406_v17, %v1965_v23  ;;  %v3493_v27 = vpop.f32.mrb[57].mxu0  ;;  %v3495_v59 = vpop.f32.mrb[33].mxu1  ;;  %2753 = vtanh.bf16 %v3482_v43  ;;  %v3504_v58 = vmul.bf16 1056980736, %v1436_v34  ;;  %v1137_v13 = vadd.f32 %v3392_v45, %v3257_v52 }
 0x265   :  { %v2124_v51 = vadd.f32 %v2123_v9, %v2122_v38  ;;  %v2024_v19 = vadd.f32 %v3430_v33, %v1847_v2  ;;  %v3499_v26 = vpop.f32.mrb[58].mxu0  ;;  %v3501_v8 = vpop.f32.mrb[34].mxu1  ;;  %2755 = vtanh.bf16 %v3489_v5  ;;  %v1046_v14 = vadd.f32 %v3396_v61, %v3253_v48 }
 0x266   :  { %v2133_v17 = vadd.f32 %v2132_v60, %v1975_v54  ;;  %v3508_v28 = vpop.f32.mrb[59].mxu0  ;;  %v3510_v29 = vpop.f32.mrb[35].mxu1  ;;  %2757 = vtanh.bf16 %v3491_v10  ;;  %v1048_v45 = vadd.f32 %v3402_v6, %v3246_v41  ;;  %v3520_v9 = vadd.f32 %v3398_v50, %v3272_v15 }
 0x267   :  { %v2746_v63 = vpop.eup %2745  ;;  %v2125_v33 = vrot.slane %v2124_v51, 1  ;;  %v2025_v38 = vadd.f32 %v2024_v19, %v1857_v12  ;;  %2759 = vtanh.bf16 %v3504_v58  ;;  %v1141_v54 = vadd.f32 %v3404_v11, %v3257_v52 }
 0x268   :  { %v2748_v21 = vpop.eup %2747  ;;  %v2134_v47 = vrot.slane %v2133_v17, 4  ;;  %v1683_v23 = vadd.bf16 1065369472, %v2746_v63  ;;  %v1050_v61 = vadd.f32 %v3412_v20, %v3253_v48  ;;  %v1463_v19 = vpack.c.bf16 %v1048_v45, %v1044_v36 }
 0x269   :  { %v2750_v7 = vpop.eup %2749  ;;  %v1665_v37 = vadd.bf16 1065369472, %v2748_v21  ;;  %v1445_v21 = vpack.c.bf16 %v1141_v54, %v1137_v13  ;;  %v3532_v3 = vadd.f32 %v2125_v33, %v2124_v51 }
 0x26a   :  { %v2752_v2 = vpop.eup %2751  ;;  %v2135_v60 = vadd.f32 %v2134_v47, %v2133_v17  ;;  %v1763_v34 = vmul.bf16 %v1683_v23, %v3432_v46  ;;  %v1684_v12 = vadd.bf16 1065369472, %v2750_v7  ;;  %v1464_v42 = vpack.c.bf16 %v1050_v61, %v1046_v14 }
 0x26b   :  { %v1745_v6 = vmul.bf16 %v1665_v37, %v3436_v30  ;;  %v1666_v63 = vadd.bf16 1065369472, %v2752_v2  ;;  %v3528_v35 = vpop.f32.mrb[60].mxu0  ;;  %v3530_v50 = vpop.f32.mrb[36].mxu1  ;;  %v3540_v13 = vmul.bf16 1056980736, %v1463_v19 }
 0x26c   :  { %v2136_v11 = vrot.slane %v2135_v60, 2  ;;  %v1866_v31 = vunpack.c.l.bf16 %v1763_v34  ;;  %v1764_v20 = vmul.bf16 %v1684_v12, %v3443_v55  ;;  %v3535_v17 = vpop.f32.mrb[61].mxu0  ;;  %v3537_v46 = vpop.f32.mrb[37].mxu1  ;;  %v1876_v33 = vunpack.c.h.bf16 %v1763_v34 }
 0x26d   :  { %4233 = vst [vmem:[#allocation12_spill] sm:$0xff] %v3537_v46  ;;  %v1828_v36 = vunpack.c.l.bf16 %v1745_v6  ;;  %v1838_v47 = vunpack.c.h.bf16 %v1745_v6  ;;  %v1746_v30 = vmul.bf16 %v1666_v63, %v3450_v4  ;;  %v3542_v14 = vpop.f32.mrb[62].mxu0  ;;  %v3544_v23 = vpop.f32.mrb[38].mxu1  ;;  %2761 = vtanh.bf16 %v3540_v13 }
 0x26e   :  { %v2137_v51 = vadd.f32 %v2136_v11, %v2135_v60  ;;  %v2013_v45 = vadd.f32 %v3458_v1, %v1866_v31  ;;  %v1867_v7 = vunpack.c.l.bf16 %v1764_v20  ;;  %v3547_v55 = vpop.f32.mrb[63].mxu0  ;;  %v3549_v37 = vpop.f32.mrb[39].mxu1  ;;  %v1877_v54 = vunpack.c.h.bf16 %v1764_v20 }
 0x26f   :  { %4234 = vst [vmem:[#allocation13_spill] sm:$0xff] %v3547_v55  ;;  %4235 = vst [vmem:[#allocation14_spill] sm:$0xff] %v3549_v37  ;;  %v1829_v61 = vunpack.c.l.bf16 %v1746_v30  ;;  %v1839_v2 = vunpack.c.h.bf16 %v1746_v30  ;;  %v2754_v4 = vpop.eup %2753  ;;  %v3552_v63 = vmul.bf16 1056980736, %v1445_v21  ;;  %v2036_v34 = vadd.f32 %v1838_v47, %v1828_v36 }
 0x270   :  { %v2138_v12 = vrot.slane %v2137_v51, 1  ;;  %v2014_v19 = vadd.f32 %v2013_v45, %v1876_v33  ;;  %v2026_v6 = vadd.f32 %v2025_v38, %v1867_v7  ;;  %v2756_v60 = vpop.eup %2755  ;;  %v1693_v11 = vadd.bf16 1065369472, %v2754_v4 }
 0x271   :  { %v3554_v31 = vmul.bf16 1056980736, %v1464_v42  ;;  %v1143_v1 = vadd.f32 %v3414_v16, %v3272_v15  ;;  %v2758_v37 = vpop.eup %2757  ;;  %v1675_v46 = vadd.bf16 1065369472, %v2756_v60  ;;  %2763 = vtanh.bf16 %v3552_v63 }
 0x272   :  { %v3558_v20 = vadd.f32 %v2138_v12, %v2137_v51  ;;  %v2027_v30 = vadd.f32 %v2026_v6, %v1877_v54  ;;  %v2760_v55 = vpop.eup %2759  ;;  %v1773_v38 = vmul.bf16 %v1693_v11, %v3482_v43  ;;  %v1694_v21 = vadd.bf16 1065369472, %v2758_v37 }
 0x273   :  { %2765 = vtanh.bf16 %v3554_v31  ;;  %v1446_v36 = vpack.c.bf16 %v1143_v1, %v3520_v9  ;;  %v3564_v42 = vpop.f32.mrb[40].mxu1  ;;  %v3566_v47 = vpop.f32.mrb[64].mxu0  ;;  %v2049_v51 = vadd.f32 %v1839_v2, %v1829_v61  ;;  %v1755_v33 = vmul.bf16 %v1675_v46, %v3489_v5 }
 0x274   :  { %v1676_v45 = vadd.bf16 1065369472, %v2760_v55  ;;  %v3571_v7 = vpop.f32.mrb[41].mxu1  ;;  %v3573_v54 = vpop.f32.mrb[65].mxu0  ;;  %v1886_v43 = vunpack.c.l.bf16 %v1773_v38  ;;  %v1774_v37 = vmul.bf16 %v1694_v21, %v3491_v10  ;;  %v1054_v9 = vadd.f32 %v3438_v25, %v3246_v41 }
 0x275   :  { %v3576_v4 = vmul.bf16 1056980736, %v1446_v36  ;;  %v3580_v12 = vpop.f32.mrb[42].mxu1  ;;  %v3582_v6 = vpop.f32.mrb[66].mxu0  ;;  %v1896_v61 = vunpack.c.h.bf16 %v1773_v38  ;;  %v1848_v2 = vunpack.c.l.bf16 %v1755_v33  ;;  %v1858_v5 = vunpack.c.h.bf16 %v1755_v33 }
 0x276   :  { %4236 = vst [vmem:[#allocation15_spill] sm:$0xff] %v3582_v6  ;;  %v1756_v46 = vmul.bf16 %v1676_v45, %v3504_v58  ;;  %v3585_v55 = vpop.f32.mrb[43].mxu1  ;;  %v3587_v60 = vpop.f32.mrb[67].mxu0  ;;  %v2015_v11 = vadd.f32 %v2014_v19, %v1886_v43  ;;  %v1887_v10 = vunpack.c.l.bf16 %v1774_v37  ;;  %v1897_v1 = vunpack.c.h.bf16 %v1774_v37 }
 0x277   :  { %2767 = vtanh.bf16 %v3576_v4  ;;  %v2037_v21 = vadd.f32 %v2036_v34, %v1848_v2  ;;  %v1147_v16 = vadd.f32 %v3440_v53, %v3257_v52  ;;  %v1056_v58 = vadd.f32 %v3445_v57, %v3253_v48 }
 0x278   :  { %v1849_v25 = vunpack.c.l.bf16 %v1756_v46  ;;  %v1859_v36 = vunpack.c.h.bf16 %v1756_v46  ;;  %v2016_v38 = vadd.f32 %v2015_v11, %v1896_v61  ;;  %v2028_v6 = vadd.f32 %v2027_v30, %v1887_v10  ;;  %v2762_v45 = vpop.eup %2761 }
 0x279   :  { %v1149_v33 = vadd.f32 %v3447_v0, %v3272_v15  ;;  %v2038_v19 = vadd.f32 %v2037_v21, %v1858_v5  ;;  %v1058_v37 = vadd.f32 %v3454_v44, %v3246_v41  ;;  %v1151_v34 = vadd.f32 %v3456_v49, %v3257_v52 }
 0x27a   :  { %v2050_v43 = vadd.f32 %v2049_v51, %v1849_v25  ;;  %v2017_v2 = vrot.slane %v2016_v38, 4  ;;  %v2029_v46 = vadd.f32 %v2028_v6, %v1897_v1  ;;  %v1703_v53 = vadd.bf16 1065369472, %v2762_v45 }
 0x27b   :  { %v1060_v30 = vadd.f32 %v3463_v39, %v3253_v48  ;;  %v3602_v61 = vpop.f32.mrb[44].mxu1  ;;  %v3604_v57 = vpop.f32.mrb[68].mxu0  ;;  %v1473_v5 = vpack.c.bf16 %v1058_v37, %v1054_v9  ;;  %v1455_v51 = vpack.c.bf16 %v1151_v34, %v1147_v16  ;;  %v1153_v44 = vadd.f32 %v3465_v40, %v3272_v15 }
 0x27c   :  { %v3606_v0 = vadd.f32 %v2050_v43, %v1859_v36  ;;  %v3610_v11 = vpop.f32.mrb[45].mxu1  ;;  %v3612_v49 = vpop.f32.mrb[69].mxu0  ;;  %v2018_v10 = vadd.f32 %v2017_v2, %v2016_v38  ;;  %v2030_v1 = vrot.slane %v2029_v46, 4  ;;  %v1783_v39 = vmul.bf16 %v1703_v53, %v3540_v13 }
 0x27d   :  { %v2764_v6 = vpop.eup %2763  ;;  %v1474_v21 = vpack.c.bf16 %v1060_v30, %v1056_v58  ;;  %v3615_v25 = vpop.f32.mrb[46].mxu1  ;;  %v3619_v16 = vmul.bf16 1056980736, %v1473_v5  ;;  %v3621_v43 = vmul.bf16 1056980736, %v1455_v51  ;;  %v1456_v40 = vpack.c.bf16 %v1153_v44, %v1149_v33 }
 0x27e   :  { %4237 = vst [vmem:[#allocation16_spill] sm:$0xff] %v3615_v25  ;;  %v3617_v45 = vpop.f32.mrb[70].mxu0  ;;  %v2766_v36 = vpop.eup %2765  ;;  %v1685_v9 = vadd.bf16 1065369472, %v2764_v6  ;;  %v4239_v37 = vcombine.low %v3400_v62, %v3416_v24  ;;  %v2019_v34 = vrot.slane %v2018_v10, 2  ;;  %v2031_v13 = vadd.f32 %v2030_v1, %v2029_v46 }
 0x27f   :  { %4238 = vst [vmem:[#allocation17_spill] sm:$0xff] %v3617_v45  ;;  %v3630_v2 = vpop.f32.mrb[47].mxu1  ;;  %v3632_v53 = vpop.f32.mrb[71].mxu0  ;;  %v1704_v5 = vadd.bf16 1065369472, %v2766_v36  ;;  %2769 = vtanh.bf16 %v3619_v16  ;;  %v1906_v62 = vunpack.c.l.bf16 %v1783_v39  ;;  %v1916_v46 = vunpack.c.h.bf16 %v1783_v39 }
 0x280   :  { %v3627_v38 = vrot.slane %v4239_v37, %v3276_v18  ;;  %4240 = vst [vmem:[#allocation18_spill] sm:$0xff] %v3630_v2  ;;  %4241 = vst [vmem:[#allocation19_spill] sm:$0xff] %v3632_v53  ;;  %v1765_v30 = vmul.bf16 %v1685_v9, %v3552_v63  ;;  %v3636_v33 = vmul.bf16 1056980736, %v1474_v21  ;;  %v2020_v51 = vadd.f32 %v2019_v34, %v2018_v10 }
 0x281   :  { %v2032_v44 = vrot.slane %v2031_v13, 2  ;;  %2771 = vtanh.bf16 %v3621_v43  ;;  %v1784_v1 = vmul.bf16 %v1704_v5, %v3554_v31  ;;  %v3641_v36 = vmul.bf16 1056980736, %v1456_v40 }
 0x282   :  { %v2768_v24 = vpop.eup %2767  ;;  %v1868_v6 = vunpack.c.l.bf16 %v1765_v30  ;;  %2773 = vtanh.bf16 %v3636_v33  ;;  %v2021_v37 = vrot.slane %v2020_v51, 1  ;;  %v1878_v21 = vunpack.c.h.bf16 %v1765_v30 }
 0x283   :  { %v2033_v58 = vadd.f32 %v2032_v44, %v2031_v13  ;;  %v1686_v63 = vadd.bf16 1065369472, %v2768_v24  ;;  %v3643_v9 = vpop.f32.mrb[72].mxu0  ;;  %v1907_v34 = vunpack.c.l.bf16 %v1784_v1  ;;  %v1917_v53 = vunpack.c.h.bf16 %v1784_v1  ;;  %v3645_v2 = vpop.f32.mrb[48].mxu1 }
 0x284   :  { %v2039_v10 = vadd.f32 %v2038_v19, %v1868_v6  ;;  %v3647_v45 = vpop.f32.mrb[73].mxu0  ;;  %v2022_v39 = vadd.f32 %v2021_v37, %v2020_v51  ;;  %2775 = vtanh.bf16 %v3641_v36  ;;  %v3651_v13 = vpop.f32.mrb[49].mxu1  ;;  %v3655_v5 = vadd.f32 %v1916_v46, %v1906_v62 }
 0x285   :  { %v2034_v25 = vrot.slane %v2033_v58, 1  ;;  %v1766_v31 = vmul.bf16 %v1686_v63, %v3576_v4  ;;  %v3653_v40 = vpop.f32.mrb[74].mxu0  ;;  %v1064_v19 = vadd.f32 %v3484_v56, %v3246_v41  ;;  %v1157_v44 = vadd.f32 %v3486_v32, %v3257_v52  ;;  %v3663_v51 = vpop.f32.mrb[50].mxu1 }
 0x286   :  { %v3657_v30 = vadd.f32 %v2039_v10, %v1878_v21  ;;  %4242 = vst [vmem:[#allocation20_spill] sm:$0xff] %v3663_v51  ;;  %v3665_v24 = vpop.f32.mrb[75].mxu0  ;;  %v1066_v1 = vadd.f32 %v3493_v27, %v3253_v48  ;;  %v1159_v62 = vadd.f32 %v3495_v59, %v3272_v15  ;;  %v3671_v46 = vpop.f32.mrb[51].mxu1  ;;  %v1068_v56 = vadd.f32 %v3499_v26, %v3246_v41 }
 0x287   :  { %4243 = vst [vmem:[#allocation21_spill] sm:$0xff] %v3665_v24  ;;  %v2035_v4 = vadd.f32 %v2034_v25, %v2033_v58  ;;  %v1869_v6 = vunpack.c.l.bf16 %v1766_v31  ;;  %4244 = vst [vmem:[#allocation22_spill] sm:$0xff] %v3671_v46  ;;  %v1161_v32 = vadd.f32 %v3501_v8, %v3257_v52  ;;  %v1070_v37 = vadd.f32 %v3508_v28, %v3253_v48 }
 0x288   :  { %v1163_v25 = vadd.f32 %v3510_v29, %v3272_v15  ;;  %v2153_v63 = vadd.f32 %v1917_v53, %v1907_v34  ;;  %v1879_v27 = vunpack.c.h.bf16 %v1766_v31  ;;  %v1483_v59 = vpack.c.bf16 %v1068_v56, %v1064_v19 }
 0x289   :  { %v2265_v58 = vcombine.low %v2022_v39, %v2035_v4  ;;  %v2052_v21 = vadd.f32 %v3606_v0, %v1869_v6  ;;  %v1465_v10 = vpack.c.bf16 %v1161_v32, %v1157_v44  ;;  %v1484_v46 = vpack.c.bf16 %v1070_v37, %v1066_v1 }
 0x28a   :  { %v1466_v24 = vpack.c.bf16 %v1163_v25, %v1159_v62  ;;  %v2770_v51 = vpop.eup %2769  ;;  %v1074_v28 = vadd.f32 %v3528_v35, %v3246_v41  ;;  %v1167_v29 = vadd.f32 %v3530_v50, %v3257_v52  ;;  %v3695_v31 = vmul.bf16 1056980736, %v1483_v59 }
 0x28b   :  { %v3683_v26 = vrot.slane %v2265_v58, %v3276_v18  ;;  %v3685_v8 = vadd.f32 %v2052_v21, %v1879_v27  ;;  %v3691_v53 = vpop.f32.mrb[76].mxu0  ;;  %v3693_v34 = vpop.f32.mrb[52].mxu1  ;;  %v1713_v39 = vadd.bf16 1065369472, %v2770_v51  ;;  %v3697_v19 = vmul.bf16 1056980736, %v1465_v10 }
 0x28c   :  { %v2772_v0 = vpop.eup %2771  ;;  %v1078_v44 = vadd.f32 %v3542_v14, %v3246_v41  ;;  %v3703_v1 = vmul.bf16 1056980736, %v1484_v46  ;;  %v3705_v50 = vmul.bf16 1056980736, %v1466_v24  ;;  %2777 = vtanh.bf16 %v3695_v31  ;;  %v3709_v32 = vpop.f32.mrb[77].mxu0 }
 0x28d   :  { %v2774_v4 = vpop.eup %2773  ;;  %v1695_v6 = vadd.bf16 1065369472, %v2772_v0  ;;  %v1793_v62 = vmul.bf16 %v1713_v39, %v3619_v16  ;;  %v3711_v37 = vpop.f32.mrb[53].mxu1  ;;  %2779 = vtanh.bf16 %v3697_v19  ;;  %v1171_v14 = vadd.f32 %v3544_v23, %v3257_v52 }
 0x28e   :  { %v1714_v56 = vadd.bf16 1065369472, %v2774_v4  ;;  %v1493_v51 = vpack.c.bf16 %v1078_v44, %v1074_v28  ;;  %v3717_v46 = vpop.f32.mrb[78].mxu0  ;;  %v3719_v24 = vpop.f32.mrb[54].mxu1  ;;  %2781 = vtanh.bf16 %v3703_v1  ;;  %v1076_v27 = vadd.f32 %v3535_v17, %v3253_v48 }
 0x28f   :  { %v1775_v41 = vmul.bf16 %v1695_v6, %v3621_v43  ;;  %4245 = vst [vmem:[#allocation23_spill] sm:$0xff] %v3719_v24  ;;  %v2776_v16 = vpop.eup %2775  ;;  %v1926_v25 = vunpack.c.l.bf16 %v1793_v62  ;;  %v2970_v21 = vmov 0.0   ;;  %v3728_v43 = vpop.f32.mrb[79].mxu0  ;;  %v1936_v59 = vunpack.c.h.bf16 %v1793_v62 }
 0x290   :  { %v1794_v58 = vmul.bf16 %v1714_v56, %v3636_v33  ;;  %80 = vst [vmem:[%s4230_s5 + $0x10] sm:$0xf] %v2970_v21  ;;  %4246 = vst [vmem:[#allocation24_spill] sm:$0xff] %v3728_v43  ;;  %v3730_v23 = vpop.f32.mrb[55].mxu1  ;;  %v1696_v28 = vadd.bf16 1065369472, %v2776_v16  ;;  %2783 = vtanh.bf16 %v3705_v50  ;;  %v1475_v6 = vpack.c.bf16 %v1171_v14, %v1167_v29 }
 0x291   :  { %4247 = vst [vmem:[#allocation25_spill] sm:$0xff] %v3730_v23  ;;  %v1888_v10 = vunpack.c.l.bf16 %v1775_v41  ;;  %v2141_v33 = vadd.f32 %v3655_v5, %v1926_v25  ;;  %v1898_v0 = vunpack.c.h.bf16 %v1775_v41  ;;  %v3734_v44 = vmul.bf16 1056980736, %v1493_v51  ;;  %v4248_v56 = vld [vmem:[#allocation13_spill] sm:$0xff]  ;;  %v2865_v14 = vld [vmem:[#allocation7] sm:$0xff] }
 0x292   :  { %v1927_v39 = vunpack.c.l.bf16 %v1794_v58  ;;  %v1776_v4 = vmul.bf16 %v1696_v28, %v3641_v36  ;;  %v1080_v21 = vadd.f32 %v4248_v56, %v3253_v48  ;;  %v1937_v23 = vunpack.c.h.bf16 %v1794_v58 }
 0x293   :  { %v2041_v17 = vadd.f32 %v3657_v30, %v1888_v10  ;;  %v3740_v35 = vpop.f32.mrb[80].mxu0  ;;  %v3742_v62 = vpop.f32.mrb[56].mxu1  ;;  %v3744_v16 = vadd.f32 %v2141_v33, %v1936_v59  ;;  %2785 = vtanh.bf16 %v3734_v44  ;;  %v3751_v29 = vmul.bf16 1056980736, %v1475_v6 }
 0x294   :  { %4249 = vst [vmem:[#allocation13_spill] sm:$0xff] %v3740_v35  ;;  %4250 = vst [vmem:[#allocation26_spill] sm:$0xff] %v3742_v62  ;;  %v2154_v5 = vadd.f32 %v2153_v63, %v1927_v39  ;;  %v3747_v51 = vpop.f32.mrb[81].mxu0  ;;  %v3749_v41 = vpop.f32.mrb[57].mxu1  ;;  %v1889_v36 = vunpack.c.l.bf16 %v1776_v4  ;;  %v4253_v48 = vsub.s32 6, %v3200_v22  ;;  %v4256_v63 = vcombine.low %v3532_v3, %v3558_v20  ;;  %v4260_v3 = vld [vmem:[#allocation12_spill] sm:$0xff] }
 0x295   :  { %4251 = vst [vmem:[#allocation27_spill] sm:$0xff] %v3747_v51  ;;  %4252 = vst [vmem:[#allocation28_spill] sm:$0xff] %v3749_v41  ;;  %v2042_v30 = vadd.f32 %v2041_v17, %v1898_v0  ;;  %v3757_v10 = vpop.f32.mrb[82].mxu0  ;;  %v3759_v59 = vpop.f32.mrb[58].mxu1  ;;  %v1494_v33 = vpack.c.bf16 %v1080_v21, %v1076_v27  ;;  %v4257_v0 = vsub.s32 7, %v3200_v22  ;;  %2787 = vtanh.bf16 %v3751_v29  ;;  %v4261_v27 = vld [vmem:[#allocation14_spill] sm:$0xff] }
 0x296   :  { %v3755_v25 = vrot.slane %v2865_v14, %v4253_v48  ;;  %4254 = vst [vmem:[#allocation29_spill] sm:$0xff] %v3757_v10  ;;  %4255 = vst [vmem:[#allocation30_spill] sm:$0xff] %v3759_v59  ;;  %v3765_v58 = vrot.slane %v4256_v63, %v3276_v18  ;;  %v3767_v28 = vadd.f32 %v2154_v5, %v1937_v23  ;;  %v3773_v17 = vpop.f32.mrb[83].mxu0  ;;  %v3775_v6 = vpop.f32.mrb[59].mxu1  ;;  %v1899_v48 = vunpack.c.h.bf16 %v1776_v4 }
 0x297   :  { %v3771_v39 = vrot.slane %v2865_v14, %v4257_v0  ;;  %4258 = vst [vmem:[#allocation31_spill] sm:$0xff] %v3773_v17  ;;  %4259 = vst [vmem:[#allocation32_spill] sm:$0xff] %v3775_v6  ;;  %v2043_v56 = vrot.slane %v2042_v30, 4  ;;  %v2054_v59 = vadd.f32 %v3685_v8, %v1889_v36  ;;  %v1169_v20 = vadd.f32 %v4260_v3, %v3272_v15  ;;  %v2778_v14 = vpop.eup %2777 }
 0x298   :  { %v3781_v23 = vmul.bf16 1056980736, %v1494_v33  ;;  %v1173_v21 = vadd.f32 %v4261_v27, %v3272_v15  ;;  %v1177_v5 = vadd.f32 %v3564_v42, %v3257_v52  ;;  %v3789_v4 = vadd.f32 %v3566_v47, %v3755_v25  ;;  %v2780_v36 = vpop.eup %2779 }
 0x299   :  { %v2044_v63 = vadd.f32 %v2043_v56, %v2042_v30  ;;  %v2055_v0 = vadd.f32 %v2054_v59, %v1899_v48  ;;  %v3793_v8 = vadd.f32 %v3571_v7, %v3272_v15  ;;  %v1723_v33 = vadd.bf16 1065369472, %v2778_v14  ;;  %v2782_v42 = vpop.eup %2781 }
 0x29a   :  { %2789 = vtanh.bf16 %v3781_v23  ;;  %v1476_v3 = vpack.c.bf16 %v1173_v21, %v1169_v20  ;;  %v1181_v27 = vadd.f32 %v3580_v12, %v3257_v52  ;;  %v1705_v59 = vadd.bf16 1065369472, %v2780_v36 }
 0x29b   :  { %v2045_v6 = vrot.slane %v2044_v63, 2  ;;  %v2056_v30 = vrot.slane %v2055_v0, 4  ;;  %v3800_v47 = vadd.f32 %v3573_v54, %v3771_v39  ;;  %v3802_v56 = vpop.f32.mrb[84].mxu0  ;;  %v3804_v7 = vpop.f32.mrb[60].mxu1  ;;  %v1803_v14 = vmul.bf16 %v1723_v33, %v3695_v31 }
 0x29c   :  { %4262 = vst [vmem:[#allocation12_spill] sm:$0xff] %v3802_v56  ;;  %4263 = vst [vmem:[#allocation14_spill] sm:$0xff] %v3804_v7  ;;  %v2784_v48 = vpop.eup %2783  ;;  %v1724_v17 = vadd.bf16 1065369472, %v2782_v42  ;;  %v3807_v20 = vmul.bf16 1056980736, %v1476_v3  ;;  %v1485_v21 = vpack.c.bf16 %v1181_v27, %v1177_v5  ;;  %v1785_v54 = vmul.bf16 %v1705_v59, %v3697_v19 }
 0x29d   :  { %v3809_v12 = vpop.f32.mrb[85].mxu0  ;;  %v3811_v41 = vpop.f32.mrb[61].mxu1  ;;  %v2046_v36 = vadd.f32 %v2045_v6, %v2044_v63  ;;  %v2057_v10 = vadd.f32 %v2056_v30, %v2055_v0  ;;  %v1706_v51 = vadd.bf16 1065369472, %v2784_v48  ;;  %v1946_v7 = vunpack.c.l.bf16 %v1803_v14  ;;  %v4268_v5 = vld [vmem:[#allocation15_spill] sm:$0xff] }
 0x29e   :  { %4264 = vst [vmem:[#allocation33_spill] sm:$0xff] %v3809_v12  ;;  %4265 = vst [vmem:[#allocation34_spill] sm:$0xff] %v3811_v41  ;;  %v3814_v62 = vpop.f32.mrb[86].mxu0  ;;  %v3816_v56 = vpop.f32.mrb[62].mxu1  ;;  %v1804_v31 = vmul.bf16 %v1724_v17, %v3703_v1  ;;  %2791 = vtanh.bf16 %v3807_v20  ;;  %v1234_v33 = vadd.f32 %v4268_v5, %v3755_v25  ;;  %v1956_v0 = vunpack.c.h.bf16 %v1803_v14 }
 0x29f   :  { %4266 = vst [vmem:[#allocation35_spill] sm:$0xff] %v3814_v62  ;;  %4267 = vst [vmem:[#allocation36_spill] sm:$0xff] %v3816_v56  ;;  %v3822_v3 = vpop.f32.mrb[87].mxu0  ;;  %v3824_v27 = vpop.f32.mrb[63].mxu1  ;;  %v2047_v63 = vrot.slane %v2046_v36, 1  ;;  %v2058_v19 = vrot.slane %v2057_v10, 2  ;;  %v1908_v42 = vunpack.c.l.bf16 %v1785_v54  ;;  %v2143_v30 = vadd.f32 %v3744_v16, %v1946_v7 }
 0x2a0   :  { %4269 = vst [vmem:[#allocation15_spill] sm:$0xff] %v3822_v3  ;;  %4270 = vst [vmem:[#allocation37_spill] sm:$0xff] %v3824_v27  ;;  %v2786_v6 = vpop.eup %2785  ;;  %v1918_v59 = vunpack.c.h.bf16 %v1785_v54  ;;  %v1947_v48 = vunpack.c.l.bf16 %v1804_v31  ;;  %v1786_v1 = vmul.bf16 %v1706_v51, %v3705_v50  ;;  %v1957_v56 = vunpack.c.h.bf16 %v1804_v31 }
 0x2a1   :  { %v3828_v17 = vadd.f32 %v2047_v63, %v2046_v36  ;;  %v2059_v41 = vadd.f32 %v2058_v19, %v2057_v10  ;;  %v1733_v5 = vadd.bf16 1065369472, %v2786_v6  ;;  %v2788_v62 = vpop.eup %2787  ;;  %v2144_v3 = vadd.f32 %v2143_v30, %v1956_v0 }
 0x2a2   :  { %v2156_v27 = vadd.f32 %v3767_v28, %v1947_v48  ;;  %v1909_v12 = vunpack.c.l.bf16 %v1786_v1  ;;  %v1919_v35 = vunpack.c.h.bf16 %v1786_v1  ;;  %v1715_v24 = vadd.bf16 1065369472, %v2788_v62 }
 0x2a3   :  { %v2060_v43 = vrot.slane %v2059_v41, 1  ;;  %v1813_v14 = vmul.bf16 %v1733_v5, %v3734_v44  ;;  %v3832_v16 = vmul.bf16 1056980736, %v1485_v21  ;;  %v3834_v7 = vpop.f32.mrb[88].mxu0  ;;  %v2166_v50 = vadd.f32 %v1918_v59, %v1908_v42  ;;  %v3839_v54 = vpop.f32.mrb[64].mxu1 }
 0x2a4   :  { %v2157_v51 = vadd.f32 %v2156_v27, %v1957_v56  ;;  %v1427_v10 = vpack.c.bf16 %v1234_v33, %v3789_v4  ;;  %v1183_v36 = vadd.f32 %v3585_v55, %v3272_v15  ;;  %v3841_v28 = vpop.f32.mrb[89].mxu0  ;;  %v2179_v44 = vadd.f32 %v1919_v35, %v1909_v12  ;;  %v3846_v63 = vpop.f32.mrb[65].mxu1  ;;  %v4278_v35 = vld [vmem:[#allocation19_spill] sm:$0xff] }
 0x2a5   :  { %v2790_v31 = vpop.eup %2789  ;;  %v3843_v6 = vadd.f32 %v2060_v43, %v2059_v41  ;;  %v1966_v62 = vunpack.c.l.bf16 %v1813_v14  ;;  %v1795_v21 = vmul.bf16 %v1715_v24, %v3751_v29  ;;  %v3848_v19 = vpop.f32.mrb[90].mxu0  ;;  %2793 = vtanh.bf16 %v3832_v16 }
 0x2a6   :  { %v1734_v56 = vadd.bf16 1065369472, %v2790_v31  ;;  %v3851_v4 = vmul.bf16 1056980736, %v1427_v10  ;;  %v1486_v55 = vpack.c.bf16 %v1183_v36, %v3793_v8  ;;  %v3854_v33 = vpop.f32.mrb[66].mxu1  ;;  %v3856_v27 = vpop.f32.mrb[91].mxu0  ;;  %v1976_v43 = vunpack.c.h.bf16 %v1813_v14 }
 0x2a7   :  { %v2145_v24 = vadd.f32 %v2144_v3, %v1966_v62  ;;  %v1928_v41 = vunpack.c.l.bf16 %v1795_v21  ;;  %v3860_v29 = vpop.f32.mrb[67].mxu1  ;;  %v1236_v8 = vadd.f32 %v3587_v60, %v3771_v39  ;;  %v1938_v59 = vunpack.c.h.bf16 %v1795_v21 }
 0x2a8   :  { %v1814_v12 = vmul.bf16 %v1734_v56, %v3781_v23  ;;  %2795 = vtanh.bf16 %v3851_v4  ;;  %v3864_v0 = vmul.bf16 1056980736, %v1486_v55  ;;  %v1187_v1 = vadd.f32 %v3602_v61, %v3257_v52 }
 0x2a9   :  { %v2792_v42 = vpop.eup %2791  ;;  %v2146_v30 = vadd.f32 %v2145_v24, %v1976_v43  ;;  %v2167_v48 = vadd.f32 %v2166_v50, %v1928_v41  ;;  %v1428_v36 = vpack.c.bf16 %v1236_v8, %v3800_v47  ;;  %v1240_v60 = vadd.f32 %v3604_v57, %v3755_v25  ;;  %v4271_v57 = vld [vmem:[#allocation16_spill] sm:$0xff] }
 0x2aa   :  { %v1967_v3 = vunpack.c.l.bf16 %v1814_v12  ;;  %v1977_v5 = vunpack.c.h.bf16 %v1814_v12  ;;  %v1716_v14 = vadd.bf16 1065369472, %v2792_v42  ;;  %2797 = vtanh.bf16 %v3864_v0 }
 0x2ab   :  { %v2147_v23 = vrot.slane %v2146_v30, 4  ;;  %v3871_v10 = vadd.f32 %v2167_v48, %v1938_v59  ;;  %v3876_v31 = vpop.f32.mrb[92].mxu0  ;;  %v3878_v62 = vpop.f32.mrb[68].mxu1  ;;  %v1189_v21 = vadd.f32 %v3610_v11, %v3272_v15  ;;  %v1242_v56 = vadd.f32 %v3612_v49, %v3771_v39  ;;  %v4275_v59 = vld [vmem:[#allocation18_spill] sm:$0xff] }
 0x2ac   :  { %v2158_v50 = vadd.f32 %v2157_v51, %v1967_v3  ;;  %v1796_v61 = vmul.bf16 %v1716_v14, %v3807_v20  ;;  %v3885_v55 = vpop.f32.mrb[93].mxu0  ;;  %v3887_v43 = vpop.f32.mrb[69].mxu1  ;;  %v3889_v24 = vmul.bf16 1056980736, %v1428_v36  ;;  %v1191_v41 = vadd.f32 %v4271_v57, %v3257_v52  ;;  %v4272_v51 = vld [vmem:[#allocation17_spill] sm:$0xff] }
 0x2ad   :  { %v2148_v47 = vadd.f32 %v2147_v23, %v2146_v30  ;;  %v1244_v12 = vadd.f32 %v4272_v51, %v3755_v25  ;;  %v3895_v20 = vpop.f32.mrb[94].mxu0  ;;  %v3897_v8 = vpop.f32.mrb[70].mxu1  ;;  %v1193_v48 = vadd.f32 %v4275_v59, %v3272_v15  ;;  %v1250_v59 = vadd.f32 %v3643_v9, %v3755_v25 }
 0x2ae   :  { %4273 = vst [vmem:[#allocation16_spill] sm:$0xff] %v3895_v20  ;;  %4274 = vst [vmem:[#allocation17_spill] sm:$0xff] %v3897_v8  ;;  %v2159_v11 = vadd.f32 %v2158_v50, %v1977_v5  ;;  %v1929_v42 = vunpack.c.l.bf16 %v1796_v61  ;;  %v1939_v49 = vunpack.c.h.bf16 %v1796_v61  ;;  %v3901_v3 = vpop.f32.mrb[95].mxu0  ;;  %v3903_v30 = vpop.f32.mrb[71].mxu1  ;;  %2799 = vtanh.bf16 %v3889_v24  ;;  %v403_v50 = vld [vmem:[#allocation7 + $0x8] sm:$0x3] }
 0x2af   :  { %4276 = vst [vmem:[#allocation18_spill] sm:$0xff] %v3901_v3  ;;  %4277 = vst [vmem:[#allocation38_spill] sm:$0xff] %v3903_v30  ;;  %v2149_v14 = vrot.slane %v2148_v47, 2  ;;  %v1495_v52 = vpack.c.bf16 %v1191_v41, %v1187_v1  ;;  %v1437_v23 = vpack.c.bf16 %v1244_v12, %v1240_v60  ;;  %v1496_v51 = vpack.c.bf16 %v1193_v48, %v1189_v21 }
 0x2b0   :  { %v2160_v36 = vrot.slane %v2159_v11, 4  ;;  %v2180_v57 = vadd.f32 %v2179_v44, %v1929_v42  ;;  %v1246_v5 = vadd.f32 %v4278_v35, %v3771_v39  ;;  %v2794_v61 = vpop.eup %2793  ;;  %v4279_v41 = vsub.s32 0, %v3200_v22 }
 0x2b1   :  { %v2150_v8 = vadd.f32 %v2149_v14, %v2148_v47  ;;  %v3908_v20 = vmul.bf16 1056980736, %v1495_v52  ;;  %v3910_v15 = vmul.bf16 1056980736, %v1437_v23  ;;  %v1725_v1 = vadd.bf16 1065369472, %v2794_v61 }
 0x2b2   :  { %v2161_v30 = vadd.f32 %v2160_v36, %v2159_v11  ;;  %v2181_v3 = vadd.f32 %v2180_v57, %v1939_v49  ;;  %v3914_v60 = vmul.bf16 1056980736, %v1496_v51  ;;  %v1438_v35 = vpack.c.bf16 %v1246_v5, %v1242_v56 }
 0x2b3   :  { %v2796_v44 = vpop.eup %2795  ;;  %v2151_v21 = vrot.slane %v2150_v8, 1  ;;  %2801 = vtanh.bf16 %v3908_v20  ;;  %v3919_v47 = vrot.slane %v403_v50, %v4279_v41  ;;  %v3921_v12 = vpop.f32.mrb[72].mxu1  ;;  %v1805_v48 = vmul.bf16 %v1725_v1, %v3832_v16 }
 0x2b4   :  { %v2162_v42 = vrot.slane %v2161_v30, 2  ;;  %v1667_v9 = vadd.bf16 1065369472, %v2796_v44  ;;  %2803 = vtanh.bf16 %v3910_v15  ;;  %v3925_v11 = vpop.f32.mrb[73].mxu1  ;;  %v3928_v52 = vmul.bf16 1056980736, %v1438_v35 }
 0x2b5   :  { %4280 = vst [vmem:[#allocation19_spill] sm:$0xff] %v3925_v11  ;;  %v2798_v49 = vpop.eup %2797  ;;  %v2152_v14 = vadd.f32 %v2151_v21, %v2150_v8  ;;  %2805 = vtanh.bf16 %v3914_v60  ;;  %v1343_v56 = vadd.f32 %v3645_v2, %v3919_v47  ;;  %v3932_v23 = vpop.f32.mrb[74].mxu1  ;;  %v1948_v57 = vunpack.c.l.bf16 %v1805_v48 }
 0x2b6   :  { %v2163_v36 = vadd.f32 %v2162_v42, %v2161_v30  ;;  %v1958_v51 = vunpack.c.h.bf16 %v1805_v48  ;;  %v1747_v16 = vmul.bf16 %v1667_v9, %v3851_v4  ;;  %v3935_v5 = vpop.f32.mrb[75].mxu1  ;;  %v1726_v61 = vadd.bf16 1065369472, %v2798_v49 }
 0x2b7   :  { %4281 = vst [vmem:[#allocation39_spill] sm:$0xff] %v3935_v5  ;;  %2807 = vtanh.bf16 %v3928_v52  ;;  %v1252_v8 = vadd.f32 %v3647_v45, %v3771_v39  ;;  %v4282_v1 = vsub.s32 1, %v3200_v22  ;;  %v2169_v21 = vadd.f32 %v3871_v10, %v1948_v57  ;;  %v4283_v45 = vld [vmem:[#allocation20_spill] sm:$0xff]  ;;  %v4284_v10 = vld [vmem:[#allocation21_spill] sm:$0xff] }
 0x2b8   :  { %v2164_v2 = vrot.slane %v2163_v36, 1  ;;  %v1830_v30 = vunpack.c.l.bf16 %v1747_v16  ;;  %v1840_v35 = vunpack.c.h.bf16 %v1747_v16  ;;  %v1806_v4 = vmul.bf16 %v1726_v61, %v3864_v0 }
 0x2b9   :  { %v3942_v44 = vrot.slane %v403_v50, %v4282_v1  ;;  %v1254_v42 = vadd.f32 %v3653_v40, %v3755_v25  ;;  %v1347_v48 = vadd.f32 %v4283_v45, %v3919_v47  ;;  %v2800_v22 = vpop.eup %2799  ;;  %v2170_v9 = vadd.f32 %v2169_v21, %v1958_v51  ;;  %v4285_v45 = vld [vmem:[#allocation22_spill] sm:$0xff] }
 0x2ba   :  { %v2165_v50 = vadd.f32 %v2164_v2, %v2163_v36  ;;  %v2062_v49 = vadd.f32 %v1840_v35, %v1830_v30  ;;  %v1256_v57 = vadd.f32 %v4284_v10, %v3771_v39  ;;  %v1949_v16 = vunpack.c.l.bf16 %v1806_v4 }
 0x2bb   :  { %v1345_v41 = vadd.f32 %v3651_v13, %v3942_v44  ;;  %v1959_v0 = vunpack.c.h.bf16 %v1806_v4  ;;  %v1668_v61 = vadd.bf16 1065369472, %v2800_v22  ;;  %v1447_v1 = vpack.c.bf16 %v1254_v42, %v1250_v59  ;;  %v3954_v13 = vpop.f32.mrb[76].mxu1 }
 0x2bc   :  { %v2307_v5 = vcombine.low %v2152_v14, %v2165_v50  ;;  %v1429_v40 = vpack.c.bf16 %v1347_v48, %v1343_v56  ;;  %v1448_v11 = vpack.c.bf16 %v1256_v57, %v1252_v8  ;;  %v1349_v36 = vadd.f32 %v4285_v45, %v3942_v44  ;;  %v3958_v2 = vpop.f32.mrb[77].mxu1 }
 0x2bd   :  { %v2182_v51 = vadd.f32 %v2181_v3, %v1949_v16  ;;  %v1748_v21 = vmul.bf16 %v1668_v61, %v3889_v24  ;;  %v3961_v30 = vmul.bf16 1056980736, %v1447_v1  ;;  %v3965_v35 = vadd.f32 %v3691_v53, %v3755_v25  ;;  %v3967_v59 = vpop.f32.mrb[78].mxu1 }
 0x2be   :  { %v2802_v14 = vpop.eup %2801  ;;  %v2321_v56 = vrot.slane %v2307_v5, %v3276_v18  ;;  %v3970_v8 = vmul.bf16 1056980736, %v1429_v40  ;;  %v3972_v4 = vmul.bf16 1056980736, %v1448_v11  ;;  %v1430_v42 = vpack.c.bf16 %v1349_v36, %v1345_v41  ;;  %v3974_v48 = vpop.f32.mrb[79].mxu1 }
 0x2bf   :  { %v2804_v3 = vpop.eup %2803  ;;  %v2183_v24 = vadd.f32 %v2182_v51, %v1959_v0  ;;  %v1831_v22 = vunpack.c.l.bf16 %v1748_v21  ;;  %v1841_v50 = vunpack.c.h.bf16 %v1748_v21  ;;  %v1735_v10 = vadd.bf16 1065369472, %v2802_v14 }
 0x2c0   :  { %v2806_v57 = vpop.eup %2805  ;;  %v2322_v53 = vcombine.low %v3765_v58, %v2321_v56  ;;  %v1677_v16 = vadd.bf16 1065369472, %v2804_v3  ;;  %2809 = vtanh.bf16 %v3961_v30  ;;  %v3978_v61 = vmul.bf16 1056980736, %v1430_v42 }
 0x2c1   :  { %v2075_v5 = vadd.f32 %v1841_v50, %v1831_v22  ;;  %v1815_v11 = vmul.bf16 %v1735_v10, %v3908_v20  ;;  %v1736_v1 = vadd.bf16 1065369472, %v2806_v57  ;;  %2811 = vtanh.bf16 %v3970_v8 }
 0x2c2   :  { %v2808_v41 = vpop.eup %2807  ;;  %v2352_v40 = vrot.slane %v2322_v53, 7  ;;  %v1757_v0 = vmul.bf16 %v1677_v16, %v3910_v15  ;;  %2813 = vtanh.bf16 %v3972_v4  ;;  %v1353_v58 = vadd.f32 %v3693_v34, %v3919_v47 }
 0x2c3   :  { %v1968_v45 = vunpack.c.l.bf16 %v1815_v11  ;;  %v1978_v36 = vunpack.c.h.bf16 %v1815_v11  ;;  %v1816_v51 = vmul.bf16 %v1736_v1, %v3914_v60  ;;  %v1678_v21 = vadd.bf16 1065369472, %v2808_v41 }
 0x2c4   :  { %v4286_v20 = vcombine.low %v3627_v38, %v3683_v26  ;;  %v1850_v56 = vunpack.c.l.bf16 %v1757_v0  ;;  %v1860_v42 = vunpack.c.h.bf16 %v1757_v0  ;;  %2815 = vtanh.bf16 %v3978_v61 }
 0x2c5   :  { %v2171_v3 = vadd.f32 %v2170_v9, %v1968_v45  ;;  %v1969_v22 = vunpack.c.l.bf16 %v1816_v51  ;;  %v1979_v50 = vunpack.c.h.bf16 %v1816_v51  ;;  %v1758_v60 = vmul.bf16 %v1678_v21, %v3928_v52  ;;  %v4287_v52 = vld [vmem:[#allocation23_spill] sm:$0xff] }
 0x2c6   :  { %v2354_v14 = vsel %vm2353_vm1, %v2352_v40, %v4286_v20  ;;  %v2063_v10 = vadd.f32 %v2062_v49, %v1850_v56  ;;  %v1262_v57 = vadd.f32 %v3709_v32, %v3771_v39  ;;  %v1355_v16 = vadd.f32 %v3711_v37, %v3942_v44 }
 0x2c7   :  { %v2356_v15 = vsel %vm2355_vm2, %v2352_v40, %v2354_v14  ;;  %v2172_v26 = vadd.f32 %v2171_v3, %v1978_v36  ;;  %v2184_v53 = vadd.f32 %v2183_v24, %v1969_v22  ;;  %v1851_v1 = vunpack.c.l.bf16 %v1758_v60  ;;  %v4289_v24 = vld [vmem:[#allocation25_spill] sm:$0xff] }
 0x2c8   :  { %v2358_v34 = vsel %vm2357_vm3, %v2352_v40, %v2356_v15  ;;  %v2064_v11 = vadd.f32 %v2063_v10, %v1860_v42  ;;  %v1861_v9 = vunpack.c.h.bf16 %v1758_v60  ;;  %v1264_v49 = vadd.f32 %v3717_v46, %v3755_v25 }
 0x2c9   :  { %v2360_v38 = vsel %vm2359_vm4, %v2352_v40, %v2358_v34  ;;  %v2173_v41 = vrot.slane %v2172_v26, 4  ;;  %v2185_v0 = vadd.f32 %v2184_v53, %v1979_v50  ;;  %v1357_v45 = vadd.f32 %v4287_v52, %v3919_v47  ;;  %v4288_v40 = vld [vmem:[#allocation24_spill] sm:$0xff] }
 0x2ca   :  { %v2390_v51 = vmul.f32 0.015625, %v2360_v38  ;;  %v2076_v32 = vadd.f32 %v2075_v5, %v1851_v1  ;;  %v1266_v36 = vadd.f32 %v4288_v40, %v3771_v39  ;;  %v1359_v21 = vadd.f32 %v4289_v24, %v3942_v44 }
 0x2cb   :  { %v2810_v37 = vpop.eup %2809  ;;  %v2174_v20 = vadd.f32 %v2173_v41, %v2172_v26  ;;  %v2186_v14 = vrot.slane %v2185_v0, 4  ;;  %v1457_v56 = vpack.c.bf16 %v1264_v49, %v3965_v35  ;;  %v1439_v42 = vpack.c.bf16 %v1357_v45, %v1353_v58 }
 0x2cc   :  { %v2812_v15 = vpop.eup %2811  ;;  %2393 = vst [vmem:[%s4230_s5] sm:$0xff] %v2390_v51  ;;  %v2077_v46 = vadd.f32 %v2076_v32, %v1861_v9  ;;  %v1687_v3 = vadd.bf16 1065369472, %v2810_v37  ;;  %v1458_v5 = vpack.c.bf16 %v1266_v36, %v1262_v57  ;;  %v1440_v22 = vpack.c.bf16 %v1359_v21, %v1355_v16 }
 0x2cd   :  { %v2814_v50 = vpop.eup %2813  ;;  %v2175_v34 = vrot.slane %v2174_v20, 2  ;;  %v2187_v10 = vadd.f32 %v2186_v14, %v2185_v0  ;;  %v1669_v60 = vadd.bf16 1065369472, %v2812_v15  ;;  %v1537_v38 = vmul.bf16 1056980736, %v1457_v56 }
 0x2ce   :  { %v1767_v26 = vmul.bf16 %v1687_v3, %v3961_v30  ;;  %v1688_v53 = vadd.bf16 1065369472, %v2814_v50  ;;  %v4013_v1 = vmul.bf16 1056980736, %v1439_v42  ;;  %v4017_v52 = vmul.bf16 1056980736, %v1458_v5 }
 0x2cf   :  { %v2816_v35 = vpop.eup %2815  ;;  %v2176_v58 = vadd.f32 %v2175_v34, %v2174_v20  ;;  %v2188_v41 = vrot.slane %v2187_v10, 2  ;;  %v1749_v49 = vmul.bf16 %v1669_v60, %v3970_v8  ;;  %2817 = vtanh.bf16 %v1537_v38  ;;  %v4291_v5 = vld [vmem:[#allocation26_spill] sm:$0xff]  ;;  %v4292_v34 = vld [vmem:[#allocation27_spill] sm:$0xff] }
 0x2d0   :  { %v1870_v9 = vunpack.c.l.bf16 %v1767_v26  ;;  %v1768_v57 = vmul.bf16 %v1688_v53, %v3972_v4  ;;  %v1670_v16 = vadd.bf16 1065369472, %v2816_v35  ;;  %v1880_v30 = vunpack.c.h.bf16 %v1767_v26  ;;  %v4294_v26 = vld [vmem:[#allocation28_spill] sm:$0xff]  ;;  %v4295_v35 = vld [vmem:[#allocation30_spill] sm:$0xff] }
 0x2d1   :  { %v2177_v0 = vrot.slane %v2176_v58, 1  ;;  %v2189_v45 = vadd.f32 %v2188_v41, %v2187_v10  ;;  %v1832_v51 = vunpack.c.l.bf16 %v1749_v49  ;;  %v1842_v32 = vunpack.c.h.bf16 %v1749_v49  ;;  %v4296_v41 = vld [vmem:[#allocation31_spill] sm:$0xff] }
 0x2d2   :  { %v2065_v40 = vadd.f32 %v2064_v11, %v1870_v9  ;;  %v1871_v36 = vunpack.c.l.bf16 %v1768_v57  ;;  %v1750_v24 = vmul.bf16 %v1670_v16, %v3978_v61  ;;  %2819 = vtanh.bf16 %v4013_v1  ;;  %v4290_v61 = vld [vmem:[#allocation13_spill] sm:$0xff]  ;;  %v4297_v9 = vld [vmem:[#allocation32_spill] sm:$0xff] }
 0x2d3   :  { %v4020_v21 = vadd.f32 %v2177_v0, %v2176_v58  ;;  %v2190_v37 = vrot.slane %v2189_v45, 1  ;;  %v1881_v20 = vunpack.c.h.bf16 %v1768_v57  ;;  %v4025_v56 = vadd.f32 %v1842_v32, %v1832_v51  ;;  %v4299_v32 = vld [vmem:[#allocation14_spill] sm:$0xff] }
 0x2d4   :  { %v2066_v8 = vadd.f32 %v2065_v40, %v1880_v30  ;;  %v2078_v4 = vadd.f32 %v2077_v46, %v1871_v36  ;;  %2821 = vtanh.bf16 %v4017_v52  ;;  %v4028_v42 = vmul.bf16 1056980736, %v1440_v22  ;;  %v4293_v22 = vld [vmem:[#allocation29_spill] sm:$0xff] }
 0x2d5   :  { %v4023_v14 = vadd.f32 %v2190_v37, %v2189_v45  ;;  %v1833_v15 = vunpack.c.l.bf16 %v1750_v24  ;;  %v1270_v3 = vadd.f32 %v4290_v61, %v3755_v25  ;;  %v1363_v50 = vadd.f32 %v4291_v5, %v3919_v47  ;;  %v4298_v45 = vld [vmem:[#allocation12_spill] sm:$0xff] }
 0x2d6   :  { %v4030_v11 = vadd.f32 %v2078_v4, %v1881_v20  ;;  %2823 = vtanh.bf16 %v4028_v42  ;;  %v1272_v10 = vadd.f32 %v4292_v34, %v3771_v39  ;;  %v1274_v60 = vadd.f32 %v4293_v22, %v3755_v25  ;;  %v4300_v4 = vld [vmem:[#allocation33_spill] sm:$0xff]  ;;  %v4301_v22 = vld [vmem:[#allocation35_spill] sm:$0xff] }
 0x2d7   :  { %v2323_v46 = vcombine.low %v4020_v21, %v4023_v14  ;;  %v1365_v53 = vadd.f32 %v4294_v26, %v3942_v44  ;;  %v1367_v58 = vadd.f32 %v4295_v35, %v3919_v47  ;;  %v1276_v49 = vadd.f32 %v4296_v41, %v3771_v39 }
 0x2d8   :  { %v1369_v57 = vadd.f32 %v4297_v9, %v3942_v44  ;;  %v1843_v16 = vunpack.c.h.bf16 %v1750_v24  ;;  %v1467_v0 = vpack.c.bf16 %v1274_v60, %v1270_v3  ;;  %v1280_v51 = vadd.f32 %v4298_v45, %v3755_v25  ;;  %v4302_v3 = vld [vmem:[#allocation36_spill] sm:$0xff]  ;;  %v4304_v45 = vld [vmem:[#allocation37_spill] sm:$0xff] }
 0x2d9   :  { %v1373_v30 = vadd.f32 %v4299_v32, %v3919_v47  ;;  %v1449_v36 = vpack.c.bf16 %v1367_v58, %v1363_v50  ;;  %v1468_v37 = vpack.c.bf16 %v1276_v49, %v1272_v10  ;;  %v1282_v61 = vadd.f32 %v4300_v4, %v3771_v39  ;;  %v4303_v50 = vld [vmem:[#allocation15_spill] sm:$0xff] }
 0x2da   :  { %v2818_v40 = vpop.eup %2817  ;;  %v1450_v20 = vpack.c.bf16 %v1369_v57, %v1365_v53  ;;  %v4057_v34 = vmul.bf16 1056980736, %v1467_v0  ;;  %v1284_v24 = vadd.f32 %v4301_v22, %v3755_v25  ;;  %v1377_v60 = vadd.f32 %v4302_v3, %v3919_v47 }
 0x2db   :  { %v1697_v5 = vadd.bf16 1065369472, %v2818_v40  ;;  %v4063_v26 = vmul.bf16 1056980736, %v1449_v36  ;;  %v4065_v35 = vmul.bf16 1056980736, %v1468_v37  ;;  %v1286_v10 = vadd.f32 %v4303_v50, %v3771_v39 }
 0x2dc   :  { %v4067_v41 = vmul.bf16 1056980736, %v1450_v20  ;;  %2825 = vtanh.bf16 %v4057_v34  ;;  %v1477_v58 = vpack.c.bf16 %v1284_v24, %v1280_v51  ;;  %v1459_v49 = vpack.c.bf16 %v1377_v60, %v1373_v30  ;;  %v4305_v37 = vld [vmem:[#allocation34_spill] sm:$0xff] }
 0x2dd   :  { %v1777_v53 = vmul.bf16 %v1697_v5, %v1537_v38  ;;  %v2820_v9 = vpop.eup %2819  ;;  %v2101_v57 = vadd.f32 %v1843_v16, %v1833_v15  ;;  %2827 = vtanh.bf16 %v4063_v26  ;;  %v1478_v0 = vpack.c.bf16 %v1286_v10, %v1282_v61 }
 0x2de   :  { %v1379_v32 = vadd.f32 %v4304_v45, %v3942_v44  ;;  %v1679_v36 = vadd.bf16 1065369472, %v2820_v9  ;;  %2829 = vtanh.bf16 %v4065_v35  ;;  %v1375_v20 = vadd.f32 %v4305_v37, %v3942_v44 }
 0x2df   :  { %v1890_v40 = vunpack.c.l.bf16 %v1777_v53  ;;  %v2822_v38 = vpop.eup %2821  ;;  %v1900_v4 = vunpack.c.h.bf16 %v1777_v53  ;;  %2831 = vtanh.bf16 %v4067_v41  ;;  %v4079_v51 = vmul.bf16 1056980736, %v1477_v58 }
 0x2e0   :  { %v4081_v15 = vmul.bf16 1056980736, %v1459_v49  ;;  %v1759_v30 = vmul.bf16 %v1679_v36, %v4013_v1  ;;  %v1698_v61 = vadd.bf16 1065369472, %v2822_v38  ;;  %v1460_v5 = vpack.c.bf16 %v1379_v32, %v1375_v20 }
 0x2e1   :  { %v2067_v16 = vadd.f32 %v2066_v8, %v1890_v40  ;;  %v2824_v22 = vpop.eup %2823  ;;  %2833 = vtanh.bf16 %v4079_v51  ;;  %v4085_v24 = vmul.bf16 1056980736, %v1478_v0  ;;  %v1290_v3 = vadd.f32 %v3834_v7, %v3755_v25 }
 0x2e2   :  { %v1383_v60 = vadd.f32 %v3839_v54, %v3919_v47  ;;  %v1852_v10 = vunpack.c.l.bf16 %v1759_v30  ;;  %v1862_v53 = vunpack.c.h.bf16 %v1759_v30  ;;  %v1778_v8 = vmul.bf16 %v1698_v61, %v4017_v52 }
 0x2e3   :  { %v2068_v50 = vadd.f32 %v2067_v16, %v1900_v4  ;;  %v1680_v58 = vadd.bf16 1065369472, %v2824_v22  ;;  %2835 = vtanh.bf16 %v4081_v15  ;;  %v4093_v1 = vmul.bf16 1056980736, %v1460_v5 }
 0x2e4   :  { %v1294_v49 = vadd.f32 %v3848_v19, %v3755_v25  ;;  %v2089_v0 = vadd.f32 %v4025_v56, %v1852_v10  ;;  %v1891_v7 = vunpack.c.l.bf16 %v1778_v8  ;;  %v1901_v45 = vunpack.c.h.bf16 %v1778_v8 }
 0x2e5   :  { %v2069_v9 = vrot.slane %v2068_v50, 4  ;;  %v1760_v54 = vmul.bf16 %v1680_v58, %v4028_v42  ;;  %2837 = vtanh.bf16 %v4085_v24  ;;  %v1387_v52 = vadd.f32 %v3854_v33, %v3919_v47 }
 0x2e6   :  { %v1487_v32 = vpack.c.bf16 %v1294_v49, %v1290_v3  ;;  %v2090_v36 = vadd.f32 %v2089_v0, %v1862_v53  ;;  %v2080_v37 = vadd.f32 %v4030_v11, %v1891_v7  ;;  %2839 = vtanh.bf16 %v4093_v1 }
 0x2e7   :  { %v2070_v40 = vadd.f32 %v2069_v9, %v2068_v50  ;;  %v2826_v19 = vpop.eup %2825  ;;  %v1853_v20 = vunpack.c.l.bf16 %v1760_v54  ;;  %v4106_v56 = vadd.f32 %v3841_v28, %v3771_v39  ;;  %v1469_v42 = vpack.c.bf16 %v1387_v52, %v1383_v60 }
 0x2e8   :  { %v4108_v38 = vmul.bf16 1056980736, %v1487_v32  ;;  %v2828_v4 = vpop.eup %2827  ;;  %v2081_v30 = vadd.f32 %v2080_v37, %v1901_v45  ;;  %v1863_v61 = vunpack.c.h.bf16 %v1760_v54  ;;  %v1707_v33 = vadd.bf16 1065369472, %v2826_v19 }
 0x2e9   :  { %v2071_v16 = vrot.slane %v2070_v40, 2  ;;  %v2830_v5 = vpop.eup %2829  ;;  %v2102_v22 = vadd.f32 %v2101_v57, %v1853_v20  ;;  %v1689_v3 = vadd.bf16 1065369472, %v2828_v4  ;;  %v4111_v11 = vmul.bf16 1056980736, %v1469_v42 }
 0x2ea   :  { %2841 = vtanh.bf16 %v4108_v38  ;;  %v2832_v50 = vpop.eup %2831  ;;  %v2082_v53 = vrot.slane %v2081_v30, 4  ;;  %v1787_v28 = vmul.bf16 %v1707_v33, %v4057_v34  ;;  %v1708_v8 = vadd.bf16 1065369472, %v2830_v5 }
 0x2eb   :  { %v2072_v10 = vadd.f32 %v2071_v16, %v2070_v40  ;;  %v2103_v58 = vadd.f32 %v2102_v22, %v1863_v61  ;;  %v1769_v60 = vmul.bf16 %v1689_v3, %v4063_v26  ;;  %v1690_v49 = vadd.bf16 1065369472, %v2832_v50 }
 0x2ec   :  { %v1296_v9 = vadd.f32 %v3856_v27, %v3771_v39  ;;  %v2834_v0 = vpop.eup %2833  ;;  %v2083_v7 = vadd.f32 %v2082_v53, %v2081_v30  ;;  %v1910_v45 = vunpack.c.l.bf16 %v1787_v28  ;;  %v1920_v54 = vunpack.c.h.bf16 %v1787_v28 }
 0x2ed   :  { %v2073_v57 = vrot.slane %v2072_v10, 1  ;;  %v1872_v32 = vunpack.c.l.bf16 %v1769_v60  ;;  %v1788_v52 = vmul.bf16 %v1708_v8, %v4065_v35  ;;  %v1770_v40 = vmul.bf16 %v1690_v49, %v4067_v41 }
 0x2ee   :  { %2843 = vtanh.bf16 %v4111_v11  ;;  %v2836_v34 = vpop.eup %2835  ;;  %v2084_v19 = vrot.slane %v2083_v7, 2  ;;  %v1882_v26 = vunpack.c.h.bf16 %v1769_v60  ;;  %v1717_v20 = vadd.bf16 1065369472, %v2834_v0 }
 0x2ef   :  { %v2074_v37 = vadd.f32 %v2073_v57, %v2072_v10  ;;  %v2091_v42 = vadd.f32 %v2090_v36, %v1872_v32  ;;  %v1911_v4 = vunpack.c.l.bf16 %v1788_v52  ;;  %v1921_v27 = vunpack.c.h.bf16 %v1788_v52 }
 0x2f0   :  { %v1873_v16 = vunpack.c.l.bf16 %v1770_v40  ;;  %v2838_v61 = vpop.eup %2837  ;;  %v2085_v30 = vadd.f32 %v2084_v19, %v2083_v7  ;;  %v2192_v33 = vadd.f32 %v1920_v54, %v1910_v45  ;;  %v1797_v5 = vmul.bf16 %v1717_v20, %v4079_v51 }
 0x2f1   :  { %v1699_v22 = vadd.bf16 1065369472, %v2836_v34  ;;  %v2840_v35 = vpop.eup %2839  ;;  %v2092_v3 = vadd.f32 %v2091_v42, %v1882_v26  ;;  %v1883_v41 = vunpack.c.h.bf16 %v1770_v40  ;;  %v1718_v53 = vadd.bf16 1065369472, %v2838_v61 }
 0x2f2   :  { %v2104_v50 = vadd.f32 %v2103_v58, %v1873_v16  ;;  %v2086_v28 = vrot.slane %v2085_v30, 1  ;;  %v2205_v10 = vadd.f32 %v1921_v27, %v1911_v4  ;;  %v1930_v8 = vunpack.c.l.bf16 %v1797_v5 }
 0x2f3   :  { %v1779_v60 = vmul.bf16 %v1699_v22, %v4081_v15  ;;  %v1798_v49 = vmul.bf16 %v1718_v53, %v4085_v24  ;;  %v1700_v0 = vadd.bf16 1065369472, %v2840_v35  ;;  %v1488_v57 = vpack.c.bf16 %v1296_v9, %v4106_v56 }
 0x2f4   :  { %v2105_v36 = vadd.f32 %v2104_v50, %v1883_v41  ;;  %v2087_v45 = vadd.f32 %v2086_v28, %v2085_v30  ;;  %v1940_v51 = vunpack.c.h.bf16 %v1797_v5  ;;  %v2193_v54 = vadd.f32 %v2192_v33, %v1930_v8 }
 0x2f5   :  { %v2842_v7 = vpop.eup %2841  ;;  %v1892_v32 = vunpack.c.l.bf16 %v1779_v60  ;;  %v1902_v52 = vunpack.c.h.bf16 %v1779_v60  ;;  %v1931_v40 = vunpack.c.l.bf16 %v1798_v49  ;;  %v1780_v58 = vmul.bf16 %v1700_v0, %v4093_v1  ;;  %v4307_v0 = vld [vmem:[#allocation16_spill] sm:$0xff] }
 0x2f6   :  { %v1727_v34 = vadd.bf16 1065369472, %v2842_v7  ;;  %v2282_v19 = vcombine.low %v2074_v37, %v2087_v45  ;;  %v2194_v26 = vadd.f32 %v2193_v54, %v1940_v51  ;;  %v1568_v15 = vmul.bf16 1056980736, %v1488_v57  ;;  %v4309_v51 = vld [vmem:[#allocation18_spill] sm:$0xff] }
 0x2f7   :  { %v2093_v20 = vadd.f32 %v2092_v3, %v1892_v32  ;;  %v1941_v42 = vunpack.c.h.bf16 %v1798_v49  ;;  %v2206_v4 = vadd.f32 %v2205_v10, %v1931_v40  ;;  %v1893_v24 = vunpack.c.l.bf16 %v1780_v58 }
 0x2f8   :  { %v1807_v27 = vmul.bf16 %v1727_v34, %v4108_v38  ;;  %v4306_v9 = vcombine.low %v3828_v17, %v3843_v6  ;;  %v4135_v1 = vrot.slane %v2282_v19, %v3276_v18  ;;  %2845 = vtanh.bf16 %v1568_v15 }
 0x2f9   :  { %v4126_v56 = vpop.eup %2843  ;;  %v2094_v37 = vadd.f32 %v2093_v20, %v1902_v52  ;;  %v4137_v61 = vadd.f32 %v2206_v4, %v1941_v42  ;;  %v1903_v30 = vunpack.c.h.bf16 %v1780_v58  ;;  %v2106_v33 = vadd.f32 %v2105_v36, %v1893_v24 }
 0x2fa   :  { %v4132_v16 = vrot.slane %v4306_v9, %v3276_v18  ;;  %v1950_v5 = vunpack.c.l.bf16 %v1807_v27  ;;  %v1385_v35 = vadd.f32 %v3846_v63, %v3942_v44  ;;  %v1389_v17 = vadd.f32 %v3860_v29, %v3942_v44 }
 0x2fb   :  { %v2095_v22 = vrot.slane %v2094_v37, 4  ;;  %v2107_v6 = vadd.f32 %v2106_v33, %v1903_v30  ;;  %v1960_v3 = vunpack.c.h.bf16 %v1807_v27  ;;  %v1300_v28 = vadd.f32 %v3876_v31, %v3755_v25  ;;  %v4308_v31 = vld [vmem:[#allocation17_spill] sm:$0xff] }
 0x2fc   :  { %v2297_v38 = vcombine.low %v4132_v16, %v4135_v1  ;;  %v2195_v41 = vadd.f32 %v2194_v26, %v1950_v5  ;;  %v1470_v53 = vpack.c.bf16 %v1389_v17, %v1385_v35  ;;  %v1393_v60 = vadd.f32 %v3878_v62, %v3919_v47  ;;  %v4310_v62 = vld [vmem:[#allocation38_spill] sm:$0xff] }
 0x2fd   :  { %v2096_v50 = vadd.f32 %v2095_v22, %v2094_v37  ;;  %v2108_v10 = vrot.slane %v2107_v6, 4  ;;  %v1302_v63 = vadd.f32 %v3885_v55, %v3771_v39  ;;  %v1395_v29 = vadd.f32 %v3887_v43, %v3942_v44  ;;  %v4311_v37 = vld [vmem:[#allocation19_spill] sm:$0xff]  ;;  %v1823_v1 = vld [vmem:[%s4230_s5 + $0x10] sm:$0xf] }
 0x2fe   :  { %v4147_v8 = vadd.f32 %v2195_v41, %v1960_v3  ;;  %v1550_v49 = vmul.bf16 1056980736, %v1470_v53  ;;  %v1304_v57 = vadd.f32 %v4307_v0, %v3755_v25  ;;  %v1397_v45 = vadd.f32 %v4308_v31, %v3919_v47 }
 0x2ff   :  { %v2097_v36 = vrot.slane %v2096_v50, 2  ;;  %v2109_v7 = vadd.f32 %v2108_v10, %v2107_v6  ;;  %v1306_v54 = vadd.f32 %v4309_v51, %v3771_v39  ;;  %v1399_v32 = vadd.f32 %v4310_v62, %v3942_v44 }
 0x300   :  { %v1709_v55 = vadd.bf16 1065369472, %v4126_v56  ;;  %2847 = vtanh.bf16 %v1550_v49  ;;  %v1497_v40 = vpack.c.bf16 %v1304_v57, %v1300_v28  ;;  %v1479_v43 = vpack.c.bf16 %v1397_v45, %v1393_v60 }
 0x301   :  { %v2098_v52 = vadd.f32 %v2097_v36, %v2096_v50  ;;  %v2110_v58 = vrot.slane %v2109_v7, 2  ;;  %v1498_v34 = vpack.c.bf16 %v1306_v54, %v1302_v63  ;;  %v1480_v19 = vpack.c.bf16 %v1399_v32, %v1395_v29 }
 0x302   :  { %v1577_v26 = vmul.bf16 1056980736, %v1497_v40  ;;  %v1403_v20 = vadd.f32 %v3921_v12, %v3919_v47  ;;  %v1407_v39 = vadd.f32 %v3932_v23, %v3919_v47  ;;  %v1559_v24 = vmul.bf16 1056980736, %v1479_v43  ;;  %v4312_v12 = vld [vmem:[#allocation39_spill] sm:$0xff] }
 0x303   :  { %v2099_v25 = vrot.slane %v2098_v52, 1  ;;  %v2846_v42 = vpop.eup %2845  ;;  %v2111_v4 = vadd.f32 %v2110_v58, %v2109_v7  ;;  %v1578_v27 = vmul.bf16 1056980736, %v1498_v34  ;;  %v1560_v9 = vmul.bf16 1056980736, %v1480_v19 }
 0x304   :  { %v1728_v56 = vadd.bf16 1065369472, %v2846_v42  ;;  %2849 = vtanh.bf16 %v1577_v26  ;;  %v1405_v30 = vadd.f32 %v4311_v37, %v3942_v44  ;;  %v1489_v33 = vpack.c.bf16 %v1407_v39, %v1403_v20 }
 0x305   :  { %v4170_v5 = vadd.f32 %v2099_v25, %v2098_v52  ;;  %v2112_v22 = vrot.slane %v2111_v4, 1  ;;  %2851 = vtanh.bf16 %v1559_v24  ;;  %v1409_v35 = vadd.f32 %v4312_v12, %v3942_v44 }
 0x306   :  { %v1808_v17 = vmul.bf16 %v1728_v56, %v1568_v15  ;;  %2853 = vtanh.bf16 %v1578_v27  ;;  %v1569_v23 = vmul.bf16 1056980736, %v1489_v33  ;;  %v1413_v6 = vadd.f32 %v3954_v13, %v3919_v47 }
 0x307   :  { %v4176_v3 = vadd.f32 %v2112_v22, %v2111_v4  ;;  %2855 = vtanh.bf16 %v1560_v9  ;;  %v1490_v41 = vpack.c.bf16 %v1409_v35, %v1405_v30  ;;  %v1417_v50 = vadd.f32 %v3967_v59, %v3919_v47 }
 0x308   :  { %v1951_v53 = vunpack.c.l.bf16 %v1808_v17  ;;  %2857 = vtanh.bf16 %v1569_v23  ;;  %v1415_v28 = vadd.f32 %v3958_v2, %v3942_v44  ;;  %v1419_v15 = vadd.f32 %v3974_v48, %v3942_v44 }
 0x309   :  { %v2298_v10 = vcombine.low %v4170_v5, %v4176_v3  ;;  %v1570_v60 = vmul.bf16 1056980736, %v1490_v41  ;;  %v1499_v13 = vpack.c.bf16 %v1417_v50, %v1413_v6  ;;  %v1961_v63 = vunpack.c.h.bf16 %v1808_v17 }
 0x30a   :  { %v2208_v36 = vadd.f32 %v4137_v61, %v1951_v53  ;;  %v1500_v29 = vpack.c.bf16 %v1419_v15, %v1415_v28  ;;  %v1789_v59 = vmul.bf16 %v1709_v55, %v4111_v11 }
 0x30b   :  { %v2848_v0 = vpop.eup %2847  ;;  %2859 = vtanh.bf16 %v1570_v60  ;;  %v1579_v47 = vmul.bf16 1056980736, %v1499_v13 }
 0x30c   :  { %v2209_v57 = vadd.f32 %v2208_v36, %v1961_v63  ;;  %v1710_v7 = vadd.bf16 1065369472, %v2848_v0  ;;  %v1580_v2 = vmul.bf16 1056980736, %v1500_v29  ;;  %v1912_v45 = vunpack.c.l.bf16 %v1789_v59 }
 0x30d   :  { %2861 = vtanh.bf16 %v1579_v47  ;;  %v1922_v51 = vunpack.c.h.bf16 %v1789_v59 }
 0x30e   :  { %v1790_v31 = vmul.bf16 %v1710_v7, %v1550_v49  ;;  %2863 = vtanh.bf16 %v1580_v2 }
 0x30f   :  { %v2850_v44 = vpop.eup %2849  ;;  %v2218_v19 = vadd.f32 %v1922_v51, %v1912_v45 }
 0x310   :  { %v2852_v48 = vpop.eup %2851  ;;  %v1737_v54 = vadd.bf16 1065369472, %v2850_v44  ;;  %v1913_v32 = vunpack.c.l.bf16 %v1790_v31  ;;  %v1923_v61 = vunpack.c.h.bf16 %v1790_v31 }
 0x311   :  { %v2854_v62 = vpop.eup %2853  ;;  %v1719_v52 = vadd.bf16 1065369472, %v2852_v48 }
 0x312   :  { %v2856_v40 = vpop.eup %2855  ;;  %v1817_v58 = vmul.bf16 %v1737_v54, %v1577_v26  ;;  %v1738_v43 = vadd.bf16 1065369472, %v2854_v62  ;;  %v2231_v39 = vadd.f32 %v1923_v61, %v1913_v32 }
 0x313   :  { %v2858_v34 = vpop.eup %2857  ;;  %v1799_v11 = vmul.bf16 %v1719_v52, %v1559_v24  ;;  %v1720_v55 = vadd.bf16 1065369472, %v2856_v40 }
 0x314   :  { %v1970_v25 = vunpack.c.l.bf16 %v1817_v58  ;;  %v1818_v20 = vmul.bf16 %v1738_v43, %v1578_v27  ;;  %v1729_v49 = vadd.bf16 1065369472, %v2858_v34  ;;  %v1980_v42 = vunpack.c.h.bf16 %v1817_v58 }
 0x315   :  { %v1932_v4 = vunpack.c.l.bf16 %v1799_v11  ;;  %v1800_v56 = vmul.bf16 %v1720_v55, %v1560_v9  ;;  %v1942_v33 = vunpack.c.h.bf16 %v1799_v11 }
 0x316   :  { %v2860_v37 = vpop.eup %2859  ;;  %v2197_v30 = vadd.f32 %v4147_v8, %v1970_v25  ;;  %v1971_v22 = vunpack.c.l.bf16 %v1818_v20  ;;  %v1809_v12 = vmul.bf16 %v1729_v49, %v1569_v23  ;;  %v1981_v26 = vunpack.c.h.bf16 %v1818_v20 }
 0x317   :  { %v2219_v35 = vadd.f32 %v2218_v19, %v1932_v4  ;;  %v1933_v17 = vunpack.c.l.bf16 %v1800_v56  ;;  %v1730_v6 = vadd.bf16 1065369472, %v2860_v37  ;;  %v1943_v53 = vunpack.c.h.bf16 %v1800_v56 }
 0x318   :  { %v2862_v24 = vpop.eup %2861  ;;  %v2198_v41 = vadd.f32 %v2197_v30, %v1980_v42  ;;  %v2210_v50 = vadd.f32 %v2209_v57, %v1971_v22  ;;  %v1952_v27 = vunpack.c.l.bf16 %v1809_v12  ;;  %v1962_v59 = vunpack.c.h.bf16 %v1809_v12 }
 0x319   :  { %v2864_v28 = vpop.eup %2863  ;;  %v2220_v15 = vadd.f32 %v2219_v35, %v1942_v33  ;;  %v2232_v13 = vadd.f32 %v2231_v39, %v1933_v17  ;;  %v1810_v63 = vmul.bf16 %v1730_v6, %v1570_v60  ;;  %v1739_v9 = vadd.bf16 1065369472, %v2862_v24 }
 0x31a   :  { %v2199_v36 = vrot.slane %v2198_v41, 4  ;;  %v2211_v29 = vadd.f32 %v2210_v50, %v1981_v26  ;;  %v1740_v8 = vadd.bf16 1065369472, %v2864_v28  ;;  %v2331_v12 = vrot.slane %v2323_v46, %v3276_v18 }
 0x31b   :  { %v2233_v0 = vadd.f32 %v2232_v13, %v1943_v53  ;;  %v2221_v23 = vadd.f32 %v2220_v15, %v1952_v27  ;;  %v1953_v7 = vunpack.c.l.bf16 %v1810_v63  ;;  %v1819_v48 = vmul.bf16 %v1739_v9, %v1579_v47 }
 0x31c   :  { %v2200_v31 = vadd.f32 %v2199_v36, %v2198_v41  ;;  %v2212_v44 = vrot.slane %v2211_v29, 4  ;;  %v1820_v45 = vmul.bf16 %v1740_v8, %v1580_v2  ;;  %v1963_v57 = vunpack.c.h.bf16 %v1810_v63 }
 0x31d   :  { %v2222_v51 = vadd.f32 %v2221_v23, %v1962_v59  ;;  %v2234_v54 = vadd.f32 %v2233_v0, %v1953_v7  ;;  %v1972_v61 = vunpack.c.l.bf16 %v1819_v48  ;;  %v1982_v43 = vunpack.c.h.bf16 %v1819_v48 }
 0x31e   :  { %v2201_v62 = vrot.slane %v2200_v31, 2  ;;  %v2213_v32 = vadd.f32 %v2212_v44, %v2211_v29  ;;  %v1973_v60 = vunpack.c.l.bf16 %v1820_v45  ;;  %v1983_v11 = vunpack.c.h.bf16 %v1820_v45 }
 0x31f   :  { %v2235_v52 = vadd.f32 %v2234_v54, %v1963_v57  ;;  %v2223_v34 = vadd.f32 %v2222_v51, %v1972_v61  ;;  %v2305_v63 = vrot.slane %v2298_v10, %v3276_v18 }
 0x320   :  { %v2202_v40 = vadd.f32 %v2201_v62, %v2200_v31  ;;  %v2214_v58 = vrot.slane %v2213_v32, 2 }
 0x321   :  { %v2236_v55 = vadd.f32 %v2235_v52, %v1973_v60  ;;  %v2224_v20 = vadd.f32 %v2223_v34, %v1982_v43 }
 0x322   :  { %v2203_v19 = vrot.slane %v2202_v40, 1  ;;  %v2215_v25 = vadd.f32 %v2214_v58, %v2213_v32 }
 0x323   :  { %v2237_v49 = vadd.f32 %v2236_v55, %v1983_v11  ;;  %v2225_v39 = vrot.slane %v2224_v20, 4 }
 0x324   :  { %v2204_v47 = vadd.f32 %v2203_v19, %v2202_v40  ;;  %v2216_v2 = vrot.slane %v2215_v25, 1 }
 0x325   :  { %v2238_v42 = vrot.slane %v2237_v49, 4  ;;  %v2226_v56 = vadd.f32 %v2225_v39, %v2224_v20 }
 0x326   :  { %v2217_v4 = vadd.f32 %v2216_v2, %v2215_v25 }
 0x327   :  { %v2239_v37 = vadd.f32 %v2238_v42, %v2237_v49  ;;  %v2227_v33 = vrot.slane %v2226_v56, 2 }
 0x328   :  { %v2324_v30 = vcombine.low %v2204_v47, %v2217_v4 }
 0x329   :  { %v2240_v22 = vrot.slane %v2239_v37, 2  ;;  %v2228_v26 = vadd.f32 %v2227_v33, %v2226_v56 }
 0x32a   :  { %v2338_v35 = vrot.slane %v2324_v30, %v3276_v18 }
 0x32b   :  { %v2241_v17 = vadd.f32 %v2240_v22, %v2239_v37  ;;  %v2229_v24 = vrot.slane %v2228_v26, 1 }
 0x32c   :  { %v2339_v6 = vcombine.low %v2331_v12, %v2338_v35 }
 0x32d   :  { %v2242_v41 = vrot.slane %v2241_v17, 1  ;;  %v2230_v53 = vadd.f32 %v2229_v24, %v2228_v26 }
 0x32e   :  { %v2363_v50 = vrot.slane %v2339_v6, 7 }
 0x32f   :  { %v2243_v27 = vadd.f32 %v2242_v41, %v2241_v17 }
 0x330   :  { %v2364_v28 = vsel %vm2353_vm1, %v2363_v50, %v2297_v38 }
 0x331   :  { %v2365_v15 = vsel %vm2355_vm2, %v2363_v50, %v2364_v28  ;;  %v2340_v13 = vcombine.low %v2230_v53, %v2243_v27 }
 0x332   :  { %v2366_v21 = vsel %vm2357_vm3, %v2363_v50, %v2365_v15 }
 0x333   :  { %v2367_v14 = vsel %vm2359_vm4, %v2363_v50, %v2366_v21  ;;  %v2347_v46 = vrot.slane %v2340_v13, %v3276_v18 }
 0x334   :  { %v2391_v36 = vmul.f32 0.015625, %v2367_v14 }
 0x335   :  { %v2370_v9 = vrot.slane %v2347_v46, 7 }
 0x336   :  { %2394 = vst [vmem:[%s4230_s5 + $0x8] sm:$0xff] %v2391_v36 }
 0x337   :  { %v2371_v16 = vsel %vm2353_vm1, %v2370_v9, %v2305_v63 }
 0x338   :  { %v2372_v38 = vsel %vm2355_vm2, %v2370_v9, %v2371_v16 }
 0x339   :  { %v2373_v29 = vsel %vm2357_vm3, %v2370_v9, %v2372_v38 }
 0x33a   :  { %v2374_v8 = vsel %vm2359_vm4, %v2370_v9, %v2373_v29 }
 0x33b   :  { %v2380_v5 = vadd.f32 %v2374_v8, %v1823_v1 }
 0x33d   :  { %2383 = vst [vmem:[%s4230_s5 + $0x10] sm:$0xf] %v2380_v5 }
 0x344   :  { %v2389_v18 = vld [vmem:[%s4230_s5 + $0x10] sm:$0xf] }
 0x345   :  { %v2392_v3 = vmul.f32 0.015625, %v2389_v18 }
 0x347   :  { %2395 = vst [vmem:[%s4230_s5 + $0x10] sm:$0xf] %v2392_v3 }
 0x348   :  { %2400 = vsyncpa [#allocation3], 1 }
 0x349   :  { %2401 = vsyncpa [#allocation5], 1 }
 0x34a   :  { %2402 = vsyncpa [#allocation8], 1 }

// kernel: forward.3
= control target key start
LH: loop header
LB: loop body
LE: loop exit
PB: predicated region body
PF: predicated region fallthrough
CT: control target
= control target key end

     0   :  { %vm4255_vm0 = vmmov 0   ;;  %vm3107_vm1 = vcmask 523264   ;;  %s5629_s1 = inlined_call_operand.vmem [shape: bf16[1280,512], index: 1, kind: input, shape index: {}]   ;;  %s5630_s0 = inlined_call_operand.vmem [shape: f32[8,1280], index: 0, kind: input, shape index: {}]   ;;  %s5631_s3 = inlined_call_operand.vmem [shape: bf16[512,256], index: 3, kind: input, shape index: {}]   ;;  %s5632_s2 = inlined_call_operand.vmem [shape: f32[1,512], index: 2, kind: input, shape index: {}]   ;;  %s5633_s5 = inlined_call_operand.vmem [shape: bf16[256,64], index: 5, kind: input, shape index: {}]   ;;  %s5634_s7 = inlined_call_operand.vmem [shape: bf16[64,128], index: 7, kind: input, shape index: {}]   ;;  %s5635_s4 = inlined_call_operand.vmem [shape: f32[1,256], index: 4, kind: input, shape index: {}]   ;;  %s5636_s6 = inlined_call_operand.vmem [shape: f32[1,64], index: 6, kind: input, shape index: {}]   ;;  %s5637_s8 = inlined_call_operand.vmem [shape: f32[1,128], index: 8, kind: input, shape index: {}]   ;;  %s5638_s9 = inlined_call_operand.vmem [shape: f32[8,128], index: 9, kind: output, shape index: {}]  }
   0x1   :  { %v3654_v0 = vld [vmem:[%s5629_s1 + $0x4] ss:$16 sps:$4 sm:$0xff]   ;;  %v3658_v2 = vld [vmem:[%s5629_s1] ss:$16 sps:$4 sm:$0xff]   ;;  %v34_v46 = vld [vmem:[%s5630_s0 + $0x8] sm:$0xff] }
   0x2   :  { %v3656_v1 = vld [vmem:[%s5629_s1 + $0x204] ss:$16 sps:$4 sm:$0xff]   ;;  %1995 = vmatprep.subr.bf16.mxu1 %v3654_v0  ;;  %v3659_v3 = vld [vmem:[%s5629_s1 + $0x200] ss:$16 sps:$4 sm:$0xff]   ;;  %v4450_v48 = vpack.c.bf16 %v34_v46, %v34_v46  ;;  %v36_v49 = vld [vmem:[%s5630_s0 + $0x18] sm:$0xff] }
   0x3   :  { %2036 = vmatprep.subr.bf16.mxu0 %v3656_v1  ;;  %v3660_v4 = vld [vmem:[%s5629_s1 + $0x24] ss:$16 sps:$4 sm:$0xff]   ;;  %1996 = vmatpush1.bf16.msra.mxu1 %v3658_v2  ;;  %v3664_v6 = vld [vmem:[%s5629_s1 + $0x20] ss:$16 sps:$4 sm:$0xff]   ;;  %v4461_v52 = vpack.c.bf16 %v36_v49, %v36_v49  ;;  %v3807_v49 = vld [vmem:[%s5629_s1 + $0x128] ss:$16 sps:$4 sm:$0xff]  }
   0x4   :  { %2037 = vmatpush1.bf16.msra.mxu0 %v3659_v3  ;;  %v3662_v5 = vld [vmem:[%s5629_s1 + $0x224] ss:$16 sps:$4 sm:$0xff]   ;;  %1997 = vmatprep.subr.bf16.mxu1 %v3660_v4  ;;  %v3665_v7 = vld [vmem:[%s5629_s1 + $0x220] ss:$16 sps:$4 sm:$0xff]  }
   0x5   :  { %2038 = vmatprep.subr.bf16.mxu0 %v3662_v5  ;;  %v3666_v8 = vld [vmem:[%s5629_s1 + $0x44] ss:$16 sps:$4 sm:$0xff]   ;;  %v3670_v10 = vld [vmem:[%s5629_s1 + $0x40] ss:$16 sps:$4 sm:$0xff]   ;;  %2027 = vmatprep.mubr.bf16.mxu1 %v4450_v48 }
   0x6   :  { %v3668_v9 = vld [vmem:[%s5629_s1 + $0x244] ss:$16 sps:$4 sm:$0xff]   ;;  %v3671_v11 = vld [vmem:[%s5629_s1 + $0x240] ss:$16 sps:$4 sm:$0xff]   ;;  %2068 = vmatprep.mubr.bf16.mxu0 %v4461_v52 }
   0x7   :  { %1998 = vmatpush1.bf16.msra.mxu1 %v3664_v6  ;;  %v3672_v12 = vld [vmem:[%s5629_s1 + $0x64] ss:$16 sps:$4 sm:$0xff]   ;;  %v3676_v14 = vld [vmem:[%s5629_s1 + $0x60] ss:$16 sps:$4 sm:$0xff]  }
   0x8   :  { %2039 = vmatpush1.bf16.msra.mxu0 %v3665_v7  ;;  %1999 = vmatprep.subr.bf16.mxu1 %v3666_v8  ;;  %v3674_v13 = vld [vmem:[%s5629_s1 + $0x264] ss:$16 sps:$4 sm:$0xff]   ;;  %v3677_v15 = vld [vmem:[%s5629_s1 + $0x260] ss:$16 sps:$4 sm:$0xff]   ;;  %v3755_v7 = vld [vmem:[%s5629_s1 + $0xc] ss:$16 sps:$4 sm:$0xff]  }
   0x9   :  { %2040 = vmatprep.subr.bf16.mxu0 %v3668_v9  ;;  %v3678_v16 = vld [vmem:[%s5629_s1 + $0x84] ss:$16 sps:$4 sm:$0xff]   ;;  %v3682_v18 = vld [vmem:[%s5629_s1 + $0x80] ss:$16 sps:$4 sm:$0xff]  }
   0xa   :  { %v3680_v17 = vld [vmem:[%s5629_s1 + $0x284] ss:$16 sps:$4 sm:$0xff]   ;;  %v3683_v19 = vld [vmem:[%s5629_s1 + $0x280] ss:$16 sps:$4 sm:$0xff]  }
   0xb   :  { %2000 = vmatpush1.bf16.msra.mxu1 %v3670_v10  ;;  %v3684_v20 = vld [vmem:[%s5629_s1 + $0xa4] ss:$16 sps:$4 sm:$0xff]   ;;  %v3688_v22 = vld [vmem:[%s5629_s1 + $0xa0] ss:$16 sps:$4 sm:$0xff]   ;;  %v3753_v10 = vld [vmem:[%s5629_s1 + $0x8] ss:$16 sps:$4 sm:$0xff]  }
   0xc   :  { %2041 = vmatpush1.bf16.msra.mxu0 %v3671_v11  ;;  %2001 = vmatprep.subr.bf16.mxu1 %v3672_v12  ;;  %v3686_v21 = vld [vmem:[%s5629_s1 + $0x2a4] ss:$16 sps:$4 sm:$0xff]   ;;  %v3689_v23 = vld [vmem:[%s5629_s1 + $0x2a0] ss:$16 sps:$4 sm:$0xff]  }
   0xd   :  { %2042 = vmatprep.subr.bf16.mxu0 %v3674_v13  ;;  %v3690_v24 = vld [vmem:[%s5629_s1 + $0xc4] ss:$16 sps:$4 sm:$0xff]   ;;  %v3694_v26 = vld [vmem:[%s5629_s1 + $0xc0] ss:$16 sps:$4 sm:$0xff]   ;;  %v3761_v13 = vld [vmem:[%s5629_s1 + $0x2c] ss:$16 sps:$4 sm:$0xff]  }
   0xe   :  { %v3692_v25 = vld [vmem:[%s5629_s1 + $0x2c4] ss:$16 sps:$4 sm:$0xff]   ;;  %v3695_v27 = vld [vmem:[%s5629_s1 + $0x2c0] ss:$16 sps:$4 sm:$0xff]  }
   0xf   :  { %2002 = vmatpush1.bf16.msra.mxu1 %v3676_v14  ;;  %v3696_v28 = vld [vmem:[%s5629_s1 + $0xe4] ss:$16 sps:$4 sm:$0xff]   ;;  %v3700_v30 = vld [vmem:[%s5629_s1 + $0xe0] ss:$16 sps:$4 sm:$0xff]  }
  0x10   :  { %2043 = vmatpush1.bf16.msra.mxu0 %v3677_v15  ;;  %2003 = vmatprep.subr.bf16.mxu1 %v3678_v16  ;;  %v3698_v29 = vld [vmem:[%s5629_s1 + $0x2e4] ss:$16 sps:$4 sm:$0xff]   ;;  %v3701_v31 = vld [vmem:[%s5629_s1 + $0x2e0] ss:$16 sps:$4 sm:$0xff]   ;;  %v3759_v15 = vld [vmem:[%s5629_s1 + $0x28] ss:$16 sps:$4 sm:$0xff]  }
  0x11   :  { %2044 = vmatprep.subr.bf16.mxu0 %v3680_v17  ;;  %v3702_v32 = vld [vmem:[%s5629_s1 + $0x104] ss:$16 sps:$4 sm:$0xff]   ;;  %v3706_v34 = vld [vmem:[%s5629_s1 + $0x100] ss:$16 sps:$4 sm:$0xff]   ;;  %v3767_v17 = vld [vmem:[%s5629_s1 + $0x4c] ss:$16 sps:$4 sm:$0xff]  }
  0x12   :  { %v3704_v33 = vld [vmem:[%s5629_s1 + $0x304] ss:$16 sps:$4 sm:$0xff]   ;;  %v3707_v35 = vld [vmem:[%s5629_s1 + $0x300] ss:$16 sps:$4 sm:$0xff]  }
  0x13   :  { %2004 = vmatpush1.bf16.msra.mxu1 %v3682_v18  ;;  %v3708_v36 = vld [vmem:[%s5629_s1 + $0x124] ss:$16 sps:$4 sm:$0xff]   ;;  %v3712_v38 = vld [vmem:[%s5629_s1 + $0x120] ss:$16 sps:$4 sm:$0xff]  }
  0x14   :  { %2045 = vmatpush1.bf16.msra.mxu0 %v3683_v19  ;;  %2005 = vmatprep.subr.bf16.mxu1 %v3684_v20  ;;  %v3710_v37 = vld [vmem:[%s5629_s1 + $0x324] ss:$16 sps:$4 sm:$0xff]   ;;  %v3713_v39 = vld [vmem:[%s5629_s1 + $0x320] ss:$16 sps:$4 sm:$0xff]   ;;  %v3765_v19 = vld [vmem:[%s5629_s1 + $0x48] ss:$16 sps:$4 sm:$0xff]  }
  0x15   :  { %2046 = vmatprep.subr.bf16.mxu0 %v3686_v21  ;;  %v3714_v40 = vld [vmem:[%s5629_s1 + $0x144] ss:$16 sps:$4 sm:$0xff]   ;;  %v3718_v42 = vld [vmem:[%s5629_s1 + $0x140] ss:$16 sps:$4 sm:$0xff]   ;;  %v3773_v21 = vld [vmem:[%s5629_s1 + $0x6c] ss:$16 sps:$4 sm:$0xff]  }
  0x16   :  { %v3716_v41 = vld [vmem:[%s5629_s1 + $0x344] ss:$16 sps:$4 sm:$0xff]   ;;  %v3719_v43 = vld [vmem:[%s5629_s1 + $0x340] ss:$16 sps:$4 sm:$0xff]  }
  0x17   :  { %2006 = vmatpush1.bf16.msra.mxu1 %v3688_v22  ;;  %v3720_v44 = vld [vmem:[%s5629_s1 + $0x164] ss:$16 sps:$4 sm:$0xff]   ;;  %v3724_v47 = vld [vmem:[%s5629_s1 + $0x160] ss:$16 sps:$4 sm:$0xff]  }
  0x18   :  { %2047 = vmatpush1.bf16.msra.mxu0 %v3689_v23  ;;  %2007 = vmatprep.subr.bf16.mxu1 %v3690_v24  ;;  %v3722_v45 = vld [vmem:[%s5629_s1 + $0x364] ss:$16 sps:$4 sm:$0xff]   ;;  %v3725_v50 = vld [vmem:[%s5629_s1 + $0x360] ss:$16 sps:$4 sm:$0xff]   ;;  %v3771_v23 = vld [vmem:[%s5629_s1 + $0x68] ss:$16 sps:$4 sm:$0xff]  }
  0x19   :  { %2048 = vmatprep.subr.bf16.mxu0 %v3692_v25  ;;  %v3726_v51 = vld [vmem:[%s5629_s1 + $0x184] ss:$16 sps:$4 sm:$0xff]   ;;  %v3730_v54 = vld [vmem:[%s5629_s1 + $0x180] ss:$16 sps:$4 sm:$0xff]   ;;  %v3779_v25 = vld [vmem:[%s5629_s1 + $0x8c] ss:$16 sps:$4 sm:$0xff]  }
  0x1a   :  { %v3728_v53 = vld [vmem:[%s5629_s1 + $0x384] ss:$16 sps:$4 sm:$0xff]   ;;  %v3731_v55 = vld [vmem:[%s5629_s1 + $0x380] ss:$16 sps:$4 sm:$0xff]  }
  0x1b   :  { %2008 = vmatpush1.bf16.msra.mxu1 %v3694_v26  ;;  %v3732_v56 = vld [vmem:[%s5629_s1 + $0x1a4] ss:$16 sps:$4 sm:$0xff]   ;;  %v3736_v58 = vld [vmem:[%s5629_s1 + $0x1a0] ss:$16 sps:$4 sm:$0xff]  }
  0x1c   :  { %2049 = vmatpush1.bf16.msra.mxu0 %v3695_v27  ;;  %2009 = vmatprep.subr.bf16.mxu1 %v3696_v28  ;;  %v3734_v57 = vld [vmem:[%s5629_s1 + $0x3a4] ss:$16 sps:$4 sm:$0xff]   ;;  %v3737_v59 = vld [vmem:[%s5629_s1 + $0x3a0] ss:$16 sps:$4 sm:$0xff]   ;;  %v3777_v27 = vld [vmem:[%s5629_s1 + $0x88] ss:$16 sps:$4 sm:$0xff]  }
  0x1d   :  { %2050 = vmatprep.subr.bf16.mxu0 %v3698_v29  ;;  %v3738_v60 = vld [vmem:[%s5629_s1 + $0x1c4] ss:$16 sps:$4 sm:$0xff]   ;;  %v3742_v62 = vld [vmem:[%s5629_s1 + $0x1c0] ss:$16 sps:$4 sm:$0xff]   ;;  %v3785_v29 = vld [vmem:[%s5629_s1 + $0xac] ss:$16 sps:$4 sm:$0xff]  }
  0x1e   :  { %v3740_v61 = vld [vmem:[%s5629_s1 + $0x3c4] ss:$16 sps:$4 sm:$0xff]   ;;  %v3743_v63 = vld [vmem:[%s5629_s1 + $0x3c0] ss:$16 sps:$4 sm:$0xff]  }
  0x1f   :  { %2010 = vmatpush1.bf16.msra.mxu1 %v3700_v30  ;;  %v3744_v0 = vld [vmem:[%s5629_s1 + $0x1e4] ss:$16 sps:$4 sm:$0xff]   ;;  %v3748_v2 = vld [vmem:[%s5629_s1 + $0x1e0] ss:$16 sps:$4 sm:$0xff]  }
  0x20   :  { %2051 = vmatpush1.bf16.msra.mxu0 %v3701_v31  ;;  %2011 = vmatprep.subr.bf16.mxu1 %v3702_v32  ;;  %v3746_v1 = vld [vmem:[%s5629_s1 + $0x3e4] ss:$16 sps:$4 sm:$0xff]   ;;  %v3749_v3 = vld [vmem:[%s5629_s1 + $0x3e0] ss:$16 sps:$4 sm:$0xff]   ;;  %v3783_v31 = vld [vmem:[%s5629_s1 + $0xa8] ss:$16 sps:$4 sm:$0xff]  }
  0x21   :  { %2052 = vmatprep.subr.bf16.mxu0 %v3704_v33  ;;  %v33_v4 = vld [vmem:[%s5630_s0] sm:$0xff]  ;;  %v35_v6 = vld [vmem:[%s5630_s0 + $0x10] sm:$0xff]  ;;  %v3791_v33 = vld [vmem:[%s5629_s1 + $0xcc] ss:$16 sps:$4 sm:$0xff]  }
  0x22   :  { %v3752_v5 = vld [vmem:[%s5629_s1 + $0x404] ss:$16 sps:$4 sm:$0xff]   ;;  %v4522_v8 = vpack.c.bf16 %v33_v4, %v33_v4  ;;  %v3750_v9 = vld [vmem:[%s5629_s1 + $0x400] ss:$16 sps:$4 sm:$0xff]   ;;  %v4530_v11 = vpack.c.bf16 %v35_v6, %v35_v6  ;;  %v3839_v4 = vld [vmem:[%s5629_s1 + $0x1cc] ss:$16 sps:$4 sm:$0xff]  }
  0x23   :  { %2012 = vmatpush1.bf16.msra.mxu1 %v3706_v34  ;;  %v3758_v12 = vld [vmem:[%s5629_s1 + $0x424] ss:$16 sps:$4 sm:$0xff]   ;;  %v3756_v14 = vld [vmem:[%s5629_s1 + $0x420] ss:$16 sps:$4 sm:$0xff]   ;;  %v38_v34 = vld [vmem:[%s5630_s0 + $0x28] sm:$0xff] }
  0x24   :  { %2053 = vmatpush1.bf16.msra.mxu0 %v3707_v35  ;;  %2013 = vmatprep.subr.bf16.mxu1 %v3708_v36  ;;  %v3764_v16 = vld [vmem:[%s5629_s1 + $0x444] ss:$16 sps:$4 sm:$0xff]   ;;  %v3762_v18 = vld [vmem:[%s5629_s1 + $0x440] ss:$16 sps:$4 sm:$0xff]   ;;  %v4607_v36 = vpack.c.bf16 %v38_v34, %v38_v34  ;;  %v3837_v6 = vld [vmem:[%s5629_s1 + $0x1c8] ss:$16 sps:$4 sm:$0xff]  }
  0x25   :  { %2054 = vmatprep.subr.bf16.mxu0 %v3710_v37  ;;  %v3770_v20 = vld [vmem:[%s5629_s1 + $0x464] ss:$16 sps:$4 sm:$0xff]   ;;  %v3768_v22 = vld [vmem:[%s5629_s1 + $0x460] ss:$16 sps:$4 sm:$0xff]   ;;  %v3789_v37 = vld [vmem:[%s5629_s1 + $0xc8] ss:$16 sps:$4 sm:$0xff]  }
  0x26   :  { %v3776_v24 = vld [vmem:[%s5629_s1 + $0x484] ss:$16 sps:$4 sm:$0xff]   ;;  %v3774_v26 = vld [vmem:[%s5629_s1 + $0x480] ss:$16 sps:$4 sm:$0xff]   ;;  %v3873_v34 = vld [vmem:[%s5629_s1 + $0x288] ss:$16 sps:$4 sm:$0xff]  }
  0x27   :  { %2014 = vmatpush1.bf16.msra.mxu1 %v3712_v38  ;;  %v3782_v28 = vld [vmem:[%s5629_s1 + $0x4a4] ss:$16 sps:$4 sm:$0xff]   ;;  %v3780_v30 = vld [vmem:[%s5629_s1 + $0x4a0] ss:$16 sps:$4 sm:$0xff]  }
  0x28   :  { %2055 = vmatpush1.bf16.msra.mxu0 %v3713_v39  ;;  %2015 = vmatprep.subr.bf16.mxu1 %v3714_v40  ;;  %v3788_v32 = vld [vmem:[%s5629_s1 + $0x4c4] ss:$16 sps:$4 sm:$0xff]   ;;  %v3786_v35 = vld [vmem:[%s5629_s1 + $0x4c0] ss:$16 sps:$4 sm:$0xff]   ;;  %v3797_v39 = vld [vmem:[%s5629_s1 + $0xec] ss:$16 sps:$4 sm:$0xff]  }
  0x29   :  { %2056 = vmatprep.subr.bf16.mxu0 %v3716_v41  ;;  %v3794_v38 = vld [vmem:[%s5629_s1 + $0x4e4] ss:$16 sps:$4 sm:$0xff]   ;;  %v3792_v40 = vld [vmem:[%s5629_s1 + $0x4e0] ss:$16 sps:$4 sm:$0xff]   ;;  %v3795_v41 = vld [vmem:[%s5629_s1 + $0xe8] ss:$16 sps:$4 sm:$0xff]  }
  0x2a   :  { %v3806_v46 = vld [vmem:[%s5629_s1 + $0x524] ss:$16 sps:$4 sm:$0xff]  }
  0x2b   :  { %2016 = vmatpush1.bf16.msra.mxu1 %v3718_v42  ;;  %v3800_v42 = vld [vmem:[%s5629_s1 + $0x504] ss:$16 sps:$4 sm:$0xff]  }
  0x2c   :  { %2057 = vmatpush1.bf16.msra.mxu0 %v3719_v43  ;;  %2017 = vmatprep.subr.bf16.mxu1 %v3720_v44  ;;  %v3803_v43 = vld [vmem:[%s5629_s1 + $0x10c] ss:$16 sps:$4 sm:$0xff]   ;;  %v3798_v44 = vld [vmem:[%s5629_s1 + $0x500] ss:$16 sps:$4 sm:$0xff]  }
  0x2d   :  { %2058 = vmatprep.subr.bf16.mxu0 %v3722_v45  ;;  %v3801_v45 = vld [vmem:[%s5629_s1 + $0x108] ss:$16 sps:$4 sm:$0xff]  }
  0x2f   :  { %2018 = vmatpush1.bf16.msra.mxu1 %v3724_v47  ;;  %v3809_v47 = vld [vmem:[%s5629_s1 + $0x12c] ss:$16 sps:$4 sm:$0xff]  }
  0x30   :  { %2059 = vmatpush1.bf16.msra.mxu0 %v3725_v50  ;;  %2019 = vmatprep.subr.bf16.mxu1 %v3726_v51  ;;  %v3812_v50 = vld [vmem:[%s5629_s1 + $0x544] ss:$16 sps:$4 sm:$0xff]   ;;  %v3815_v51 = vld [vmem:[%s5629_s1 + $0x14c] ss:$16 sps:$4 sm:$0xff]  }
  0x31   :  { %2060 = vmatprep.subr.bf16.mxu0 %v3728_v53  ;;  %v3810_v53 = vld [vmem:[%s5629_s1 + $0x540] ss:$16 sps:$4 sm:$0xff]  }
  0x33   :  { %2020 = vmatpush1.bf16.msra.mxu1 %v3730_v54  ;;  %v3813_v54 = vld [vmem:[%s5629_s1 + $0x148] ss:$16 sps:$4 sm:$0xff]  }
  0x34   :  { %2061 = vmatpush1.bf16.msra.mxu0 %v3731_v55  ;;  %2021 = vmatprep.subr.bf16.mxu1 %v3732_v56  ;;  %v3818_v55 = vld [vmem:[%s5629_s1 + $0x564] ss:$16 sps:$4 sm:$0xff]   ;;  %v3821_v56 = vld [vmem:[%s5629_s1 + $0x16c] ss:$16 sps:$4 sm:$0xff]  }
  0x35   :  { %2062 = vmatprep.subr.bf16.mxu0 %v3734_v57  ;;  %v3816_v57 = vld [vmem:[%s5629_s1 + $0x560] ss:$16 sps:$4 sm:$0xff]  }
  0x37   :  { %2022 = vmatpush1.bf16.msra.mxu1 %v3736_v58  ;;  %v3819_v58 = vld [vmem:[%s5629_s1 + $0x168] ss:$16 sps:$4 sm:$0xff]  }
  0x38   :  { %2063 = vmatpush1.bf16.msra.mxu0 %v3737_v59  ;;  %2023 = vmatprep.subr.bf16.mxu1 %v3738_v60  ;;  %v3824_v59 = vld [vmem:[%s5629_s1 + $0x584] ss:$16 sps:$4 sm:$0xff]   ;;  %v3827_v60 = vld [vmem:[%s5629_s1 + $0x18c] ss:$16 sps:$4 sm:$0xff]  }
  0x39   :  { %2064 = vmatprep.subr.bf16.mxu0 %v3740_v61  ;;  %v3822_v61 = vld [vmem:[%s5629_s1 + $0x580] ss:$16 sps:$4 sm:$0xff]  }
  0x3b   :  { %2024 = vmatpush1.bf16.msra.mxu1 %v3742_v62  ;;  %v3825_v62 = vld [vmem:[%s5629_s1 + $0x188] ss:$16 sps:$4 sm:$0xff]  }
  0x3c   :  { %2065 = vmatpush1.bf16.msra.mxu0 %v3743_v63  ;;  %2025 = vmatprep.subr.bf16.mxu1 %v3744_v0  ;;  %v3830_v63 = vld [vmem:[%s5629_s1 + $0x5a4] ss:$16 sps:$4 sm:$0xff]   ;;  %v3833_v0 = vld [vmem:[%s5629_s1 + $0x1ac] ss:$16 sps:$4 sm:$0xff]  }
  0x3d   :  { %2066 = vmatprep.subr.bf16.mxu0 %v3746_v1  ;;  %v3828_v1 = vld [vmem:[%s5629_s1 + $0x5a0] ss:$16 sps:$4 sm:$0xff]  }
  0x3f   :  { %2026 = vmatpush1.bf16.msra.mxu1 %v3748_v2  ;;  %v3831_v2 = vld [vmem:[%s5629_s1 + $0x1a8] ss:$16 sps:$4 sm:$0xff]  }
  0x40   :  { %2067 = vmatpush1.bf16.msra.mxu0 %v3749_v3  ;;  %2200 = vmatprep.subr.bf16.mxu1 %v3755_v7  ;;  %v3836_v3 = vld [vmem:[%s5629_s1 + $0x5c4] ss:$16 sps:$4 sm:$0xff]  }
  0x41   :  { %2077 = vmatprep.subr.bf16.mxu0 %v3752_v5  ;;  %v3834_v5 = vld [vmem:[%s5629_s1 + $0x5c0] ss:$16 sps:$4 sm:$0xff]   ;;  %v3842_v7 = vld [vmem:[%s5629_s1 + $0x5e4] ss:$16 sps:$4 sm:$0xff]  }
  0x42   :  { %2028 = vmatmul.mubr.bf16.vlgmr.msra.gmra.mrb[0].mxu1 %v4522_v8 }
  0x43   :  { %2069 = vmatmul.mubr.bf16.vlgmr.msra.gmra.mrb[0].mxu0 %v4530_v11  ;;  %2201 = vmatpush1.bf16.msra.mxu1 %v3753_v10  ;;  %v3840_v10 = vld [vmem:[%s5629_s1 + $0x5e0] ss:$16 sps:$4 sm:$0xff]  }
  0x44   :  { %2078 = vmatpush1.bf16.msra.mxu0 %v3750_v9  ;;  %2202 = vmatprep.subr.bf16.mxu1 %v3761_v13  ;;  %v3845_v9 = vld [vmem:[%s5629_s1 + $0x1ec] ss:$16 sps:$4 sm:$0xff]   ;;  %v37_v13 = vld [vmem:[%s5630_s0 + $0x20] sm:$0xff] }
  0x45   :  { %2079 = vmatprep.subr.bf16.mxu0 %v3758_v12  ;;  %2232 = vmatprep.mubr.bf16.mxu1 %v4450_v48  ;;  %v3804_v48 = vld [vmem:[%s5629_s1 + $0x520] ss:$16 sps:$4 sm:$0xff]   ;;  %v3843_v12 = vld [vmem:[%s5629_s1 + $0x1e8] ss:$16 sps:$4 sm:$0xff]  }
  0x46   :  { %2109 = vmatprep.mubr.bf16.mxu0 %v4607_v36 }
  0x47   :  { %2203 = vmatpush1.bf16.msra.mxu1 %v3759_v15  ;;  %v3851_v15 = vld [vmem:[%s5629_s1 + $0x20c] ss:$16 sps:$4 sm:$0xff]  }
  0x48   :  { %2080 = vmatpush1.bf16.msra.mxu0 %v3756_v14  ;;  %2204 = vmatprep.subr.bf16.mxu1 %v3767_v17  ;;  %v3848_v14 = vld [vmem:[%s5629_s1 + $0x604] ss:$16 sps:$4 sm:$0xff]   ;;  %v3846_v17 = vld [vmem:[%s5629_s1 + $0x600] ss:$16 sps:$4 sm:$0xff]  }
  0x49   :  { %2081 = vmatprep.subr.bf16.mxu0 %v3764_v16  ;;  %v4730_v16 = vpack.c.bf16 %v37_v13, %v37_v13  ;;  %v3930_v13 = vld [vmem:[%s5629_s1 + $0x7c0] ss:$16 sps:$4 sm:$0xff]  }
  0x4b   :  { %2205 = vmatpush1.bf16.msra.mxu1 %v3765_v19  ;;  %v3854_v19 = vld [vmem:[%s5629_s1 + $0x624] ss:$16 sps:$4 sm:$0xff]  }
  0x4c   :  { %2082 = vmatpush1.bf16.msra.mxu0 %v3762_v18  ;;  %2206 = vmatprep.subr.bf16.mxu1 %v3773_v21  ;;  %v3849_v18 = vld [vmem:[%s5629_s1 + $0x208] ss:$16 sps:$4 sm:$0xff]  }
  0x4d   :  { %2083 = vmatprep.subr.bf16.mxu0 %v3770_v20  ;;  %v3857_v20 = vld [vmem:[%s5629_s1 + $0x22c] ss:$16 sps:$4 sm:$0xff]  }
  0x4e   :  { %v40_v21 = vld [vmem:[%s5630_s0 + $0x38] sm:$0xff] }
  0x4f   :  { %2207 = vmatpush1.bf16.msra.mxu1 %v3771_v23  ;;  %v4752_v23 = vpack.c.bf16 %v40_v21, %v40_v21  ;;  %v39_v21 = vld [vmem:[%s5630_s0 + $0x30] sm:$0xff] }
  0x50   :  { %2084 = vmatpush1.bf16.msra.mxu0 %v3768_v22  ;;  %2208 = vmatprep.subr.bf16.mxu1 %v3779_v25  ;;  %v3852_v22 = vld [vmem:[%s5629_s1 + $0x620] ss:$16 sps:$4 sm:$0xff]   ;;  %v3860_v25 = vld [vmem:[%s5629_s1 + $0x644] ss:$16 sps:$4 sm:$0xff]  }
  0x51   :  { %2085 = vmatprep.subr.bf16.mxu0 %v3776_v24  ;;  %v3855_v24 = vld [vmem:[%s5629_s1 + $0x228] ss:$16 sps:$4 sm:$0xff]  }
  0x53   :  { %2209 = vmatpush1.bf16.msra.mxu1 %v3777_v27  ;;  %v3861_v27 = vld [vmem:[%s5629_s1 + $0x248] ss:$16 sps:$4 sm:$0xff]  }
  0x54   :  { %2086 = vmatpush1.bf16.msra.mxu0 %v3774_v26  ;;  %2210 = vmatprep.subr.bf16.mxu1 %v3785_v29  ;;  %v3858_v26 = vld [vmem:[%s5629_s1 + $0x640] ss:$16 sps:$4 sm:$0xff]  }
  0x55   :  { %2087 = vmatprep.subr.bf16.mxu0 %v3782_v28  ;;  %v3866_v28 = vld [vmem:[%s5629_s1 + $0x664] ss:$16 sps:$4 sm:$0xff]   ;;  %v3864_v29 = vld [vmem:[%s5629_s1 + $0x660] ss:$16 sps:$4 sm:$0xff]  }
  0x57   :  { %2211 = vmatpush1.bf16.msra.mxu1 %v3783_v31  ;;  %v3872_v31 = vld [vmem:[%s5629_s1 + $0x684] ss:$16 sps:$4 sm:$0xff]  }
  0x58   :  { %2088 = vmatpush1.bf16.msra.mxu0 %v3780_v30  ;;  %2212 = vmatprep.subr.bf16.mxu1 %v3791_v33  ;;  %v3867_v30 = vld [vmem:[%s5629_s1 + $0x268] ss:$16 sps:$4 sm:$0xff]   ;;  %v3870_v33 = vld [vmem:[%s5629_s1 + $0x680] ss:$16 sps:$4 sm:$0xff]  }
  0x59   :  { %2089 = vmatprep.subr.bf16.mxu0 %v3788_v32  ;;  %v3875_v32 = vld [vmem:[%s5629_s1 + $0x28c] ss:$16 sps:$4 sm:$0xff]  }
  0x5b   :  { %2213 = vmatpush1.bf16.msra.mxu1 %v3789_v37  ;;  %v3881_v37 = vld [vmem:[%s5629_s1 + $0x2ac] ss:$16 sps:$4 sm:$0xff]  }
  0x5c   :  { %2090 = vmatpush1.bf16.msra.mxu0 %v3786_v35  ;;  %2214 = vmatprep.subr.bf16.mxu1 %v3797_v39  ;;  %v3878_v35 = vld [vmem:[%s5629_s1 + $0x6a4] ss:$16 sps:$4 sm:$0xff]   ;;  %v3879_v39 = vld [vmem:[%s5629_s1 + $0x2a8] ss:$16 sps:$4 sm:$0xff]  }
  0x5d   :  { %2091 = vmatprep.subr.bf16.mxu0 %v3794_v38  ;;  %v3876_v38 = vld [vmem:[%s5629_s1 + $0x6a0] ss:$16 sps:$4 sm:$0xff]  }
  0x5f   :  { %2215 = vmatpush1.bf16.msra.mxu1 %v3795_v41  ;;  %v3887_v41 = vld [vmem:[%s5629_s1 + $0x2cc] ss:$16 sps:$4 sm:$0xff]  }
  0x60   :  { %2092 = vmatpush1.bf16.msra.mxu0 %v3792_v40  ;;  %2216 = vmatprep.subr.bf16.mxu1 %v3803_v43  ;;  %v3884_v40 = vld [vmem:[%s5629_s1 + $0x6c4] ss:$16 sps:$4 sm:$0xff]   ;;  %v3885_v43 = vld [vmem:[%s5629_s1 + $0x2c8] ss:$16 sps:$4 sm:$0xff]  }
  0x61   :  { %2093 = vmatprep.subr.bf16.mxu0 %v3800_v42  ;;  %v3882_v42 = vld [vmem:[%s5629_s1 + $0x6c0] ss:$16 sps:$4 sm:$0xff]  }
  0x63   :  { %2217 = vmatpush1.bf16.msra.mxu1 %v3801_v45  ;;  %v3893_v45 = vld [vmem:[%s5629_s1 + $0x2ec] ss:$16 sps:$4 sm:$0xff]  }
  0x64   :  { %2094 = vmatpush1.bf16.msra.mxu0 %v3798_v44  ;;  %2218 = vmatprep.subr.bf16.mxu1 %v3809_v47  ;;  %v3890_v44 = vld [vmem:[%s5629_s1 + $0x6e4] ss:$16 sps:$4 sm:$0xff]   ;;  %v3891_v47 = vld [vmem:[%s5629_s1 + $0x2e8] ss:$16 sps:$4 sm:$0xff]  }
  0x65   :  { %2095 = vmatprep.subr.bf16.mxu0 %v3806_v46  ;;  %v3888_v46 = vld [vmem:[%s5629_s1 + $0x6e0] ss:$16 sps:$4 sm:$0xff]  }
  0x67   :  { %2219 = vmatpush1.bf16.msra.mxu1 %v3807_v49  ;;  %v3899_v49 = vld [vmem:[%s5629_s1 + $0x30c] ss:$16 sps:$4 sm:$0xff]  }
  0x68   :  { %2096 = vmatpush1.bf16.msra.mxu0 %v3804_v48  ;;  %2220 = vmatprep.subr.bf16.mxu1 %v3815_v51  ;;  %v3896_v48 = vld [vmem:[%s5629_s1 + $0x704] ss:$16 sps:$4 sm:$0xff]   ;;  %v3897_v51 = vld [vmem:[%s5629_s1 + $0x308] ss:$16 sps:$4 sm:$0xff]  }
  0x69   :  { %2097 = vmatprep.subr.bf16.mxu0 %v3812_v50  ;;  %v3894_v50 = vld [vmem:[%s5629_s1 + $0x700] ss:$16 sps:$4 sm:$0xff]  }
  0x6b   :  { %2221 = vmatpush1.bf16.msra.mxu1 %v3813_v54  ;;  %v3905_v54 = vld [vmem:[%s5629_s1 + $0x32c] ss:$16 sps:$4 sm:$0xff]  }
  0x6c   :  { %2098 = vmatpush1.bf16.msra.mxu0 %v3810_v53  ;;  %2222 = vmatprep.subr.bf16.mxu1 %v3821_v56  ;;  %v3902_v53 = vld [vmem:[%s5629_s1 + $0x724] ss:$16 sps:$4 sm:$0xff]   ;;  %v3903_v56 = vld [vmem:[%s5629_s1 + $0x328] ss:$16 sps:$4 sm:$0xff]  }
  0x6d   :  { %2099 = vmatprep.subr.bf16.mxu0 %v3818_v55  ;;  %v3900_v55 = vld [vmem:[%s5629_s1 + $0x720] ss:$16 sps:$4 sm:$0xff]  }
  0x6f   :  { %2223 = vmatpush1.bf16.msra.mxu1 %v3819_v58  ;;  %v3911_v58 = vld [vmem:[%s5629_s1 + $0x34c] ss:$16 sps:$4 sm:$0xff]  }
  0x70   :  { %2100 = vmatpush1.bf16.msra.mxu0 %v3816_v57  ;;  %2224 = vmatprep.subr.bf16.mxu1 %v3827_v60  ;;  %v3908_v57 = vld [vmem:[%s5629_s1 + $0x744] ss:$16 sps:$4 sm:$0xff]   ;;  %v3909_v60 = vld [vmem:[%s5629_s1 + $0x348] ss:$16 sps:$4 sm:$0xff]  }
  0x71   :  { %2101 = vmatprep.subr.bf16.mxu0 %v3824_v59  ;;  %v3906_v59 = vld [vmem:[%s5629_s1 + $0x740] ss:$16 sps:$4 sm:$0xff]  }
  0x73   :  { %2225 = vmatpush1.bf16.msra.mxu1 %v3825_v62  ;;  %v3917_v62 = vld [vmem:[%s5629_s1 + $0x36c] ss:$16 sps:$4 sm:$0xff]  }
  0x74   :  { %2102 = vmatpush1.bf16.msra.mxu0 %v3822_v61  ;;  %2226 = vmatprep.subr.bf16.mxu1 %v3833_v0  ;;  %v3914_v61 = vld [vmem:[%s5629_s1 + $0x764] ss:$16 sps:$4 sm:$0xff]   ;;  %v3915_v0 = vld [vmem:[%s5629_s1 + $0x368] ss:$16 sps:$4 sm:$0xff]  }
  0x75   :  { %2103 = vmatprep.subr.bf16.mxu0 %v3830_v63  ;;  %v3912_v63 = vld [vmem:[%s5629_s1 + $0x760] ss:$16 sps:$4 sm:$0xff]  }
  0x77   :  { %2227 = vmatpush1.bf16.msra.mxu1 %v3831_v2  ;;  %v3923_v2 = vld [vmem:[%s5629_s1 + $0x38c] ss:$16 sps:$4 sm:$0xff]  }
  0x78   :  { %2104 = vmatpush1.bf16.msra.mxu0 %v3828_v1  ;;  %2228 = vmatprep.subr.bf16.mxu1 %v3839_v4  ;;  %v3920_v1 = vld [vmem:[%s5629_s1 + $0x784] ss:$16 sps:$4 sm:$0xff]   ;;  %v3921_v4 = vld [vmem:[%s5629_s1 + $0x388] ss:$16 sps:$4 sm:$0xff]  }
  0x79   :  { %2105 = vmatprep.subr.bf16.mxu0 %v3836_v3  ;;  %v3918_v3 = vld [vmem:[%s5629_s1 + $0x780] ss:$16 sps:$4 sm:$0xff]  }
  0x7b   :  { %2229 = vmatpush1.bf16.msra.mxu1 %v3837_v6  ;;  %v3929_v6 = vld [vmem:[%s5629_s1 + $0x3ac] ss:$16 sps:$4 sm:$0xff]  }
  0x7c   :  { %2106 = vmatpush1.bf16.msra.mxu0 %v3834_v5  ;;  %2230 = vmatprep.subr.bf16.mxu1 %v3845_v9  ;;  %v3926_v5 = vld [vmem:[%s5629_s1 + $0x7a4] ss:$16 sps:$4 sm:$0xff]   ;;  %v3927_v9 = vld [vmem:[%s5629_s1 + $0x3a8] ss:$16 sps:$4 sm:$0xff]  }
  0x7d   :  { %2107 = vmatprep.subr.bf16.mxu0 %v3842_v7  ;;  %v3924_v7 = vld [vmem:[%s5629_s1 + $0x7a0] ss:$16 sps:$4 sm:$0xff]  }
  0x7f   :  { %2231 = vmatpush1.bf16.msra.mxu1 %v3843_v12  ;;  %v3935_v12 = vld [vmem:[%s5629_s1 + $0x3cc] ss:$16 sps:$4 sm:$0xff]  }
  0x80   :  { %2108 = vmatpush1.bf16.msra.mxu0 %v3840_v10  ;;  %2241 = vmatprep.subr.bf16.mxu1 %v3851_v15  ;;  %v3932_v10 = vld [vmem:[%s5629_s1 + $0x7c4] ss:$16 sps:$4 sm:$0xff]  }
  0x81   :  { %2118 = vmatprep.subr.bf16.mxu0 %v3848_v14  ;;  %v3933_v14 = vld [vmem:[%s5629_s1 + $0x3c8] ss:$16 sps:$4 sm:$0xff]   ;;  %v3938_v15 = vld [vmem:[%s5629_s1 + $0x7e4] ss:$16 sps:$4 sm:$0xff]  }
  0x82   :  { %2233 = vmatmul.mubr.bf16.vlgmr.msra.gmra.mrb[4].mxu1 %v4522_v8  ;;  %v3863_v8 = vld [vmem:[%s5629_s1 + $0x24c] ss:$16 sps:$4 sm:$0xff]  }
  0x83   :  { %2110 = vmatmul.mubr.bf16.vlgmr.msra.gmra.mrb[0].mxu0 %v4730_v16  ;;  %2242 = vmatpush1.bf16.msra.mxu1 %v3849_v18  ;;  %v3936_v18 = vld [vmem:[%s5629_s1 + $0x7e0] ss:$16 sps:$4 sm:$0xff]  }
  0x84   :  { %2119 = vmatpush1.bf16.msra.mxu0 %v3846_v17  ;;  %2243 = vmatprep.subr.bf16.mxu1 %v3857_v20  ;;  %v3941_v17 = vld [vmem:[%s5629_s1 + $0x3ec] ss:$16 sps:$4 sm:$0xff]   ;;  %v3944_v20 = vld [vmem:[%s5629_s1 + $0x804] ss:$16 sps:$4 sm:$0xff]  }
  0x85   :  { %2120 = vmatprep.subr.bf16.mxu0 %v3854_v19  ;;  %2150 = vmatprep.mubr.bf16.mxu0 %v4752_v23  ;;  %v3939_v19 = vld [vmem:[%s5629_s1 + $0x3e8] ss:$16 sps:$4 sm:$0xff]  }
  0x86   :  { %2273 = vmatprep.mubr.bf16.mxu1 %v4461_v52  ;;  %v3869_v52 = vld [vmem:[%s5629_s1 + $0x26c] ss:$16 sps:$4 sm:$0xff]  }
  0x87   :  { %2244 = vmatpush1.bf16.msra.mxu1 %v3855_v24  ;;  %v3942_v24 = vld [vmem:[%s5629_s1 + $0x800] ss:$16 sps:$4 sm:$0xff]  }
  0x88   :  { %2121 = vmatpush1.bf16.msra.mxu0 %v3852_v22  ;;  %2245 = vmatprep.subr.bf16.mxu1 %v3863_v8  ;;  %v3947_v22 = vld [vmem:[%s5629_s1 + $0x40c] ss:$16 sps:$4 sm:$0xff]  }
  0x89   :  { %2122 = vmatprep.subr.bf16.mxu0 %v3860_v25  ;;  %v4939_v25 = vpack.c.bf16 %v39_v21, %v39_v21  ;;  %v42_v8 = vld [vmem:[%s5630_s0 + $0x48] sm:$0xff] }
  0x8a   :  { %v4029_v21 = vld [vmem:[%s5629_s1 + $0x5c8] ss:$16 sps:$4 sm:$0xff]  }
  0x8b   :  { %2246 = vmatpush1.bf16.msra.mxu1 %v3861_v27  ;;  %v3950_v27 = vld [vmem:[%s5629_s1 + $0x824] ss:$16 sps:$4 sm:$0xff]  }
  0x8c   :  { %2123 = vmatpush1.bf16.msra.mxu0 %v3858_v26  ;;  %2247 = vmatprep.subr.bf16.mxu1 %v3869_v52  ;;  %v3945_v26 = vld [vmem:[%s5629_s1 + $0x408] ss:$16 sps:$4 sm:$0xff]   ;;  %v4953_v52 = vpack.c.bf16 %v42_v8, %v42_v8  ;;  %v4032_v8 = vld [vmem:[%s5629_s1 + $0x9e0] ss:$16 sps:$4 sm:$0xff]  }
  0x8d   :  { %2124 = vmatprep.subr.bf16.mxu0 %v3866_v28  ;;  %v3953_v28 = vld [vmem:[%s5629_s1 + $0x42c] ss:$16 sps:$4 sm:$0xff]  }
  0x8f   :  { %2248 = vmatpush1.bf16.msra.mxu1 %v3867_v30  ;;  %v3951_v30 = vld [vmem:[%s5629_s1 + $0x428] ss:$16 sps:$4 sm:$0xff]  }
  0x90   :  { %2125 = vmatpush1.bf16.msra.mxu0 %v3864_v29  ;;  %2249 = vmatprep.subr.bf16.mxu1 %v3875_v32  ;;  %v3948_v29 = vld [vmem:[%s5629_s1 + $0x820] ss:$16 sps:$4 sm:$0xff]  }
  0x91   :  { %2126 = vmatprep.subr.bf16.mxu0 %v3872_v31  ;;  %v3956_v31 = vld [vmem:[%s5629_s1 + $0x844] ss:$16 sps:$4 sm:$0xff]   ;;  %v3954_v32 = vld [vmem:[%s5629_s1 + $0x840] ss:$16 sps:$4 sm:$0xff]  }
  0x93   :  { %2250 = vmatpush1.bf16.msra.mxu1 %v3873_v34  ;;  %v3962_v34 = vld [vmem:[%s5629_s1 + $0x864] ss:$16 sps:$4 sm:$0xff]  }
  0x94   :  { %2127 = vmatpush1.bf16.msra.mxu0 %v3870_v33  ;;  %2251 = vmatprep.subr.bf16.mxu1 %v3881_v37  ;;  %v3957_v33 = vld [vmem:[%s5629_s1 + $0x448] ss:$16 sps:$4 sm:$0xff]   ;;  %v3960_v37 = vld [vmem:[%s5629_s1 + $0x860] ss:$16 sps:$4 sm:$0xff]  }
  0x95   :  { %2128 = vmatprep.subr.bf16.mxu0 %v3878_v35  ;;  %v3965_v35 = vld [vmem:[%s5629_s1 + $0x46c] ss:$16 sps:$4 sm:$0xff]  }
  0x97   :  { %2252 = vmatpush1.bf16.msra.mxu1 %v3879_v39  ;;  %v3971_v39 = vld [vmem:[%s5629_s1 + $0x48c] ss:$16 sps:$4 sm:$0xff]  }
  0x98   :  { %2129 = vmatpush1.bf16.msra.mxu0 %v3876_v38  ;;  %2253 = vmatprep.subr.bf16.mxu1 %v3887_v41  ;;  %v3968_v38 = vld [vmem:[%s5629_s1 + $0x884] ss:$16 sps:$4 sm:$0xff]   ;;  %v3969_v41 = vld [vmem:[%s5629_s1 + $0x488] ss:$16 sps:$4 sm:$0xff]  }
  0x99   :  { %2130 = vmatprep.subr.bf16.mxu0 %v3884_v40  ;;  %v3966_v40 = vld [vmem:[%s5629_s1 + $0x880] ss:$16 sps:$4 sm:$0xff]  }
  0x9b   :  { %2254 = vmatpush1.bf16.msra.mxu1 %v3885_v43  ;;  %v3977_v43 = vld [vmem:[%s5629_s1 + $0x4ac] ss:$16 sps:$4 sm:$0xff]  }
  0x9c   :  { %2131 = vmatpush1.bf16.msra.mxu0 %v3882_v42  ;;  %2255 = vmatprep.subr.bf16.mxu1 %v3893_v45  ;;  %v3974_v42 = vld [vmem:[%s5629_s1 + $0x8a4] ss:$16 sps:$4 sm:$0xff]   ;;  %v3975_v45 = vld [vmem:[%s5629_s1 + $0x4a8] ss:$16 sps:$4 sm:$0xff]  }
  0x9d   :  { %2132 = vmatprep.subr.bf16.mxu0 %v3890_v44  ;;  %v3972_v44 = vld [vmem:[%s5629_s1 + $0x8a0] ss:$16 sps:$4 sm:$0xff]  }
  0x9f   :  { %2256 = vmatpush1.bf16.msra.mxu1 %v3891_v47  ;;  %v3983_v47 = vld [vmem:[%s5629_s1 + $0x4cc] ss:$16 sps:$4 sm:$0xff]  }
  0xa0   :  { %2133 = vmatpush1.bf16.msra.mxu0 %v3888_v46  ;;  %2257 = vmatprep.subr.bf16.mxu1 %v3899_v49  ;;  %v3980_v46 = vld [vmem:[%s5629_s1 + $0x8c4] ss:$16 sps:$4 sm:$0xff]   ;;  %v3981_v49 = vld [vmem:[%s5629_s1 + $0x4c8] ss:$16 sps:$4 sm:$0xff]  }
  0xa1   :  { %2134 = vmatprep.subr.bf16.mxu0 %v3896_v48  ;;  %v3978_v48 = vld [vmem:[%s5629_s1 + $0x8c0] ss:$16 sps:$4 sm:$0xff]  }
  0xa3   :  { %2258 = vmatpush1.bf16.msra.mxu1 %v3897_v51  ;;  %v3989_v51 = vld [vmem:[%s5629_s1 + $0x4ec] ss:$16 sps:$4 sm:$0xff]  }
  0xa4   :  { %2135 = vmatpush1.bf16.msra.mxu0 %v3894_v50  ;;  %2259 = vmatprep.subr.bf16.mxu1 %v3905_v54  ;;  %v3986_v50 = vld [vmem:[%s5629_s1 + $0x8e4] ss:$16 sps:$4 sm:$0xff]   ;;  %v3987_v54 = vld [vmem:[%s5629_s1 + $0x4e8] ss:$16 sps:$4 sm:$0xff]  }
  0xa5   :  { %2136 = vmatprep.subr.bf16.mxu0 %v3902_v53  ;;  %v3984_v53 = vld [vmem:[%s5629_s1 + $0x8e0] ss:$16 sps:$4 sm:$0xff]  }
  0xa7   :  { %2260 = vmatpush1.bf16.msra.mxu1 %v3903_v56  ;;  %v3995_v56 = vld [vmem:[%s5629_s1 + $0x50c] ss:$16 sps:$4 sm:$0xff]  }
  0xa8   :  { %2137 = vmatpush1.bf16.msra.mxu0 %v3900_v55  ;;  %2261 = vmatprep.subr.bf16.mxu1 %v3911_v58  ;;  %v3992_v55 = vld [vmem:[%s5629_s1 + $0x904] ss:$16 sps:$4 sm:$0xff]   ;;  %v3993_v58 = vld [vmem:[%s5629_s1 + $0x508] ss:$16 sps:$4 sm:$0xff]  }
  0xa9   :  { %2138 = vmatprep.subr.bf16.mxu0 %v3908_v57  ;;  %v3990_v57 = vld [vmem:[%s5629_s1 + $0x900] ss:$16 sps:$4 sm:$0xff]  }
  0xab   :  { %2262 = vmatpush1.bf16.msra.mxu1 %v3909_v60  ;;  %v4001_v60 = vld [vmem:[%s5629_s1 + $0x52c] ss:$16 sps:$4 sm:$0xff]  }
  0xac   :  { %2139 = vmatpush1.bf16.msra.mxu0 %v3906_v59  ;;  %2263 = vmatprep.subr.bf16.mxu1 %v3917_v62  ;;  %v3998_v59 = vld [vmem:[%s5629_s1 + $0x924] ss:$16 sps:$4 sm:$0xff]   ;;  %v3999_v62 = vld [vmem:[%s5629_s1 + $0x528] ss:$16 sps:$4 sm:$0xff]  }
  0xad   :  { %2140 = vmatprep.subr.bf16.mxu0 %v3914_v61  ;;  %v3996_v61 = vld [vmem:[%s5629_s1 + $0x920] ss:$16 sps:$4 sm:$0xff]  }
  0xaf   :  { %2264 = vmatpush1.bf16.msra.mxu1 %v3915_v0  ;;  %v4007_v0 = vld [vmem:[%s5629_s1 + $0x54c] ss:$16 sps:$4 sm:$0xff]  }
  0xb0   :  { %2141 = vmatpush1.bf16.msra.mxu0 %v3912_v63  ;;  %2265 = vmatprep.subr.bf16.mxu1 %v3923_v2  ;;  %v4004_v63 = vld [vmem:[%s5629_s1 + $0x944] ss:$16 sps:$4 sm:$0xff]   ;;  %v4005_v2 = vld [vmem:[%s5629_s1 + $0x548] ss:$16 sps:$4 sm:$0xff]  }
  0xb1   :  { %2142 = vmatprep.subr.bf16.mxu0 %v3920_v1  ;;  %v4002_v1 = vld [vmem:[%s5629_s1 + $0x940] ss:$16 sps:$4 sm:$0xff]  }
  0xb3   :  { %2266 = vmatpush1.bf16.msra.mxu1 %v3921_v4  ;;  %v4013_v4 = vld [vmem:[%s5629_s1 + $0x56c] ss:$16 sps:$4 sm:$0xff]  }
  0xb4   :  { %2143 = vmatpush1.bf16.msra.mxu0 %v3918_v3  ;;  %2267 = vmatprep.subr.bf16.mxu1 %v3929_v6  ;;  %v4010_v3 = vld [vmem:[%s5629_s1 + $0x964] ss:$16 sps:$4 sm:$0xff]   ;;  %v4011_v6 = vld [vmem:[%s5629_s1 + $0x568] ss:$16 sps:$4 sm:$0xff]  }
  0xb5   :  { %2144 = vmatprep.subr.bf16.mxu0 %v3926_v5  ;;  %v4008_v5 = vld [vmem:[%s5629_s1 + $0x960] ss:$16 sps:$4 sm:$0xff]  }
  0xb7   :  { %2268 = vmatpush1.bf16.msra.mxu1 %v3927_v9  ;;  %v4019_v9 = vld [vmem:[%s5629_s1 + $0x58c] ss:$16 sps:$4 sm:$0xff]  }
  0xb8   :  { %2145 = vmatpush1.bf16.msra.mxu0 %v3924_v7  ;;  %2269 = vmatprep.subr.bf16.mxu1 %v3935_v12  ;;  %v4016_v7 = vld [vmem:[%s5629_s1 + $0x984] ss:$16 sps:$4 sm:$0xff]   ;;  %v4017_v12 = vld [vmem:[%s5629_s1 + $0x588] ss:$16 sps:$4 sm:$0xff]  }
  0xb9   :  { %2146 = vmatprep.subr.bf16.mxu0 %v3932_v10  ;;  %v4014_v10 = vld [vmem:[%s5629_s1 + $0x980] ss:$16 sps:$4 sm:$0xff]  }
  0xbb   :  { %2270 = vmatpush1.bf16.msra.mxu1 %v3933_v14  ;;  %v4025_v14 = vld [vmem:[%s5629_s1 + $0x5ac] ss:$16 sps:$4 sm:$0xff]  }
  0xbc   :  { %2147 = vmatpush1.bf16.msra.mxu0 %v3930_v13  ;;  %2271 = vmatprep.subr.bf16.mxu1 %v3941_v17  ;;  %v4022_v13 = vld [vmem:[%s5629_s1 + $0x9a4] ss:$16 sps:$4 sm:$0xff]   ;;  %v4023_v17 = vld [vmem:[%s5629_s1 + $0x5a8] ss:$16 sps:$4 sm:$0xff]  }
  0xbd   :  { %2148 = vmatprep.subr.bf16.mxu0 %v3938_v15  ;;  %v4020_v15 = vld [vmem:[%s5629_s1 + $0x9a0] ss:$16 sps:$4 sm:$0xff]  }
  0xbf   :  { %2272 = vmatpush1.bf16.msra.mxu1 %v3939_v19  ;;  %v4031_v19 = vld [vmem:[%s5629_s1 + $0x5cc] ss:$16 sps:$4 sm:$0xff]  }
  0xc0   :  { %2149 = vmatpush1.bf16.msra.mxu0 %v3936_v18  ;;  %2282 = vmatprep.subr.bf16.mxu1 %v3947_v22  ;;  %v4028_v18 = vld [vmem:[%s5629_s1 + $0x9c4] ss:$16 sps:$4 sm:$0xff]  }
  0xc1   :  { %2159 = vmatprep.subr.bf16.mxu0 %v3944_v20  ;;  %v4026_v20 = vld [vmem:[%s5629_s1 + $0x9c0] ss:$16 sps:$4 sm:$0xff]   ;;  %v4034_v22 = vld [vmem:[%s5629_s1 + $0x9e4] ss:$16 sps:$4 sm:$0xff]  }
  0xc2   :  { %2274 = vmatmul.mubr.bf16.vlgmr.msra.gmra.mrb[4].mxu1 %v4530_v11  ;;  %v3959_v11 = vld [vmem:[%s5629_s1 + $0x44c] ss:$16 sps:$4 sm:$0xff]  }
  0xc3   :  { %2151 = vmatmul.mubr.bf16.vlgmr.msra.gmra.mrb[0].mxu0 %v4939_v25  ;;  %2283 = vmatpush1.bf16.msra.mxu1 %v3945_v26  ;;  %v4035_v26 = vld [vmem:[%s5629_s1 + $0x5e8] ss:$16 sps:$4 sm:$0xff]  }
  0xc4   :  { %2160 = vmatpush1.bf16.msra.mxu0 %v3942_v24  ;;  %2284 = vmatprep.subr.bf16.mxu1 %v3953_v28  ;;  %v4037_v24 = vld [vmem:[%s5629_s1 + $0x5ec] ss:$16 sps:$4 sm:$0xff]  }
  0xc5   :  { %2161 = vmatprep.subr.bf16.mxu0 %v3950_v27  ;;  %2191 = vmatprep.mubr.bf16.mxu0 %v4953_v52  ;;  %v41_v27 = vld [vmem:[%s5630_s0 + $0x40] sm:$0xff]  ;;  %v4040_v28 = vld [vmem:[%s5629_s1 + $0x60c] ss:$16 sps:$4 sm:$0xff]  }
  0xc6   :  { %2314 = vmatprep.mubr.bf16.mxu1 %v4607_v36  ;;  %v3963_v36 = vld [vmem:[%s5629_s1 + $0x468] ss:$16 sps:$4 sm:$0xff]  }
  0xc7   :  { %2285 = vmatpush1.bf16.msra.mxu1 %v3951_v30  ;;  %v4038_v30 = vld [vmem:[%s5629_s1 + $0x608] ss:$16 sps:$4 sm:$0xff]  }
  0xc8   :  { %2162 = vmatpush1.bf16.msra.mxu0 %v3948_v29  ;;  %2286 = vmatprep.subr.bf16.mxu1 %v3959_v11  ;;  %v5139_v29 = vpack.c.bf16 %v41_v27, %v41_v27  ;;  %v4041_v11 = vld [vmem:[%s5629_s1 + $0x628] ss:$16 sps:$4 sm:$0xff]  }
  0xc9   :  { %2163 = vmatprep.subr.bf16.mxu0 %v3956_v31  ;;  %v4043_v31 = vld [vmem:[%s5629_s1 + $0x62c] ss:$16 sps:$4 sm:$0xff]   ;;  %v4080_v27 = vld [vmem:[%s5629_s1 + $0x7c8] ss:$16 sps:$4 sm:$0xff]  }
  0xcb   :  { %2287 = vmatpush1.bf16.msra.mxu1 %v3957_v33  ;;  %v4134_v33 = vld [vmem:[%s5631_s3] ss:$8 sps:$4 sm:$0xff]  }
  0xcc   :  { %2164 = vmatpush1.bf16.msra.mxu0 %v3954_v32  ;;  %2288 = vmatprep.subr.bf16.mxu1 %v3965_v35  ;;  %v4046_v32 = vld [vmem:[%s5629_s1 + $0x64c] ss:$16 sps:$4 sm:$0xff]   ;;  %v4044_v35 = vld [vmem:[%s5629_s1 + $0x648] ss:$16 sps:$4 sm:$0xff]  }
  0xcd   :  { %2165 = vmatprep.subr.bf16.mxu0 %v3962_v34  ;;  %v4139_v34 = vld [vmem:[%s5631_s3 + $0x14] ss:$8 sps:$4 sm:$0xff]  }
  0xcf   :  { %2289 = vmatpush1.bf16.msra.mxu1 %v3963_v36  ;;  %v4142_v36 = vld [vmem:[%s5631_s3 + $0x24] ss:$8 sps:$4 sm:$0xff]  }
  0xd0   :  { %2166 = vmatpush1.bf16.msra.mxu0 %v3960_v37  ;;  %2290 = vmatprep.subr.bf16.mxu1 %v3971_v39  ;;  %v4137_v37 = vld [vmem:[%s5631_s3 + $0x10] ss:$8 sps:$4 sm:$0xff]   ;;  %v4052_v39 = vld [vmem:[%s5629_s1 + $0x68c] ss:$16 sps:$4 sm:$0xff]  }
  0xd1   :  { %2167 = vmatprep.subr.bf16.mxu0 %v3968_v38  ;;  %v4047_v38 = vld [vmem:[%s5629_s1 + $0x668] ss:$16 sps:$4 sm:$0xff]  }
  0xd3   :  { %2291 = vmatpush1.bf16.msra.mxu1 %v3969_v41  ;;  %v4145_v41 = vld [vmem:[%s5631_s3 + $0x34] ss:$8 sps:$4 sm:$0xff]  }
  0xd4   :  { %2168 = vmatpush1.bf16.msra.mxu0 %v3966_v40  ;;  %2292 = vmatprep.subr.bf16.mxu1 %v3977_v43  ;;  %v4140_v40 = vld [vmem:[%s5631_s3 + $0x20] ss:$8 sps:$4 sm:$0xff]   ;;  %v4055_v43 = vld [vmem:[%s5629_s1 + $0x6ac] ss:$16 sps:$4 sm:$0xff]  }
  0xd5   :  { %2169 = vmatprep.subr.bf16.mxu0 %v3974_v42  ;;  %v4050_v42 = vld [vmem:[%s5629_s1 + $0x688] ss:$16 sps:$4 sm:$0xff]  }
  0xd7   :  { %2293 = vmatpush1.bf16.msra.mxu1 %v3975_v45  ;;  %v4148_v45 = vld [vmem:[%s5631_s3 + $0x44] ss:$8 sps:$4 sm:$0xff]  }
  0xd8   :  { %2170 = vmatpush1.bf16.msra.mxu0 %v3972_v44  ;;  %2294 = vmatprep.subr.bf16.mxu1 %v3983_v47  ;;  %v4143_v44 = vld [vmem:[%s5631_s3 + $0x30] ss:$8 sps:$4 sm:$0xff]   ;;  %v4058_v47 = vld [vmem:[%s5629_s1 + $0x6cc] ss:$16 sps:$4 sm:$0xff]  }
  0xd9   :  { %2171 = vmatprep.subr.bf16.mxu0 %v3980_v46  ;;  %v4053_v46 = vld [vmem:[%s5629_s1 + $0x6a8] ss:$16 sps:$4 sm:$0xff]  }
  0xdb   :  { %2295 = vmatpush1.bf16.msra.mxu1 %v3981_v49  ;;  %v4151_v49 = vld [vmem:[%s5631_s3 + $0x54] ss:$8 sps:$4 sm:$0xff]  }
  0xdc   :  { %2172 = vmatpush1.bf16.msra.mxu0 %v3978_v48  ;;  %2296 = vmatprep.subr.bf16.mxu1 %v3989_v51  ;;  %v4146_v48 = vld [vmem:[%s5631_s3 + $0x40] ss:$8 sps:$4 sm:$0xff]  }
  0xdd   :  { %2173 = vmatprep.subr.bf16.mxu0 %v3986_v50  ;;  %v4056_v51 = vld [vmem:[%s5629_s1 + $0x6c8] ss:$16 sps:$4 sm:$0xff]  }
  0xdf   :  { %2297 = vmatpush1.bf16.msra.mxu1 %v3987_v54  ;;  %v4061_v54 = vld [vmem:[%s5629_s1 + $0x6ec] ss:$16 sps:$4 sm:$0xff]  }
  0xe0   :  { %2174 = vmatpush1.bf16.msra.mxu0 %v3984_v53  ;;  %2298 = vmatprep.subr.bf16.mxu1 %v3995_v56  ;;  %v4154_v56 = vld [vmem:[%s5631_s3 + $0x64] ss:$8 sps:$4 sm:$0xff]  }
  0xe1   :  { %2175 = vmatprep.subr.bf16.mxu0 %v3992_v55  ;;  %v4149_v55 = vld [vmem:[%s5631_s3 + $0x50] ss:$8 sps:$4 sm:$0xff]  }
  0xe3   :  { %2299 = vmatpush1.bf16.msra.mxu1 %v3993_v58 }
  0xe4   :  { %2176 = vmatpush1.bf16.msra.mxu0 %v3990_v57  ;;  %2300 = vmatprep.subr.bf16.mxu1 %v4001_v60  ;;  %v4152_v60 = vld [vmem:[%s5631_s3 + $0x60] ss:$8 sps:$4 sm:$0xff]  }
  0xe5   :  { %2177 = vmatprep.subr.bf16.mxu0 %v3998_v59  ;;  %v4059_v59 = vld [vmem:[%s5629_s1 + $0x6e8] ss:$16 sps:$4 sm:$0xff]  }
  0xe7   :  { %2301 = vmatpush1.bf16.msra.mxu1 %v3999_v62  ;;  %v4157_v62 = vld [vmem:[%s5631_s3 + $0x74] ss:$8 sps:$4 sm:$0xff]  }
  0xe8   :  { %2178 = vmatpush1.bf16.msra.mxu0 %v3996_v61  ;;  %2302 = vmatprep.subr.bf16.mxu1 %v4007_v0  ;;  %v4064_v61 = vld [vmem:[%s5629_s1 + $0x70c] ss:$16 sps:$4 sm:$0xff]   ;;  %v4155_v0 = vld [vmem:[%s5631_s3 + $0x70] ss:$8 sps:$4 sm:$0xff]  }
  0xe9   :  { %2179 = vmatprep.subr.bf16.mxu0 %v4004_v63  ;;  %v4062_v63 = vld [vmem:[%s5629_s1 + $0x708] ss:$16 sps:$4 sm:$0xff]  }
  0xeb   :  { %2303 = vmatpush1.bf16.msra.mxu1 %v4005_v2  ;;  %v4160_v2 = vld [vmem:[%s5631_s3 + $0x84] ss:$8 sps:$4 sm:$0xff]  }
  0xec   :  { %2180 = vmatpush1.bf16.msra.mxu0 %v4002_v1  ;;  %2304 = vmatprep.subr.bf16.mxu1 %v4013_v4  ;;  %v4067_v1 = vld [vmem:[%s5629_s1 + $0x72c] ss:$16 sps:$4 sm:$0xff]   ;;  %v4158_v4 = vld [vmem:[%s5631_s3 + $0x80] ss:$8 sps:$4 sm:$0xff]  }
  0xed   :  { %2181 = vmatprep.subr.bf16.mxu0 %v4010_v3  ;;  %v4065_v3 = vld [vmem:[%s5629_s1 + $0x728] ss:$16 sps:$4 sm:$0xff]  }
  0xef   :  { %2305 = vmatpush1.bf16.msra.mxu1 %v4011_v6  ;;  %v4163_v6 = vld [vmem:[%s5631_s3 + $0x94] ss:$8 sps:$4 sm:$0xff]  }
  0xf0   :  { %2182 = vmatpush1.bf16.msra.mxu0 %v4008_v5  ;;  %2306 = vmatprep.subr.bf16.mxu1 %v4019_v9  ;;  %v4070_v5 = vld [vmem:[%s5629_s1 + $0x74c] ss:$16 sps:$4 sm:$0xff]   ;;  %v4161_v9 = vld [vmem:[%s5631_s3 + $0x90] ss:$8 sps:$4 sm:$0xff]  }
  0xf1   :  { %2183 = vmatprep.subr.bf16.mxu0 %v4016_v7  ;;  %v4068_v7 = vld [vmem:[%s5629_s1 + $0x748] ss:$16 sps:$4 sm:$0xff]  }
  0xf3   :  { %2307 = vmatpush1.bf16.msra.mxu1 %v4017_v12  ;;  %v4166_v12 = vld [vmem:[%s5631_s3 + $0xa4] ss:$8 sps:$4 sm:$0xff]  }
  0xf4   :  { %2184 = vmatpush1.bf16.msra.mxu0 %v4014_v10  ;;  %2308 = vmatprep.subr.bf16.mxu1 %v4025_v14  ;;  %v4073_v10 = vld [vmem:[%s5629_s1 + $0x76c] ss:$16 sps:$4 sm:$0xff]   ;;  %v4164_v14 = vld [vmem:[%s5631_s3 + $0xa0] ss:$8 sps:$4 sm:$0xff]  }
  0xf5   :  { %2185 = vmatprep.subr.bf16.mxu0 %v4022_v13  ;;  %v4071_v13 = vld [vmem:[%s5629_s1 + $0x768] ss:$16 sps:$4 sm:$0xff]  }
  0xf7   :  { %2309 = vmatpush1.bf16.msra.mxu1 %v4023_v17  ;;  %v4169_v17 = vld [vmem:[%s5631_s3 + $0xb4] ss:$8 sps:$4 sm:$0xff]  }
  0xf8   :  { %2186 = vmatpush1.bf16.msra.mxu0 %v4020_v15  ;;  %2310 = vmatprep.subr.bf16.mxu1 %v4031_v19  ;;  %v4076_v15 = vld [vmem:[%s5629_s1 + $0x78c] ss:$16 sps:$4 sm:$0xff]   ;;  %v4167_v19 = vld [vmem:[%s5631_s3 + $0xb0] ss:$8 sps:$4 sm:$0xff]  }
  0xf9   :  { %2187 = vmatprep.subr.bf16.mxu0 %v4028_v18  ;;  %v4074_v18 = vld [vmem:[%s5629_s1 + $0x788] ss:$16 sps:$4 sm:$0xff]  }
  0xfb   :  { %2311 = vmatpush1.bf16.msra.mxu1 %v4029_v21  ;;  %v4172_v21 = vld [vmem:[%s5631_s3 + $0xc4] ss:$8 sps:$4 sm:$0xff]  }
  0xfc   :  { %2188 = vmatpush1.bf16.msra.mxu0 %v4026_v20  ;;  %2312 = vmatprep.subr.bf16.mxu1 %v4037_v24  ;;  %v4079_v20 = vld [vmem:[%s5629_s1 + $0x7ac] ss:$16 sps:$4 sm:$0xff]   ;;  %v4170_v24 = vld [vmem:[%s5631_s3 + $0xc0] ss:$8 sps:$4 sm:$0xff]  }
  0xfd   :  { %2189 = vmatprep.subr.bf16.mxu0 %v4034_v22  ;;  %v4077_v22 = vld [vmem:[%s5629_s1 + $0x7a8] ss:$16 sps:$4 sm:$0xff]  }
  0xff   :  { %2313 = vmatpush1.bf16.msra.mxu1 %v4035_v26  ;;  %v4175_v26 = vld [vmem:[%s5631_s3 + $0xd4] ss:$8 sps:$4 sm:$0xff]  }
 0x100   :  { %2190 = vmatpush1.bf16.msra.mxu0 %v4032_v8  ;;  %2323 = vmatprep.subr.bf16.mxu1 %v4040_v28  ;;  %v4082_v8 = vld [vmem:[%s5629_s1 + $0x7cc] ss:$16 sps:$4 sm:$0xff]   ;;  %v4173_v28 = vld [vmem:[%s5631_s3 + $0xd0] ss:$8 sps:$4 sm:$0xff]  }
 0x102   :  { %2315 = vmatmul.mubr.bf16.vlgmr.msra.gmra.mrb[4].mxu1 %v4730_v16  ;;  %v4136_v16 = vld [vmem:[%s5631_s3 + $0x4] ss:$8 sps:$4 sm:$0xff]  }
 0x103   :  { %2192 = vmatmul.mubr.bf16.vlgmr.msra.gmra.mrb[0].mxu0 %v5139_v29  ;;  %2324 = vmatpush1.bf16.msra.mxu1 %v4038_v30  ;;  %v4085_v30 = vld [vmem:[%s5629_s1 + $0x7ec] ss:$16 sps:$4 sm:$0xff]  }
 0x104   :  { %2355 = vmatprep.mubr.bf16.mxu1 %v4752_v23  ;;  %2325 = vmatprep.subr.bf16.mxu1 %v4043_v31  ;;  %v4049_v23 = vld [vmem:[%s5629_s1 + $0x66c] ss:$16 sps:$4 sm:$0xff]  }
 0x105   :  { %2805 = vmatprep.subr.bf16.mxu0 %v4136_v16  ;;  %v4178_v31 = vld [vmem:[%s5631_s3 + $0xe4] ss:$8 sps:$4 sm:$0xff]   ;;  %v4086_v16 = vld [vmem:[%s5629_s1 + $0x808] ss:$16 sps:$4 sm:$0xff]  }
 0x106   :  { %2806 = vmatpush1.bf16.msra.mxu0 %v4134_v33  ;;  %v4088_v33 = vld [vmem:[%s5629_s1 + $0x80c] ss:$16 sps:$4 sm:$0xff]  }
 0x107   :  { %2326 = vmatpush1.bf16.msra.mxu1 %v4041_v11  ;;  %2807 = vmatprep.subr.bf16.mxu0 %v4139_v34  ;;  %v4083_v11 = vld [vmem:[%s5629_s1 + $0x7e8] ss:$16 sps:$4 sm:$0xff]   ;;  %v4091_v34 = vld [vmem:[%s5629_s1 + $0x82c] ss:$16 sps:$4 sm:$0xff]  }
 0x108   :  { %2327 = vmatprep.subr.bf16.mxu1 %v4046_v32  ;;  %v4176_v32 = vld [vmem:[%s5631_s3 + $0xe0] ss:$8 sps:$4 sm:$0xff]  }
 0x10a   :  { %2808 = vmatpush1.bf16.msra.mxu0 %v4137_v37  ;;  %v4092_v37 = vld [vmem:[%s5629_s1 + $0x848] ss:$16 sps:$4 sm:$0xff]  }
 0x10b   :  { %2328 = vmatpush1.bf16.msra.mxu1 %v4044_v35  ;;  %2809 = vmatprep.subr.bf16.mxu0 %v4142_v36  ;;  %v4089_v35 = vld [vmem:[%s5629_s1 + $0x828] ss:$16 sps:$4 sm:$0xff]   ;;  %v4100_v36 = vld [vmem:[%s5629_s1 + $0x88c] ss:$16 sps:$4 sm:$0xff]  }
 0x10c   :  { %2329 = vmatprep.subr.bf16.mxu1 %v4049_v23  ;;  %v4094_v23 = vld [vmem:[%s5629_s1 + $0x84c] ss:$16 sps:$4 sm:$0xff]  }
 0x10e   :  { %2810 = vmatpush1.bf16.msra.mxu0 %v4140_v40  ;;  %v4101_v40 = vld [vmem:[%s5629_s1 + $0x8a8] ss:$16 sps:$4 sm:$0xff]  }
 0x10f   :  { %2330 = vmatpush1.bf16.msra.mxu1 %v4047_v38  ;;  %2811 = vmatprep.subr.bf16.mxu0 %v4145_v41  ;;  %v4098_v38 = vld [vmem:[%s5629_s1 + $0x888] ss:$16 sps:$4 sm:$0xff]   ;;  %v4106_v41 = vld [vmem:[%s5629_s1 + $0x8cc] ss:$16 sps:$4 sm:$0xff]  }
 0x110   :  { %2331 = vmatprep.subr.bf16.mxu1 %v4052_v39  ;;  %v4103_v39 = vld [vmem:[%s5629_s1 + $0x8ac] ss:$16 sps:$4 sm:$0xff]  }
 0x112   :  { %2812 = vmatpush1.bf16.msra.mxu0 %v4143_v44  ;;  %v4179_v44 = vld [vmem:[%s5631_s3 + $0xf0] ss:$8 sps:$4 sm:$0xff]  }
 0x113   :  { %2332 = vmatpush1.bf16.msra.mxu1 %v4050_v42  ;;  %2813 = vmatprep.subr.bf16.mxu0 %v4148_v45  ;;  %v4181_v42 = vld [vmem:[%s5631_s3 + $0xf4] ss:$8 sps:$4 sm:$0xff]  }
 0x114   :  { %2333 = vmatprep.subr.bf16.mxu1 %v4055_v43  ;;  %v4104_v43 = vld [vmem:[%s5629_s1 + $0x8c8] ss:$16 sps:$4 sm:$0xff]   ;;  %v4109_v45 = vld [vmem:[%s5629_s1 + $0x8ec] ss:$16 sps:$4 sm:$0xff]  }
 0x115   :  { %v5213_v50 = vpop.f32.mrb[0].mxu1 }
 0x116   :  { %v5218_v53 = vpop.f32.mrb[1].mxu1  ;;  %2814 = vmatpush1.bf16.msra.mxu0 %v4146_v48  ;;  %v4184_v48 = vld [vmem:[%s5631_s3 + $0x104] ss:$8 sps:$4 sm:$0xff]  }
 0x117   :  { %v2033_v57 = vpop.f32.mrb[2].mxu1  ;;  %2334 = vmatpush1.bf16.msra.mxu1 %v4053_v46  ;;  %2815 = vmatprep.subr.bf16.mxu0 %v4151_v49  ;;  %v4107_v46 = vld [vmem:[%s5629_s1 + $0x8e8] ss:$16 sps:$4 sm:$0xff]  }
 0x118   :  { %v2034_v58 = vpop.f32.mrb[3].mxu1  ;;  %2335 = vmatprep.subr.bf16.mxu1 %v4058_v47  ;;  %v4112_v47 = vld [vmem:[%s5629_s1 + $0x90c] ss:$16 sps:$4 sm:$0xff]   ;;  %v4110_v49 = vld [vmem:[%s5629_s1 + $0x908] ss:$16 sps:$4 sm:$0xff]  }
 0x119   :  { %v4121_v57 = vld [vmem:[%s5629_s1 + $0x96c] ss:$16 sps:$4 sm:$0xff]   ;;  %v4119_v58 = vld [vmem:[%s5629_s1 + $0x968] ss:$16 sps:$4 sm:$0xff]  }
 0x11a   :  { %2816 = vmatpush1.bf16.msra.mxu0 %v4149_v55  ;;  %v4118_v55 = vld [vmem:[%s5629_s1 + $0x94c] ss:$16 sps:$4 sm:$0xff]  }
 0x11b   :  { %2336 = vmatpush1.bf16.msra.mxu1 %v4056_v51  ;;  %2817 = vmatprep.subr.bf16.mxu0 %v4154_v56  ;;  %v4115_v51 = vld [vmem:[%s5629_s1 + $0x92c] ss:$16 sps:$4 sm:$0xff]   ;;  %v4116_v56 = vld [vmem:[%s5629_s1 + $0x948] ss:$16 sps:$4 sm:$0xff]  }
 0x11c   :  { %2337 = vmatprep.subr.bf16.mxu1 %v4061_v54  ;;  %v4113_v54 = vld [vmem:[%s5629_s1 + $0x928] ss:$16 sps:$4 sm:$0xff]  }
 0x11e   :  { %2818 = vmatpush1.bf16.msra.mxu0 %v4152_v60  ;;  %v4122_v60 = vld [vmem:[%s5629_s1 + $0x988] ss:$16 sps:$4 sm:$0xff]  }
 0x11f   :  { %2338 = vmatpush1.bf16.msra.mxu1 %v4059_v59  ;;  %2819 = vmatprep.subr.bf16.mxu0 %v4157_v62  ;;  %v4124_v59 = vld [vmem:[%s5629_s1 + $0x98c] ss:$16 sps:$4 sm:$0xff]   ;;  %v4125_v62 = vld [vmem:[%s5629_s1 + $0x9a8] ss:$16 sps:$4 sm:$0xff]  }
 0x120   :  { %2339 = vmatprep.subr.bf16.mxu1 %v4064_v61  ;;  %v4127_v61 = vld [vmem:[%s5629_s1 + $0x9ac] ss:$16 sps:$4 sm:$0xff]  }
 0x122   :  { %2820 = vmatpush1.bf16.msra.mxu0 %v4155_v0  ;;  %v4128_v0 = vld [vmem:[%s5629_s1 + $0x9c8] ss:$16 sps:$4 sm:$0xff]  }
 0x123   :  { %2340 = vmatpush1.bf16.msra.mxu1 %v4062_v63  ;;  %2821 = vmatprep.subr.bf16.mxu0 %v4160_v2  ;;  %v4130_v63 = vld [vmem:[%s5629_s1 + $0x9cc] ss:$16 sps:$4 sm:$0xff]   ;;  %v4131_v2 = vld [vmem:[%s5629_s1 + $0x9e8] ss:$16 sps:$4 sm:$0xff]  }
 0x124   :  { %2341 = vmatprep.subr.bf16.mxu1 %v4067_v1  ;;  %v4133_v1 = vld [vmem:[%s5629_s1 + $0x9ec] ss:$16 sps:$4 sm:$0xff]  }
 0x126   :  { %2822 = vmatpush1.bf16.msra.mxu0 %v4158_v4 }
 0x127   :  { %2342 = vmatpush1.bf16.msra.mxu1 %v4065_v3  ;;  %2823 = vmatprep.subr.bf16.mxu0 %v4163_v6  ;;  %v375_v3 = vlaneseq  ;;  %v5445_v6 = vld [vmem:[%s5632_s2] sm:$0xf] }
 0x128   :  { %2343 = vmatprep.subr.bf16.mxu1 %v4070_v5 }
 0x129   :  { %v5439_v4 = vshrl.u32 %v375_v3, 7  ;;  %v4234_v3 = vld [vmem:[%s5633_s5 + $0x50] sm:$0xff]  }
 0x12a   :  { %2824 = vmatpush1.bf16.msra.mxu0 %v4161_v9 }
 0x12b   :  { %2344 = vmatpush1.bf16.msra.mxu1 %v4068_v7  ;;  %2825 = vmatprep.subr.bf16.mxu0 %v4166_v12  ;;  %v377_v5 = vsub.s32 0, %v5439_v4  ;;  %v381_v7 = vsub.s32 1, %v5439_v4 }
 0x12c   :  { %2345 = vmatprep.subr.bf16.mxu1 %v4073_v10 }
 0x12d   :  { %v378_v9 = vrot.slane %v5445_v6, %v377_v5 }
 0x12e   :  { %2826 = vmatpush1.bf16.msra.mxu0 %v4164_v14 }
 0x12f   :  { %2346 = vmatpush1.bf16.msra.mxu1 %v4071_v13  ;;  %2827 = vmatprep.subr.bf16.mxu0 %v4169_v17  ;;  %v2030_v10 = vadd.f32 %v5213_v50, %v378_v9  ;;  %v4185_v50 = vld [vmem:[%s5631_s3 + $0x110] ss:$8 sps:$4 sm:$0xff]  }
 0x130   :  { %2347 = vmatprep.subr.bf16.mxu1 %v4076_v15  ;;  %v4236_v9 = vld [vmem:[%s5633_s5 + $0x58] sm:$0xff]  }
 0x132   :  { %2828 = vmatpush1.bf16.msra.mxu0 %v4167_v19 }
 0x133   :  { %2348 = vmatpush1.bf16.msra.mxu1 %v4074_v18  ;;  %2829 = vmatprep.subr.bf16.mxu0 %v4172_v21  ;;  %v4182_v21 = vld [vmem:[%s5631_s3 + $0x100] ss:$8 sps:$4 sm:$0xff]  }
 0x134   :  { %2349 = vmatprep.subr.bf16.mxu1 %v4079_v20 }
 0x136   :  { %2830 = vmatpush1.bf16.msra.mxu0 %v4170_v24  ;;  %v4187_v24 = vld [vmem:[%s5631_s3 + $0x114] ss:$8 sps:$4 sm:$0xff]  }
 0x137   :  { %2350 = vmatpush1.bf16.msra.mxu1 %v4077_v22  ;;  %2831 = vmatprep.subr.bf16.mxu0 %v4175_v26  ;;  %v4193_v26 = vld [vmem:[%s5631_s3 + $0x134] ss:$8 sps:$4 sm:$0xff]  }
 0x138   :  { %2351 = vmatprep.subr.bf16.mxu1 %v4082_v8  ;;  %v4188_v8 = vld [vmem:[%s5631_s3 + $0x120] ss:$8 sps:$4 sm:$0xff]  }
 0x13a   :  { %2832 = vmatpush1.bf16.msra.mxu0 %v4173_v28  ;;  %v4196_v28 = vld [vmem:[%s5631_s3 + $0x144] ss:$8 sps:$4 sm:$0xff]  }
 0x13b   :  { %2352 = vmatpush1.bf16.msra.mxu1 %v4080_v27  ;;  %2833 = vmatprep.subr.bf16.mxu0 %v4178_v31  ;;  %v4191_v27 = vld [vmem:[%s5631_s3 + $0x130] ss:$8 sps:$4 sm:$0xff]   ;;  %v4199_v31 = vld [vmem:[%s5631_s3 + $0x154] ss:$8 sps:$4 sm:$0xff]  }
 0x13c   :  { %2353 = vmatprep.subr.bf16.mxu1 %v4085_v30  ;;  %v4194_v30 = vld [vmem:[%s5631_s3 + $0x140] ss:$8 sps:$4 sm:$0xff]  }
 0x13e   :  { %2834 = vmatpush1.bf16.msra.mxu0 %v4176_v32  ;;  %v4202_v32 = vld [vmem:[%s5631_s3 + $0x164] ss:$8 sps:$4 sm:$0xff]  }
 0x13f   :  { %2354 = vmatpush1.bf16.msra.mxu1 %v4083_v11  ;;  %2835 = vmatprep.subr.bf16.mxu0 %v4181_v42  ;;  %v4197_v11 = vld [vmem:[%s5631_s3 + $0x150] ss:$8 sps:$4 sm:$0xff]   ;;  %v4223_v42 = vld [vmem:[%s5631_s3 + $0x1d4] ss:$8 sps:$4 sm:$0xff]  }
 0x140   :  { %2364 = vmatprep.subr.bf16.mxu1 %v4088_v33  ;;  %v4200_v33 = vld [vmem:[%s5631_s3 + $0x160] ss:$8 sps:$4 sm:$0xff]  }
 0x142   :  { %2356 = vmatmul.mubr.bf16.vlgmr.msra.gmra.mrb[4].mxu1 %v4939_v25  ;;  %v4097_v25 = vld [vmem:[%s5629_s1 + $0x86c] ss:$16 sps:$4 sm:$0xff]   ;;  %2836 = vmatpush1.bf16.msra.mxu0 %v4179_v44 }
 0x143   :  { %2365 = vmatpush1.bf16.msra.mxu1 %v4086_v16  ;;  %2396 = vmatprep.mubr.bf16.mxu1 %v4953_v52  ;;  %v4095_v52 = vld [vmem:[%s5629_s1 + $0x868] ss:$16 sps:$4 sm:$0xff]   ;;  %v4205_v16 = vld [vmem:[%s5631_s3 + $0x174] ss:$8 sps:$4 sm:$0xff]   ;;  %v4226_v44 = vld [vmem:[%s5631_s3 + $0x1e4] ss:$8 sps:$4 sm:$0xff]  }
 0x144   :  { %2366 = vmatprep.subr.bf16.mxu1 %v4091_v34  ;;  %2846 = vmatprep.subr.bf16.mxu0 %v4184_v48  ;;  %v4203_v34 = vld [vmem:[%s5631_s3 + $0x170] ss:$8 sps:$4 sm:$0xff]   ;;  %v4230_v48 = vld [vmem:[%s5633_s5 + $0x40] sm:$0xff]  }
 0x147   :  { %2367 = vmatpush1.bf16.msra.mxu1 %v4089_v35  ;;  %v4208_v35 = vld [vmem:[%s5631_s3 + $0x184] ss:$8 sps:$4 sm:$0xff]  }
 0x148   :  { %2368 = vmatprep.subr.bf16.mxu1 %v4094_v23  ;;  %v4206_v23 = vld [vmem:[%s5631_s3 + $0x180] ss:$8 sps:$4 sm:$0xff]  }
 0x14b   :  { %2369 = vmatpush1.bf16.msra.mxu1 %v4092_v37  ;;  %v4211_v37 = vld [vmem:[%s5631_s3 + $0x194] ss:$8 sps:$4 sm:$0xff]  }
 0x14c   :  { %2370 = vmatprep.subr.bf16.mxu1 %v4097_v25  ;;  %v4209_v25 = vld [vmem:[%s5631_s3 + $0x190] ss:$8 sps:$4 sm:$0xff]  }
 0x14f   :  { %2371 = vmatpush1.bf16.msra.mxu1 %v4095_v52  ;;  %v4214_v52 = vld [vmem:[%s5631_s3 + $0x1a4] ss:$8 sps:$4 sm:$0xff]  }
 0x150   :  { %2372 = vmatprep.subr.bf16.mxu1 %v4100_v36  ;;  %v4212_v36 = vld [vmem:[%s5631_s3 + $0x1a0] ss:$8 sps:$4 sm:$0xff]  }
 0x153   :  { %2373 = vmatpush1.bf16.msra.mxu1 %v4098_v38  ;;  %v4217_v38 = vld [vmem:[%s5631_s3 + $0x1b4] ss:$8 sps:$4 sm:$0xff]  }
 0x154   :  { %2374 = vmatprep.subr.bf16.mxu1 %v4103_v39  ;;  %v4215_v39 = vld [vmem:[%s5631_s3 + $0x1b0] ss:$8 sps:$4 sm:$0xff]  }
 0x157   :  { %2375 = vmatpush1.bf16.msra.mxu1 %v4101_v40  ;;  %v4220_v40 = vld [vmem:[%s5631_s3 + $0x1c4] ss:$8 sps:$4 sm:$0xff]  }
 0x158   :  { %2376 = vmatprep.subr.bf16.mxu1 %v4106_v41  ;;  %v4218_v41 = vld [vmem:[%s5631_s3 + $0x1c0] ss:$8 sps:$4 sm:$0xff]  }
 0x15b   :  { %2377 = vmatpush1.bf16.msra.mxu1 %v4104_v43  ;;  %v4221_v43 = vld [vmem:[%s5631_s3 + $0x1d0] ss:$8 sps:$4 sm:$0xff]  }
 0x15c   :  { %2378 = vmatprep.subr.bf16.mxu1 %v4109_v45  ;;  %v4224_v45 = vld [vmem:[%s5631_s3 + $0x1e0] ss:$8 sps:$4 sm:$0xff]  }
 0x15f   :  { %2379 = vmatpush1.bf16.msra.mxu1 %v4107_v46  ;;  %v4229_v46 = vld [vmem:[%s5631_s3 + $0x1f4] ss:$8 sps:$4 sm:$0xff]  }
 0x160   :  { %2380 = vmatprep.subr.bf16.mxu1 %v4112_v47  ;;  %v4227_v47 = vld [vmem:[%s5631_s3 + $0x1f0] ss:$8 sps:$4 sm:$0xff]  }
 0x163   :  { %2381 = vmatpush1.bf16.msra.mxu1 %v4110_v49  ;;  %v385_v49 = vsub.s32 2, %v5439_v4 }
 0x164   :  { %2382 = vmatprep.subr.bf16.mxu1 %v4115_v51  ;;  %v389_v51 = vsub.s32 3, %v5439_v4  ;;  %v4249_v4 = vld [vmem:[%s5634_s7 + $0x18] sm:$0xff]  }
 0x167   :  { %2383 = vmatpush1.bf16.msra.mxu1 %v4113_v54  ;;  %v386_v54 = vrot.slane %v5445_v6, %v385_v49 }
 0x168   :  { %2384 = vmatprep.subr.bf16.mxu1 %v4118_v55  ;;  %v390_v55 = vrot.slane %v5445_v6, %v389_v51 }
 0x16b   :  { %2385 = vmatpush1.bf16.msra.mxu1 %v4116_v56 }
 0x16c   :  { %2386 = vmatprep.subr.bf16.mxu1 %v4121_v57 }
 0x16f   :  { %2387 = vmatpush1.bf16.msra.mxu1 %v4119_v58 }
 0x170   :  { %2388 = vmatprep.subr.bf16.mxu1 %v4124_v59 }
 0x173   :  { %2389 = vmatpush1.bf16.msra.mxu1 %v4122_v60 }
 0x174   :  { %2390 = vmatprep.subr.bf16.mxu1 %v4127_v61 }
 0x177   :  { %2391 = vmatpush1.bf16.msra.mxu1 %v4125_v62 }
 0x178   :  { %2392 = vmatprep.subr.bf16.mxu1 %v4130_v63  ;;  %v4231_v63 = vld [vmem:[%s5633_s5] sm:$0xff]  }
 0x17b   :  { %2393 = vmatpush1.bf16.msra.mxu1 %v4128_v0 }
 0x17c   :  { %2394 = vmatprep.subr.bf16.mxu1 %v4133_v1  ;;  %v4232_v1 = vld [vmem:[%s5633_s5 + $0x48] sm:$0xff]  }
 0x17f   :  { %2395 = vmatpush1.bf16.msra.mxu1 %v4131_v2  ;;  %v4233_v2 = vld [vmem:[%s5633_s5 + $0x8] sm:$0xff]  }
 0x182   :  { %2397 = vmatmul.mubr.bf16.vlgmr.msra.gmra.mrb[4].mxu1 %v5139_v29  ;;  %v382_v29 = vrot.slane %v5445_v6, %v381_v7  ;;  %v4235_v6 = vld [vmem:[%s5633_s5 + $0x10] sm:$0xff]  }
 0x184   :  { %v2032_v12 = vadd.f32 %v5218_v53, %v382_v29  ;;  %v4190_v53 = vld [vmem:[%s5631_s3 + $0x124] ss:$8 sps:$4 sm:$0xff]   ;;  %v4237_v29 = vld [vmem:[%s5633_s5 + $0x18] sm:$0xff]  }
 0x1d6   :  { %v2193_v13 = vpop.f32.mrb[0].mxu0 }
 0x1d7   :  { %v3613_v14 = vadd.f32 %v2193_v13, %v2030_v10  ;;  %v2195_v15 = vpop.f32.mrb[1].mxu0  ;;  %v4238_v10 = vld [vmem:[%s5633_s5 + $0x60] sm:$0xff]   ;;  %v4240_v13 = vld [vmem:[%s5633_s5 + $0x68] sm:$0xff]  }
 0x1d8   :  { %v3615_v17 = vadd.f32 %v2195_v15, %v2032_v12  ;;  %v2197_v18 = vpop.f32.mrb[2].mxu0  ;;  %v4239_v12 = vld [vmem:[%s5633_s5 + $0x20] sm:$0xff]   ;;  %v4242_v15 = vld [vmem:[%s5633_s5 + $0x70] sm:$0xff]  }
 0x1d9   :  { %v2198_v19 = vpop.f32.mrb[3].mxu0  ;;  %v2405_v22 = vpack.c.bf16 %v3613_v14, %v3613_v14  ;;  %v4241_v14 = vld [vmem:[%s5633_s5 + $0x28] sm:$0xff]   ;;  %v4244_v18 = vld [vmem:[%s5633_s5 + $0x78] sm:$0xff]  }
 0x1da   :  { %v2406_v20 = vpack.c.bf16 %v3615_v17, %v3615_v17  ;;  %v4243_v17 = vld [vmem:[%s5633_s5 + $0x30] sm:$0xff]   ;;  %v4245_v19 = vld [vmem:[%s5633_s5 + $0x38] sm:$0xff]  }
 0x1dc   :  { %2837 = vmatprep.mubr.bf16.mxu0 %v2406_v20  ;;  %v4254_v20 = vmov 0.0  }
 0x1dd   :  { %2838 = vmatmul.mubr.bf16.vlgmr.msra.gmra.mrb[4].mxu0 %v2405_v22  ;;  %3600 = vmatprep.subr.bf16.mxu1 %v4254_v20  ;;  %v4247_v22 = vld [vmem:[%s5634_s7 + $0x8] sm:$0xff]  }
 0x1de   :  { %2847 = vmatpush1.bf16.msra.mxu0 %v4182_v21  ;;  %v4246_v21 = vld [vmem:[%s5634_s7] sm:$0xff]   ;;  %3608 = vmatprep.mubr.msk.bf16.mxu1 %vm4255_vm0, %v4254_v20 }
 0x1df   :  { %2848 = vmatprep.subr.bf16.mxu0 %v4187_v24  ;;  %3601 = vmatpush3.bf16.msra.mxu1 %v4246_v21  ;;  %v2473_v24 = vld [vmem:[%s5635_s4] sm:$0x3] }
 0x1e0   :  { %3602 = vmatprep.subr.bf16.mxu1 %v4254_v20 }
 0x1e2   :  { %2849 = vmatpush1.bf16.msra.mxu0 %v4185_v50  ;;  %v2478_v50 = vrot.slane %v2473_v24, %v377_v5 }
 0x1e3   :  { %2850 = vmatprep.subr.bf16.mxu0 %v4190_v53  ;;  %3603 = vmatpush3.bf16.msra.mxu1 %v4247_v22  ;;  %v2482_v53 = vrot.slane %v2473_v24, %v381_v7  ;;  %v3550_v7 = vld [vmem:[%s5636_s6] ss:$0 sm:$0xff] }
 0x1e4   :  { %3604 = vmatprep.subr.bf16.mxu1 %v4254_v20 }
 0x1e6   :  { %2851 = vmatpush1.bf16.msra.mxu0 %v4188_v8 }
 0x1e7   :  { %2852 = vmatprep.subr.bf16.mxu0 %v4193_v26 }
 0x1ea   :  { %2853 = vmatpush1.bf16.msra.mxu0 %v4191_v27 }
 0x1eb   :  { %2854 = vmatprep.subr.bf16.mxu0 %v4196_v28 }
 0x1ee   :  { %2855 = vmatpush1.bf16.msra.mxu0 %v4194_v30 }
 0x1ef   :  { %2856 = vmatprep.subr.bf16.mxu0 %v4199_v31 }
 0x1f2   :  { %2857 = vmatpush1.bf16.msra.mxu0 %v4197_v11 }
 0x1f3   :  { %2858 = vmatprep.subr.bf16.mxu0 %v4202_v32 }
 0x1f6   :  { %2859 = vmatpush1.bf16.msra.mxu0 %v4200_v33 }
 0x1f7   :  { %2860 = vmatprep.subr.bf16.mxu0 %v4205_v16 }
 0x1fa   :  { %2861 = vmatpush1.bf16.msra.mxu0 %v4203_v34  ;;  %v4248_v34 = vld [vmem:[%s5634_s7 + $0x10] sm:$0xff]  }
 0x1fb   :  { %2862 = vmatprep.subr.bf16.mxu0 %v4208_v35  ;;  %3605 = vmatpush3.bf16.msra.mxu1 %v4248_v34 }
 0x1fc   :  { %3606 = vmatprep.subr.bf16.mxu1 %v4254_v20 }
 0x1fe   :  { %2863 = vmatpush1.bf16.msra.mxu0 %v4206_v23 }
 0x1ff   :  { %2864 = vmatprep.subr.bf16.mxu0 %v4211_v37  ;;  %3607 = vmatpush3.bf16.msra.mxu1 %v4249_v4 }
 0x202   :  { %2865 = vmatpush1.bf16.msra.mxu0 %v4209_v25 }
 0x203   :  { %2866 = vmatprep.subr.bf16.mxu0 %v4214_v52 }
 0x206   :  { %2867 = vmatpush1.bf16.msra.mxu0 %v4212_v36 }
 0x207   :  { %2868 = vmatprep.subr.bf16.mxu0 %v4217_v38 }
 0x20a   :  { %2869 = vmatpush1.bf16.msra.mxu0 %v4215_v39  ;;  %v3567_v39 = vld [vmem:[%s5637_s8] ss:$0 sm:$0xff] }
 0x20b   :  { %2870 = vmatprep.subr.bf16.mxu0 %v4220_v40 }
 0x20e   :  { %2871 = vmatpush1.bf16.msra.mxu0 %v4218_v41 }
 0x20f   :  { %2872 = vmatprep.subr.bf16.mxu0 %v4223_v42 }
 0x212   :  { %2873 = vmatpush1.bf16.msra.mxu0 %v4221_v43 }
 0x213   :  { %2874 = vmatprep.subr.bf16.mxu0 %v4226_v44 }
 0x216   :  { %2875 = vmatpush1.bf16.msra.mxu0 %v4224_v45 }
 0x217   :  { %2876 = vmatprep.subr.bf16.mxu0 %v4229_v46 }
 0x21a   :  { %2877 = vmatpush1.bf16.msra.mxu0 %v4227_v47 }
 0x21b   :  { %3573 = vmatprep.subr.bf16.mxu0 %v4230_v48 }
 0x255   :  { %v2398_v56 = vpop.f32.mrb[4].mxu1 }
 0x256   :  { %v3616_v57 = vadd.f32 %v2398_v56, %v386_v54  ;;  %v2400_v58 = vpop.f32.mrb[5].mxu1 }
 0x257   :  { %v3617_v59 = vadd.f32 %v2400_v58, %v390_v55  ;;  %v2402_v60 = vpop.f32.mrb[6].mxu1 }
 0x258   :  { %v2403_v61 = vpop.f32.mrb[7].mxu1  ;;  %v2407_v0 = vpack.c.bf16 %v3616_v57, %v3616_v57 }
 0x259   :  { %v2408_v62 = vpack.c.bf16 %v3617_v59, %v3617_v59 }
 0x25b   :  { %2878 = vmatprep.mubr.bf16.mxu0 %v2408_v62 }
 0x25c   :  { %2879 = vmatmul.mubr.bf16.vlgmr.msra.gmra.mrb[4].mxu0 %v2407_v0 }
 0x25d   :  { %3574 = vmatpush3.bf16.msra.mxu0 %v4231_v63 }
 0x25e   :  { %3575 = vmatprep.subr.bf16.mxu0 %v4232_v1 }
 0x261   :  { %3576 = vmatpush3.bf16.msra.mxu0 %v4233_v2 }
 0x262   :  { %3577 = vmatprep.subr.bf16.mxu0 %v4234_v3 }
 0x265   :  { %3578 = vmatpush3.bf16.msra.mxu0 %v4235_v6 }
 0x266   :  { %3579 = vmatprep.subr.bf16.mxu0 %v4236_v9 }
 0x269   :  { %3580 = vmatpush3.bf16.msra.mxu0 %v4237_v29 }
 0x26a   :  { %3581 = vmatprep.subr.bf16.mxu0 %v4238_v10 }
 0x26d   :  { %3582 = vmatpush3.bf16.msra.mxu0 %v4239_v12 }
 0x26e   :  { %3583 = vmatprep.subr.bf16.mxu0 %v4240_v13 }
 0x271   :  { %3584 = vmatpush3.bf16.msra.mxu0 %v4241_v14 }
 0x272   :  { %3585 = vmatprep.subr.bf16.mxu0 %v4242_v15 }
 0x275   :  { %3586 = vmatpush3.bf16.msra.mxu0 %v4243_v17 }
 0x276   :  { %3587 = vmatprep.subr.bf16.mxu0 %v4244_v18 }
 0x279   :  { %3588 = vmatpush3.bf16.msra.mxu0 %v4245_v19 }
 0x32f   :  { %v2880_v8 = vpop.f32.mrb[4].mxu0 }
 0x330   :  { %v3618_v26 = vadd.f32 %v2880_v8, %v2478_v50  ;;  %v2882_v27 = vpop.f32.mrb[5].mxu0 }
 0x331   :  { %v3619_v28 = vadd.f32 %v2882_v27, %v2482_v53  ;;  %v2884_v30 = vpop.f32.mrb[6].mxu0 }
 0x332   :  { %v2887_v31 = vmax.f32 %v3618_v26, 0.0  ;;  %v2885_v11 = vpop.f32.mrb[7].mxu0 }
 0x333   :  { %v2888_v32 = vmax.f32 %v3619_v28, 0.0 }
 0x334   :  { %v2889_v16 = vpack.c.bf16 %v2887_v31, %v2887_v31 }
 0x335   :  { %v2890_v33 = vpack.c.bf16 %v2888_v32, %v2888_v32 }
 0x337   :  { %3058 = vmatprep.mubr.bf16.mxu0 %v2890_v33 }
 0x338   :  { %3059 = vmatmul.mubr.bf16.vlgmr.msra.gmra.mrb[8].mxu0 %v2889_v16 }
 0x40b   :  { %v3589_v5 = vpop.f32.mrb[8].mxu0 }
 0x40c   :  { %v3590_v35 = vpop.f32.mrb[9].mxu0 }
 0x40d   :  { %v3591_v23 = vadd.f32 %v3590_v35, %v3589_v5  ;;  %v3592_v37 = vpop.f32.mrb[10].mxu0 }
 0x40e   :  { %v3593_v25 = vpop.f32.mrb[11].mxu0 }
 0x40f   :  { %v3061_v52 = vadd.f32 %v3591_v23, %v3550_v7 }
 0x411   :  { %v3066_v36 = vmax.f32 %v3061_v52, 0.0 }
 0x413   :  { %v3067_v38 = vpack.c.bf16 %v3066_v36, %v3066_v36 }
 0x415   :  { %3609 = vmatmul.mubr.msk.bf16.vlgmr.msra.gmra.mrb[8].mxu1 %vm3107_vm1, %v3067_v38 }
 0x4e8   :  { %v3145_v40 = vpop.f32.mrb[8].mxu1 }
 0x4e9   :  { %v3146_v41 = vadd.f32 %v3567_v39, %v3145_v40  ;;  %v3610_v42 = vpop.f32.mrb[9].mxu1 }
 0x4ea   :  { %v3148_v43 = vpop.f32.mrb[10].mxu1 }
 0x4eb   :  { %v3151_v44 = vand.u32 2147483647, %v3146_v41  ;;  %v3611_v45 = vpop.f32.mrb[11].mxu1  ;;  %vm3158_vm2 = vcmp.ge.f32.partialorder %v3146_v41, 0.0 }
 0x4ed   :  { %v3152_v46 = vsub.f32 0.0, %v3151_v44 }
 0x4ef   :  { %v3153_v47 = vmul.f32 1.442695, %v3152_v46 }
 0x4f1   :  { %4250 = vpow2.f32 %v3153_v47 }
 0x4fb   :  { %v4251_v48 = vpop.eup %4250 }
 0x4fc   :  { %v3155_v49 = vadd.f32 1.0, %v4251_v48 }
 0x4fe   :  { %4252 = vrcp.f32 %v3155_v49 }
 0x508   :  { %v4253_v51 = vpop.eup %4252 }
 0x509   :  { %v3159_v54 = vmul.f32 %v4253_v51, %v4251_v48 }
 0x50b   :  { %v3160_v55 = vsel %vm3158_vm2, %v4253_v51, %v3159_v54 }
 0x50c   :  { %3161 = vst [vmem:[%s5638_s9] sm:$0xff] %v3160_v55 }

</bundles_post_ra>
